<compile_context>
chip_gen: v7x
topology: tpu7x:2x2x1
jax: 0.10.0
libtpu: 0.0.40
codegen_flags: <defaults>
</compile_context>

<pallas_src>
import functools

import jax
import jax.numpy as jnp
from jax.experimental import pallas as pl
from jax.experimental.pallas import tpu as pltpu


# ----------------------------------------------------------------------------
# Small helpers
# ----------------------------------------------------------------------------
def _round_up(x, m):
    return ((x + m - 1) // m) * m


def _pad2d(a, rows, cols):
    return jnp.pad(a, ((0, rows - a.shape[0]), (0, cols - a.shape[1])))


# ----------------------------------------------------------------------------
# Pallas kernels
# ----------------------------------------------------------------------------
def _matmul_bias_act_kernel(a_ref, w_ref, b_ref, o_ref, *, relu):
    """o = relu?(a @ w + b); a:(tm,K) w:(K,N) b:(1,N) o:(tm,N). MXU matmul."""
    acc = jnp.dot(a_ref[...], w_ref[...], preferred_element_type=jnp.float32)
    acc = acc + b_ref[...]
    if relu:
        acc = jnp.maximum(acc, 0.0)
    o_ref[...] = acc.astype(o_ref.dtype)


def _maxpool2x2_kernel(y_ref, o_ref):
    """y_ref: (2, Wo, 2, C) = (h-parity, pooled-w, w-parity, channel)."""
    y = y_ref[...]
    m = jnp.maximum(y[0], y[1])          # max over the two rows    -> (Wo, 2, C)
    o_ref[0] = jnp.max(m, axis=1)        # max over the two columns -> (Wo, C)


def _mlp_head_kernel(x_ref, w1_ref, b1_ref, w2_ref, b2_ref, w3_ref, b3_ref,
                     o_ref):
    """Fused fc1+ReLU, fc2+ReLU, fc3 with all weights VMEM-resident."""
    h = jnp.dot(x_ref[...], w1_ref[...],
                preferred_element_type=jnp.float32) + b1_ref[...]
    h = jnp.maximum(h, 0.0)
    h = jnp.dot(h, w2_ref[...],
                preferred_element_type=jnp.float32) + b2_ref[...]
    h = jnp.maximum(h, 0.0)
    o_ref[...] = jnp.dot(h, w3_ref[...],
                         preferred_element_type=jnp.float32) + b3_ref[...]


# ----------------------------------------------------------------------------
# Kernel wrappers
# ----------------------------------------------------------------------------
def matmul_bias_act_pallas(a, w, b, *, relu, tm=512):
    """relu?(a @ w + b).

    a: (M, K) f32; w: (Kp, Np) zero-padded with Kp >= K, Np multiple of 128;
    b: (1, Np). Tiled over M; weight/bias blocks stay resident across the grid.
    """
    m, k = a.shape
    kp, n = w.shape
    assert kp >= k and n % 128 == 0
    tm = min(tm, _round_up(m, 8))
    mp = _round_up(m, tm)
    if (mp, kp) != (m, k):
        a = jnp.pad(a, ((0, mp - m), (0, kp - k)))

    out = pl.pallas_call(
        functools.partial(_matmul_bias_act_kernel, relu=relu),
        out_shape=jax.ShapeDtypeStruct((mp, n), jnp.float32),
        grid=(mp // tm,),
        in_specs=[
            pl.BlockSpec((tm, kp), lambda i: (i, 0)),
            pl.BlockSpec((kp, n), lambda i: (0, 0)),   # VMEM-resident weight
            pl.BlockSpec((1, n), lambda i: (0, 0)),    # VMEM-resident bias
        ],
        out_specs=pl.BlockSpec((tm, n), lambda i: (i, 0)),
        compiler_params=pltpu.CompilerParams(
            dimension_semantics=("parallel",),
            vmem_limit_bytes=32 * 1024 * 1024,
        ),
        cost_estimate=pl.CostEstimate(
            flops=2 * mp * kp * n,
            transcendentals=0,
            bytes_accessed=4 * (mp * kp + kp * n + n + mp * n),
        ),
    )(a, w, b)
    return out if mp == m else out[:m]


def maxpool2x2_pallas(y):
    """y: (B, H, W, C) NHWC, H/W even, C multiple of 128 -> (B, H//2, W//2, C)."""
    b, h, w, c = y.shape
    ho, wo = h // 2, w // 2
    y = y.reshape(b * h, wo, 2, c)        # free reshape: split W into (Wo, 2)
    out = pl.pallas_call(
        _maxpool2x2_kernel,
        out_shape=jax.ShapeDtypeStruct((b * ho, wo, c), y.dtype),
        grid=(b * ho,),
        in_specs=[pl.BlockSpec((2, wo, 2, c), lambda i: (i, 0, 0, 0))],
        out_specs=pl.BlockSpec((1, wo, c), lambda i: (i, 0, 0)),
        compiler_params=pltpu.CompilerParams(
            dimension_semantics=("parallel",)),
    )(y)
    return out.reshape(b, ho, wo, c)


def mlp_head_pallas(x, w1, b1, w2, b2, w3, b3, *, tb=256):
    """Fused fc1+ReLU -> fc2+ReLU -> fc3 on padded, pre-transposed weights."""
    bsz, k1 = x.shape
    n1, n2, n3 = w1.shape[1], w2.shape[1], w3.shape[1]
    tb = min(tb, _round_up(bsz, 8))
    bp = _round_up(bsz, tb)
    if bp != bsz:
        x = jnp.pad(x, ((0, bp - bsz), (0, 0)))

    def resident(shape):
        return pl.BlockSpec(shape, lambda i: (0,) * len(shape))

    out = pl.pallas_call(
        _mlp_head_kernel,
        out_shape=jax.ShapeDtypeStruct((bp, n3), jnp.float32),
        grid=(bp // tb,),
        in_specs=[
            pl.BlockSpec((tb, k1), lambda i: (i, 0)),
            resident((k1, n1)), resident((1, n1)),
            resident((n1, n2)), resident((1, n2)),
            resident((n2, n3)), resident((1, n3)),
        ],
        out_specs=pl.BlockSpec((tb, n3), lambda i: (i, 0)),
        compiler_params=pltpu.CompilerParams(
            dimension_semantics=("parallel",),
            vmem_limit_bytes=32 * 1024 * 1024,
        ),
        cost_estimate=pl.CostEstimate(
            flops=2 * bp * (k1 * n1 + n1 * n2 + n2 * n3),
            transcendentals=0,
            bytes_accessed=4 * (bp * k1 + k1 * n1 + n1 * n2 + n2 * n3
                                + n1 + n2 + n3 + bp * n3),
        ),
    )(x, w1, b1, w2, b2, w3, b3)
    return out if bp == bsz else out[:bsz]


# ----------------------------------------------------------------------------
# JAX glue: im2col (NHWC, (kh, kw, c) feature order)
# ----------------------------------------------------------------------------
def _im2col_nhwc(x, k):
    """x: (B, H, W, C) NHWC -> ((B*OH*OW, K*K*C) patches, (B, OH, OW)).

    Feature order is (kh, kw, c), matching the weight layout produced by
    prepare_params (which absorbs the reordering of torch's (c, kh, kw))."""
    b, h, w, c = x.shape
    oh, ow = h - k + 1, w - k + 1
    slabs = [x[:, i:i + oh, j:j + ow, :] for i in range(k) for j in range(k)]
    p = jnp.stack(slabs, axis=3)                       # (B, OH, OW, K*K, C)
    return p.reshape(b * oh * ow, k * k * c), (b, oh, ow)


# ----------------------------------------------------------------------------
# Parameter preparation (one-time, outside the jitted forward)
# ----------------------------------------------------------------------------
def prepare_params(p):
    """Re-layout PyTorch-style params into kernel layout.

    * conv weights -> (k*k*cin, cout) in (kh, kw, c) order, zero-padded to
      (round_up(., 128), round_up(., 128)); biases -> (1, Npad).
    * fc1 columns permuted from torch's NCHW flatten order to the NHWC
      padded-channel flatten order produced by the forward pass.
    * fc2 / fc3 transposed to (in, out) and zero-padded to 128 lanes.
    Returns (kernel_params, meta)."""
    ksz = p["conv1_w"].shape[-1]
    c_in = p["conv1_w"].shape[1]
    c1 = p["conv1_w"].shape[0]
    c2 = p["conv2_w"].shape[0]
    f1 = p["fc1_w"].shape[0]
    f2 = p["fc2_w"].shape[0]
    ncls = p["fc3_w"].shape[0]
    s2 = int(round((p["fc1_w"].shape[1] // c2) ** 0.5))   # pooled spatial size

    c1_pad, c2_pad = _round_up(c1, 128), _round_up(c2, 128)
    c1_keep = _round_up(c1, 8)          # channels kept after pool1 for conv2
    f1_pad, f2_pad = _round_up(f1, 128), _round_up(f2, 128)
    n3_pad = _round_up(ncls, 128)

    kp = {}
    # conv1: (c1, c_in, k, k) -> (k*k*c_in, c1) in (kh, kw, c) order, padded.
    w = jnp.transpose(p["conv1_w"], (2, 3, 1, 0)).reshape(ksz * ksz * c_in, c1)
    kp["conv1_w"] = _pad2d(w, _round_up(w.shape[0], 128), c1_pad)
    kp["conv1_b"] = _pad2d(p["conv1_b"].reshape(1, c1), 1, c1_pad)

    # conv2: pad cin to c1_keep (those activation channels are zero), then
    # (k*k*c1_keep, c2), padded.
    w = jnp.transpose(p["conv2_w"], (2, 3, 1, 0))            # (k, k, c1, c2)
    w = jnp.pad(w, ((0, 0), (0, 0), (0, c1_keep - c1), (0, 0)))
    w = w.reshape(ksz * ksz * c1_keep, c2)
    kp["conv2_w"] = _pad2d(w, _round_up(w.shape[0], 128), c2_pad)
    kp["conv2_b"] = _pad2d(p["conv2_b"].reshape(1, c2), 1, c2_pad)

    # fc1: torch flattens NCHW (c, h, w); the kernel flattens NHWC with padded
    # channels (h, w, c_pad).  Permute + pad the columns accordingly.
    w = p["fc1_w"].reshape(f1, c2, s2, s2)                   # (out, c, h, w)
    w = jnp.transpose(w, (2, 3, 1, 0))                       # (h, w, c, out)
    w = jnp.pad(w, ((0, 0), (0, 0), (0, c2_pad - c2), (0, f1_pad - f1)))
    kp["fc1_w"] = w.reshape(s2 * s2 * c2_pad, f1_pad)
    kp["fc1_b"] = _pad2d(p["fc1_b"].reshape(1, f1), 1, f1_pad)

    kp["fc2_w"] = _pad2d(p["fc2_w"].T, f1_pad, f2_pad)
    kp["fc2_b"] = _pad2d(p["fc2_b"].reshape(1, f2), 1, f2_pad)
    kp["fc3_w"] = _pad2d(p["fc3_w"].T, f2_pad, n3_pad)
    kp["fc3_b"] = _pad2d(p["fc3_b"].reshape(1, ncls), 1, n3_pad)

    meta = {"ksize": ksz, "c1_keep": c1_keep, "num_classes": ncls}
    return kp, meta


# ----------------------------------------------------------------------------
# LeNet forward
# ----------------------------------------------------------------------------
def lenet_forward(x, kp, *, meta):
    """x: (B, 3, 32, 32) float32, NCHW (PyTorch layout)."""
    k = meta["ksize"]
    x = jnp.transpose(x, (0, 2, 3, 1))                        # -> NHWC

    # conv1 + relu1 (lane-dense padded channels), then pool1
    p, (b, oh, ow) = _im2col_nhwc(x, k)
    y = matmul_bias_act_pallas(p, kp["conv1_w"], kp["conv1_b"], relu=True)
    y = maxpool2x2_pallas(y.reshape(b, oh, ow, -1))           # (B, 14, 14, 128)

    # conv2 + relu2, then pool2 (keep only the real channels, rounded to 8;
    # the extra slots are exactly zero and hit zero weight rows)
    y = y[..., : meta["c1_keep"]]
    p, (b, oh, ow) = _im2col_nhwc(y, k)
    y = matmul_bias_act_pallas(p, kp["conv2_w"], kp["conv2_b"], relu=True)
    y = maxpool2x2_pallas(y.reshape(b, oh, ow, -1))           # (B, 5, 5, 128)

    # flatten in NHWC padded-channel order; fc1 weights were pre-permuted from
    # torch's NCHW flatten order, and padded channels hit zero weight rows.
    y = y.reshape(b, -1)                                      # (B, 3200)

    # fused fc1+relu3 / fc2+relu4 / fc3
    y = mlp_head_pallas(y, kp["fc1_w"], kp["fc1_b"], kp["fc2_w"], kp["fc2_b"],
                        kp["fc3_w"], kp["fc3_b"])
    return y[:, : meta["num_classes"]]


# ----------------------------------------------------------------------------
# Parameter init (PyTorch-layout, deterministic)
# ----------------------------------------------------------------------------
def init_params(key, w=1):
    """PyTorch-style U(-1/sqrt(fan_in), 1/sqrt(fan_in)) init, torch layouts."""
    w = int(w)

    def uni(k, shape, fan_in):
        bound = 1.0 / jnp.sqrt(jnp.float32(fan_in))
        return jax.random.uniform(k, shape, jnp.float32, -bound, bound)

    keys = jax.random.split(key, 10)
    p = {}
    p["conv1_w"] = uni(keys[0], (6 * w, 3, 5, 5), 3 * 5 * 5)
    p["conv1_b"] = uni(keys[1], (6 * w,), 3 * 5 * 5)
    p["conv2_w"] = uni(keys[2], (16 * w, 6 * w, 5, 5), 6 * w * 5 * 5)
    p["conv2_b"] = uni(keys[3], (16 * w,), 6 * w * 5 * 5)
    p["fc1_w"] = uni(keys[4], (120 * w, 16 * 5 * 5 * w), 16 * 5 * 5 * w)
    p["fc1_b"] = uni(keys[5], (120 * w,), 16 * 5 * 5 * w)
    p["fc2_w"] = uni(keys[6], (84 * w, 120 * w), 120 * w)
    p["fc2_b"] = uni(keys[7], (84 * w,), 120 * w)
    p["fc3_w"] = uni(keys[8], (10, 84 * w), 84 * w)
    p["fc3_b"] = uni(keys[9], (10,), 84 * w)
    return p


if __name__ == "__main__":
    key = jax.random.PRNGKey(0)
    k_params, k_x = jax.random.split(key)

    params = init_params(k_params, w=1)
    kparams, meta = prepare_params(params)     # one-time weight re-layout

    # CIFAR-10 style input: fc1's 16*5*5 requires 32x32 spatial.
    x = jax.random.normal(k_x, (2, 3, 32, 32), jnp.float32)

    fwd = jax.jit(functools.partial(lenet_forward, meta=meta))
    out = jax.block_until_ready(fwd(x, kparams))
    assert out.shape == (2, 10) and out.dtype == jnp.float32
    print("KERNEL_OK")
</pallas_src>

<mosaic_0001>
module attributes {stable_mosaic.version = 11 : i64} {
  func.func @_matmul_bias_act_kernel(%arg0: i32, %arg1: memref<512x128xf32, #tpu.memory_space<vmem>>, %arg2: memref<128x128xf32, #tpu.memory_space<vmem>>, %arg3: memref<1x128xf32, #tpu.memory_space<vmem>>, %arg4: memref<512x128xf32, #tpu.memory_space<vmem>>) attributes {dimension_semantics = [#tpu.dimension_semantics<parallel>], iteration_bounds = array<i64: 4>, scalar_prefetch = 0 : i64, scratch_operands = 0 : i64, tpu.core_type = #tpu.core_type<tc>, window_params = [{transform_indices = @transform_0, window_bounds = array<i64: 512, 128>}, {pipeline_mode = #tpu.pipeline_mode<synchronous>, transform_indices = @transform_1, window_bounds = array<i64: 128, 128>}, {pipeline_mode = #tpu.pipeline_mode<synchronous>, transform_indices = @transform_2, window_bounds = array<i64: 1, 128>}, {transform_indices = @transform_3, window_bounds = array<i64: 512, 128>}]} {
    %c0 = arith.constant 0 : index
    %c0_0 = arith.constant 0 : index
    %0 = vector.load %arg1[%c0, %c0_0] : memref<512x128xf32, #tpu.memory_space<vmem>>, vector<512x128xf32>
    %c0_1 = arith.constant 0 : index
    %c0_2 = arith.constant 0 : index
    %1 = vector.load %arg2[%c0_1, %c0_2] : memref<128x128xf32, #tpu.memory_space<vmem>>, vector<128x128xf32>
    %cst = arith.constant dense<0.000000e+00> : vector<512x128xf32>
    %2 = tpu.matmul %0, %1, %cst {dimension_numbers = #tpu.dot_dimension_numbers<[1], [0], [0], [1], [0, 0, 1, 1], [], []>} : vector<512x128xf32>, vector<128x128xf32>, vector<512x128xf32> -> vector<512x128xf32>
    %c0_3 = arith.constant 0 : index
    %c0_4 = arith.constant 0 : index
    %3 = vector.load %arg3[%c0_3, %c0_4] : memref<1x128xf32, #tpu.memory_space<vmem>>, vector<1x128xf32>
    %4 = vector.broadcast %3 : vector<1x128xf32> to vector<512x128xf32>
    %5 = arith.addf %2, %4 : vector<512x128xf32>
    %cst_5 = arith.constant 0.000000e+00 : f32
    %6 = vector.broadcast %cst_5 : f32 to vector<512x128xf32>
    %7 = arith.maximumf %5, %6 : vector<512x128xf32>
    %c0_6 = arith.constant 0 : index
    %c0_7 = arith.constant 0 : index
    %8 = vector.load %arg4[%c0_6, %c0_7] : memref<512x128xf32, #tpu.memory_space<vmem>>, vector<512x128xf32>
    tpu.vector_store %arg4[%c0_6, %c0_7], %7 {strides = array<i32>} : memref<512x128xf32, #tpu.memory_space<vmem>>, vector<512x128xf32>,
    return
  }
  func.func @transform_0(%arg0: i32) -> (i32, i32) {
    %c0_i32 = arith.constant 0 : i32
    %c0_i32_0 = arith.constant 0 : i32
    return %arg0, %c0_i32 : i32, i32
  }
  func.func @transform_1(%arg0: i32) -> (i32, i32) {
    %c0_i32 = arith.constant 0 : i32
    %c0_i32_0 = arith.constant 0 : i32
    %c0_i32_1 = arith.constant 0 : i32
    return %c0_i32, %c0_i32_0 : i32, i32
  }
  func.func @transform_2(%arg0: i32) -> (i32, i32) {
    %c0_i32 = arith.constant 0 : i32
    %c0_i32_0 = arith.constant 0 : i32
    %c0_i32_1 = arith.constant 0 : i32
    return %c0_i32, %c0_i32_0 : i32, i32
  }
  func.func @transform_3(%arg0: i32) -> (i32, i32) {
    %c0_i32 = arith.constant 0 : i32
    %c0_i32_0 = arith.constant 0 : i32
    return %arg0, %c0_i32 : i32, i32
  }
}

module attributes {stable_mosaic.version = 11 : i64} {
  func.func @_maxpool2x2_kernel(%arg0: i32, %arg1: memref<2x14x2x128xf32, #tpu.memory_space<vmem>>, %arg2: memref<1x14x128xf32, #tpu.memory_space<vmem>>) attributes {dimension_semantics = [#tpu.dimension_semantics<parallel>], iteration_bounds = array<i64: 28>, scalar_prefetch = 0 : i64, scratch_operands = 0 : i64, tpu.core_type = #tpu.core_type<tc>, window_params = [{transform_indices = @transform_0, window_bounds = array<i64: 2, 14, 2, 128>}, {transform_indices = @transform_1, window_bounds = array<i64: 1, 14, 128>}]} {
    %c0 = arith.constant 0 : index
    %c0_0 = arith.constant 0 : index
    %c0_1 = arith.constant 0 : index
    %c0_2 = arith.constant 0 : index
    %0 = vector.load %arg1[%c0, %c0_0, %c0_1, %c0_2] : memref<2x14x2x128xf32, #tpu.memory_space<vmem>>, vector<2x14x2x128xf32>
    %1 = vector.extract_strided_slice %0 {offsets = [0, 0, 0, 0], sizes = [1, 14, 2, 128], strides = [1, 1, 1, 1]} : vector<2x14x2x128xf32> to vector<1x14x2x128xf32>
    %2 = vector.shape_cast %1 : vector<1x14x2x128xf32> to vector<14x2x128xf32>
    %3 = vector.extract_strided_slice %0 {offsets = [1, 0, 0, 0], sizes = [1, 14, 2, 128], strides = [1, 1, 1, 1]} : vector<2x14x2x128xf32> to vector<1x14x2x128xf32>
    %4 = vector.shape_cast %3 : vector<1x14x2x128xf32> to vector<14x2x128xf32>
    %5 = arith.maximumf %2, %4 : vector<14x2x128xf32>
    %cst = arith.constant dense<0xFF800000> : vector<14x128xf32>
    %6 = vector.multi_reduction <maximumf>, %5, %cst [1] : vector<14x2x128xf32> to vector<14x128xf32>
    %c0_3 = arith.constant 0 : index
    %c0_4 = arith.constant 0 : index
    %c0_5 = arith.constant 0 : index
    %7 = vector.load %arg2[%c0_3, %c0_4, %c0_5] : memref<1x14x128xf32, #tpu.memory_space<vmem>>, vector<1x14x128xf32>
    %8 = vector.shape_cast %7 : vector<1x14x128xf32> to vector<14x128xf32>
    %9 = vector.shape_cast %6 : vector<14x128xf32> to vector<1x14x128xf32>
    tpu.vector_store %arg2[%c0_3, %c0_4, %c0_5], %9 {strides = array<i32>} : memref<1x14x128xf32, #tpu.memory_space<vmem>>, vector<1x14x128xf32>,
    return
  }
  func.func @transform_0(%arg0: i32) -> (i32, i32, i32, i32) {
    %c0_i32 = arith.constant 0 : i32
    %c0_i32_0 = arith.constant 0 : i32
    %c0_i32_1 = arith.constant 0 : i32
    %c0_i32_2 = arith.constant 0 : i32
    return %arg0, %c0_i32, %c0_i32_0, %c0_i32_1 : i32, i32, i32, i32
  }
  func.func @transform_1(%arg0: i32) -> (i32, i32, i32) {
    %c0_i32 = arith.constant 0 : i32
    %c0_i32_0 = arith.constant 0 : i32
    %c0_i32_1 = arith.constant 0 : i32
    return %arg0, %c0_i32, %c0_i32_0 : i32, i32, i32
  }
}

module attributes {stable_mosaic.version = 11 : i64} {
  func.func @_matmul_bias_act_kernel(%arg0: i32, %arg1: memref<200x256xf32, #tpu.memory_space<vmem>>, %arg2: memref<256x128xf32, #tpu.memory_space<vmem>>, %arg3: memref<1x128xf32, #tpu.memory_space<vmem>>, %arg4: memref<200x128xf32, #tpu.memory_space<vmem>>) attributes {dimension_semantics = [#tpu.dimension_semantics<parallel>], iteration_bounds = array<i64: 1>, scalar_prefetch = 0 : i64, scratch_operands = 0 : i64, tpu.core_type = #tpu.core_type<tc>, window_params = [{transform_indices = @transform_0, window_bounds = array<i64: 200, 256>}, {pipeline_mode = #tpu.pipeline_mode<synchronous>, transform_indices = @transform_1, window_bounds = array<i64: 256, 128>}, {pipeline_mode = #tpu.pipeline_mode<synchronous>, transform_indices = @transform_2, window_bounds = array<i64: 1, 128>}, {transform_indices = @transform_3, window_bounds = array<i64: 200, 128>}]} {
    %c0 = arith.constant 0 : index
    %c0_0 = arith.constant 0 : index
    %0 = vector.load %arg1[%c0, %c0_0] : memref<200x256xf32, #tpu.memory_space<vmem>>, vector<200x256xf32>
    %c0_1 = arith.constant 0 : index
    %c0_2 = arith.constant 0 : index
    %1 = vector.load %arg2[%c0_1, %c0_2] : memref<256x128xf32, #tpu.memory_space<vmem>>, vector<256x128xf32>
    %cst = arith.constant dense<0.000000e+00> : vector<200x128xf32>
    %2 = tpu.matmul %0, %1, %cst {dimension_numbers = #tpu.dot_dimension_numbers<[1], [0], [0], [1], [0, 0, 1, 1], [], []>} : vector<200x256xf32>, vector<256x128xf32>, vector<200x128xf32> -> vector<200x128xf32>
    %c0_3 = arith.constant 0 : index
    %c0_4 = arith.constant 0 : index
    %3 = vector.load %arg3[%c0_3, %c0_4] : memref<1x128xf32, #tpu.memory_space<vmem>>, vector<1x128xf32>
    %4 = vector.broadcast %3 : vector<1x128xf32> to vector<200x128xf32>
    %5 = arith.addf %2, %4 : vector<200x128xf32>
    %cst_5 = arith.constant 0.000000e+00 : f32
    %6 = vector.broadcast %cst_5 : f32 to vector<200x128xf32>
    %7 = arith.maximumf %5, %6 : vector<200x128xf32>
    %c0_6 = arith.constant 0 : index
    %c0_7 = arith.constant 0 : index
    %8 = vector.load %arg4[%c0_6, %c0_7] : memref<200x128xf32, #tpu.memory_space<vmem>>, vector<200x128xf32>
    tpu.vector_store %arg4[%c0_6, %c0_7], %7 {strides = array<i32>} : memref<200x128xf32, #tpu.memory_space<vmem>>, vector<200x128xf32>,
    return
  }
  func.func @transform_0(%arg0: i32) -> (i32, i32) {
    %c0_i32 = arith.constant 0 : i32
    %c0_i32_0 = arith.constant 0 : i32
    return %arg0, %c0_i32 : i32, i32
  }
  func.func @transform_1(%arg0: i32) -> (i32, i32) {
    %c0_i32 = arith.constant 0 : i32
    %c0_i32_0 = arith.constant 0 : i32
    %c0_i32_1 = arith.constant 0 : i32
    return %c0_i32, %c0_i32_0 : i32, i32
  }
  func.func @transform_2(%arg0: i32) -> (i32, i32) {
    %c0_i32 = arith.constant 0 : i32
    %c0_i32_0 = arith.constant 0 : i32
    %c0_i32_1 = arith.constant 0 : i32
    return %c0_i32, %c0_i32_0 : i32, i32
  }
  func.func @transform_3(%arg0: i32) -> (i32, i32) {
    %c0_i32 = arith.constant 0 : i32
    %c0_i32_0 = arith.constant 0 : i32
    return %arg0, %c0_i32 : i32, i32
  }
}

module attributes {stable_mosaic.version = 11 : i64} {
  func.func @_maxpool2x2_kernel(%arg0: i32, %arg1: memref<2x5x2x128xf32, #tpu.memory_space<vmem>>, %arg2: memref<1x5x128xf32, #tpu.memory_space<vmem>>) attributes {dimension_semantics = [#tpu.dimension_semantics<parallel>], iteration_bounds = array<i64: 10>, scalar_prefetch = 0 : i64, scratch_operands = 0 : i64, tpu.core_type = #tpu.core_type<tc>, window_params = [{transform_indices = @transform_0, window_bounds = array<i64: 2, 5, 2, 128>}, {transform_indices = @transform_1, window_bounds = array<i64: 1, 5, 128>}]} {
    %c0 = arith.constant 0 : index
    %c0_0 = arith.constant 0 : index
    %c0_1 = arith.constant 0 : index
    %c0_2 = arith.constant 0 : index
    %0 = vector.load %arg1[%c0, %c0_0, %c0_1, %c0_2] : memref<2x5x2x128xf32, #tpu.memory_space<vmem>>, vector<2x5x2x128xf32>
    %1 = vector.extract_strided_slice %0 {offsets = [0, 0, 0, 0], sizes = [1, 5, 2, 128], strides = [1, 1, 1, 1]} : vector<2x5x2x128xf32> to vector<1x5x2x128xf32>
    %2 = vector.shape_cast %1 : vector<1x5x2x128xf32> to vector<5x2x128xf32>
    %3 = vector.extract_strided_slice %0 {offsets = [1, 0, 0, 0], sizes = [1, 5, 2, 128], strides = [1, 1, 1, 1]} : vector<2x5x2x128xf32> to vector<1x5x2x128xf32>
    %4 = vector.shape_cast %3 : vector<1x5x2x128xf32> to vector<5x2x128xf32>
    %5 = arith.maximumf %2, %4 : vector<5x2x128xf32>
    %cst = arith.constant dense<0xFF800000> : vector<5x128xf32>
    %6 = vector.multi_reduction <maximumf>, %5, %cst [1] : vector<5x2x128xf32> to vector<5x128xf32>
    %c0_3 = arith.constant 0 : index
    %c0_4 = arith.constant 0 : index
    %c0_5 = arith.constant 0 : index
    %7 = vector.load %arg2[%c0_3, %c0_4, %c0_5] : memref<1x5x128xf32, #tpu.memory_space<vmem>>, vector<1x5x128xf32>
    %8 = vector.shape_cast %7 : vector<1x5x128xf32> to vector<5x128xf32>
    %9 = vector.shape_cast %6 : vector<5x128xf32> to vector<1x5x128xf32>
    tpu.vector_store %arg2[%c0_3, %c0_4, %c0_5], %9 {strides = array<i32>} : memref<1x5x128xf32, #tpu.memory_space<vmem>>, vector<1x5x128xf32>,
    return
  }
  func.func @transform_0(%arg0: i32) -> (i32, i32, i32, i32) {
    %c0_i32 = arith.constant 0 : i32
    %c0_i32_0 = arith.constant 0 : i32
    %c0_i32_1 = arith.constant 0 : i32
    %c0_i32_2 = arith.constant 0 : i32
    return %arg0, %c0_i32, %c0_i32_0, %c0_i32_1 : i32, i32, i32, i32
  }
  func.func @transform_1(%arg0: i32) -> (i32, i32, i32) {
    %c0_i32 = arith.constant 0 : i32
    %c0_i32_0 = arith.constant 0 : i32
    %c0_i32_1 = arith.constant 0 : i32
    return %arg0, %c0_i32, %c0_i32_0 : i32, i32, i32
  }
}

module attributes {stable_mosaic.version = 11 : i64} {
  func.func @_mlp_head_kernel(%arg0: i32, %arg1: memref<8x3200xf32, #tpu.memory_space<vmem>>, %arg2: memref<3200x128xf32, #tpu.memory_space<vmem>>, %arg3: memref<1x128xf32, #tpu.memory_space<vmem>>, %arg4: memref<128x128xf32, #tpu.memory_space<vmem>>, %arg5: memref<1x128xf32, #tpu.memory_space<vmem>>, %arg6: memref<128x128xf32, #tpu.memory_space<vmem>>, %arg7: memref<1x128xf32, #tpu.memory_space<vmem>>, %arg8: memref<8x128xf32, #tpu.memory_space<vmem>>) attributes {dimension_semantics = [#tpu.dimension_semantics<parallel>], iteration_bounds = array<i64: 1>, scalar_prefetch = 0 : i64, scratch_operands = 0 : i64, tpu.core_type = #tpu.core_type<tc>, window_params = [{transform_indices = @transform_0, window_bounds = array<i64: 8, 3200>}, {pipeline_mode = #tpu.pipeline_mode<synchronous>, transform_indices = @transform_1, window_bounds = array<i64: 3200, 128>}, {pipeline_mode = #tpu.pipeline_mode<synchronous>, transform_indices = @transform_2, window_bounds = array<i64: 1, 128>}, {pipeline_mode = #tpu.pipeline_mode<synchronous>, transform_indices = @transform_3, window_bounds = array<i64: 128, 128>}, {pipeline_mode = #tpu.pipeline_mode<synchronous>, transform_indices = @transform_4, window_bounds = array<i64: 1, 128>}, {pipeline_mode = #tpu.pipeline_mode<synchronous>, transform_indices = @transform_5, window_bounds = array<i64: 128, 128>}, {pipeline_mode = #tpu.pipeline_mode<synchronous>, transform_indices = @transform_6, window_bounds = array<i64: 1, 128>}, {transform_indices = @transform_7, window_bounds = array<i64: 8, 128>}]} {
    %c0 = arith.constant 0 : index
    %c0_0 = arith.constant 0 : index
    %0 = vector.load %arg1[%c0, %c0_0] : memref<8x3200xf32, #tpu.memory_space<vmem>>, vector<8x3200xf32>
    %c0_1 = arith.constant 0 : index
    %c0_2 = arith.constant 0 : index
    %1 = vector.load %arg2[%c0_1, %c0_2] : memref<3200x128xf32, #tpu.memory_space<vmem>>, vector<3200x128xf32>
    %cst = arith.constant dense<0.000000e+00> : vector<8x128xf32>
    %2 = tpu.matmul %0, %1, %cst {dimension_numbers = #tpu.dot_dimension_numbers<[1], [0], [0], [1], [0, 0, 1, 1], [], []>} : vector<8x3200xf32>, vector<3200x128xf32>, vector<8x128xf32> -> vector<8x128xf32>
    %c0_3 = arith.constant 0 : index
    %c0_4 = arith.constant 0 : index
    %3 = vector.load %arg3[%c0_3, %c0_4] : memref<1x128xf32, #tpu.memory_space<vmem>>, vector<1x128xf32>
    %4 = vector.broadcast %3 : vector<1x128xf32> to vector<8x128xf32>
    %5 = arith.addf %2, %4 : vector<8x128xf32>
    %cst_5 = arith.constant 0.000000e+00 : f32
    %6 = vector.broadcast %cst_5 : f32 to vector<8x128xf32>
    %7 = arith.maximumf %5, %6 : vector<8x128xf32>
    %c0_6 = arith.constant 0 : index
    %c0_7 = arith.constant 0 : index
    %8 = vector.load %arg4[%c0_6, %c0_7] : memref<128x128xf32, #tpu.memory_space<vmem>>, vector<128x128xf32>
    %cst_8 = arith.constant dense<0.000000e+00> : vector<8x128xf32>
    %9 = tpu.matmul %7, %8, %cst_8 {dimension_numbers = #tpu.dot_dimension_numbers<[1], [0], [0], [1], [0, 0, 1, 1], [], []>} : vector<8x128xf32>, vector<128x128xf32>, vector<8x128xf32> -> vector<8x128xf32>
    %c0_9 = arith.constant 0 : index
    %c0_10 = arith.constant 0 : index
    %10 = vector.load %arg5[%c0_9, %c0_10] : memref<1x128xf32, #tpu.memory_space<vmem>>, vector<1x128xf32>
    %11 = vector.broadcast %10 : vector<1x128xf32> to vector<8x128xf32>
    %12 = arith.addf %9, %11 : vector<8x128xf32>
    %cst_11 = arith.constant 0.000000e+00 : f32
    %13 = vector.broadcast %cst_11 : f32 to vector<8x128xf32>
    %14 = arith.maximumf %12, %13 : vector<8x128xf32>
    %c0_12 = arith.constant 0 : index
    %c0_13 = arith.constant 0 : index
    %15 = vector.load %arg6[%c0_12, %c0_13] : memref<128x128xf32, #tpu.memory_space<vmem>>, vector<128x128xf32>
    %cst_14 = arith.constant dense<0.000000e+00> : vector<8x128xf32>
    %16 = tpu.matmul %14, %15, %cst_14 {dimension_numbers = #tpu.dot_dimension_numbers<[1], [0], [0], [1], [0, 0, 1, 1], [], []>} : vector<8x128xf32>, vector<128x128xf32>, vector<8x128xf32> -> vector<8x128xf32>
    %c0_15 = arith.constant 0 : index
    %c0_16 = arith.constant 0 : index
    %17 = vector.load %arg7[%c0_15, %c0_16] : memref<1x128xf32, #tpu.memory_space<vmem>>, vector<1x128xf32>
    %18 = vector.broadcast %17 : vector<1x128xf32> to vector<8x128xf32>
    %19 = arith.addf %16, %18 : vector<8x128xf32>
    %c0_17 = arith.constant 0 : index
    %c0_18 = arith.constant 0 : index
    %20 = vector.load %arg8[%c0_17, %c0_18] : memref<8x128xf32, #tpu.memory_space<vmem>>, vector<8x128xf32>
    tpu.vector_store %arg8[%c0_17, %c0_18], %19 {strides = array<i32>} : memref<8x128xf32, #tpu.memory_space<vmem>>, vector<8x128xf32>,
    return
  }
  func.func @transform_0(%arg0: i32) -> (i32, i32) {
    %c0_i32 = arith.constant 0 : i32
    %c0_i32_0 = arith.constant 0 : i32
    return %arg0, %c0_i32 : i32, i32
  }
  func.func @transform_1(%arg0: i32) -> (i32, i32) {
    %c0_i32 = arith.constant 0 : i32
    %c0_i32_0 = arith.constant 0 : i32
    %c0_i32_1 = arith.constant 0 : i32
    return %c0_i32, %c0_i32_0 : i32, i32
  }
  func.func @transform_2(%arg0: i32) -> (i32, i32) {
    %c0_i32 = arith.constant 0 : i32
    %c0_i32_0 = arith.constant 0 : i32
    %c0_i32_1 = arith.constant 0 : i32
    return %c0_i32, %c0_i32_0 : i32, i32
  }
  func.func @transform_3(%arg0: i32) -> (i32, i32) {
    %c0_i32 = arith.constant 0 : i32
    %c0_i32_0 = arith.constant 0 : i32
    %c0_i32_1 = arith.constant 0 : i32
    return %c0_i32, %c0_i32_0 : i32, i32
  }
  func.func @transform_4(%arg0: i32) -> (i32, i32) {
    %c0_i32 = arith.constant 0 : i32
    %c0_i32_0 = arith.constant 0 : i32
    %c0_i32_1 = arith.constant 0 : i32
    return %c0_i32, %c0_i32_0 : i32, i32
  }
  func.func @transform_5(%arg0: i32) -> (i32, i32) {
    %c0_i32 = arith.constant 0 : i32
    %c0_i32_0 = arith.constant 0 : i32
    %c0_i32_1 = arith.constant 0 : i32
    return %c0_i32, %c0_i32_0 : i32, i32
  }
  func.func @transform_6(%arg0: i32) -> (i32, i32) {
    %c0_i32 = arith.constant 0 : i32
    %c0_i32_0 = arith.constant 0 : i32
    %c0_i32_1 = arith.constant 0 : i32
    return %c0_i32, %c0_i32_0 : i32, i32
  }
  func.func @transform_7(%arg0: i32) -> (i32, i32) {
    %c0_i32 = arith.constant 0 : i32
    %c0_i32_0 = arith.constant 0 : i32
    return %arg0, %c0_i32 : i32, i32
  }
}

</mosaic_0001>

<bundles_post_ra>
// kernel: lenet_forward.6
= control target key start
LH: loop header
LB: loop body
LE: loop exit
PB: predicated region body
PF: predicated region fallthrough
CT: control target
= control target key end

     0   :  { %s394_s6 = smov 0   ;;  %s531_s0 = inlined_call_operand.vmem [shape: f32[56,14,2,128], index: 0, kind: input, shape index: {}]   ;;  %s532_s1 = inlined_call_operand.vmem [shape: f32[28,14,128], index: 1, kind: output, shape index: {}]  }
   0x1 LB: > { %s400_s7 = sadd.s32 4294967295, %s382_s6   ;;  %p359_p0 = scmp.ge.s32.totalorder %s382_s6, 1  ;;  %s382_s6 = sphi %s394_s6, %s11_s6  }
   0x2   : > { %p89_p1 = scmp.lt.s32.totalorder %s382_s6, 29 }
   0x4   : > { %p90_p2 = pnand %p359_p0, %p89_p1 }
   0x5   : > { %s360_s8 = sshll.u32 (!%p90_p2), %s400_s7, 1  ;;  %vm164_vm0 = vcmask (!%p90_p2), 1041408   ;;  %vm277_vm1 = vcmask (!%p90_p2), 1041409   ;;  %vm279_vm2 = vcmask (!%p90_p2), 1042434   ;;  %vm281_vm3 = vcmask (!%p90_p2), 1043459   ;;  %p117_p4 = scmp.lt.s32.totalorder (!%p90_p2), %s400_s7, 27 }
   0x6   : > { %93 = sbr.rel (%p90_p2) target bundleno = 60 (0x3c), region = 24  ;;  %p111_p3 = scmp.lt.s32.totalorder (!%p90_p2), %s360_s8, 55  ;;  %vm283_vm4 = vcmask (!%p90_p2), 1044484   ;;  %vm285_vm5 = vcmask (!%p90_p2), 1045509   ;;  %vm287_vm6 = vcmask (!%p90_p2), 1046534   ;;  %vm289_vm7 = vcmask (!%p90_p2), 1047559  }
   0xd   : > { %s534_s8 = smov (!%p111_p3, %s360_s8), 55  ;;  %s536_s7 = smov (!%p117_p4, %s400_s7), 27 }
   0xe   : > { %s367_s9 = smul.u32 28, %s534_s8  ;;  %s366_s13 = sshll.u32 %s536_s7, 4 }
   0xf   : > { %s121_s16 = scalar_lea.vmem %s532_s1, %s366_s13 }
  0x10   : > { %s408_s12 = scalar_lea.vmem %s531_s0, %s367_s9 }
  0x11   : > { %v122_v0 = vld [vmem:[%s408_s12] sm:$0x3]  ;;  %v123_v1 = vld [vmem:[%s408_s12 + $0x2] sm:$0x3]  ;;  %v124_v2 = vld [vmem:[%s408_s12 + $0x4] sm:$0x3] }
  0x12   : > { %v125_v3 = vld [vmem:[%s408_s12 + $0x6] sm:$0x3]  ;;  %v126_v4 = vld [vmem:[%s408_s12 + $0x8] sm:$0x3]  ;;  %v127_v5 = vld [vmem:[%s408_s12 + $0xa] sm:$0x3] }
  0x13   : > { %v128_v6 = vld [vmem:[%s408_s12 + $0xc] sm:$0x3]  ;;  %v129_v7 = vld [vmem:[%s408_s12 + $0xe] sm:$0x3]  ;;  %v419_v8 = vld [vmem:[%s408_s12 + $0x10] sm:$0x3] }
  0x14   : > { %v422_v9 = vld [vmem:[%s408_s12 + $0x12] sm:$0x3]  ;;  %v425_v10 = vld [vmem:[%s408_s12 + $0x14] sm:$0x3]  ;;  %v428_v11 = vld [vmem:[%s408_s12 + $0x16] sm:$0x3] }
  0x15   : > { %v431_v12 = vld [vmem:[%s408_s12 + $0x18] sm:$0x3]  ;;  %v136_v13 = vld [vmem:[%s408_s12 + $0x1c] sm:$0x3]  ;;  %v435_v14 = vld [vmem:[%s408_s12 + $0x1a] sm:$0x3] }
  0x16   : > { %v137_v15 = vld [vmem:[%s408_s12 + $0x1e] sm:$0x3]  ;;  %v138_v16 = vld [vmem:[%s408_s12 + $0x20] sm:$0x3]  ;;  %v139_v17 = vld [vmem:[%s408_s12 + $0x22] sm:$0x3]  ;;  %v150_v18 = vmax.f32 %v122_v0, %v136_v13 }
  0x17   : > { %v140_v19 = vld [vmem:[%s408_s12 + $0x24] sm:$0x3]  ;;  %v141_v20 = vld [vmem:[%s408_s12 + $0x26] sm:$0x3]  ;;  %v142_v21 = vld [vmem:[%s408_s12 + $0x28] sm:$0x3]  ;;  %v151_v22 = vmax.f32 %v123_v1, %v137_v15  ;;  %v152_v23 = vmax.f32 %v124_v2, %v138_v16  ;;  %v153_v27 = vmax.f32 %v125_v3, %v139_v17 }
  0x18   : > { %v143_v24 = vld [vmem:[%s408_s12 + $0x2a] sm:$0x3]  ;;  %v445_v25 = vld [vmem:[%s408_s12 + $0x2c] sm:$0x3]  ;;  %v448_v26 = vld [vmem:[%s408_s12 + $0x2e] sm:$0x3]  ;;  %v154_v28 = vmax.f32 %v126_v4, %v140_v19  ;;  %v155_v29 = vmax.f32 %v127_v5, %v141_v20  ;;  %v156_v33 = vmax.f32 %v128_v6, %v142_v21 }
  0x19   : > { %v451_v30 = vld [vmem:[%s408_s12 + $0x30] sm:$0x3]  ;;  %v454_v31 = vld [vmem:[%s408_s12 + $0x32] sm:$0x3]  ;;  %v457_v32 = vld [vmem:[%s408_s12 + $0x34] sm:$0x3]  ;;  %v157_v34 = vmax.f32 %v129_v7, %v143_v24  ;;  %v158_v35 = vmax.f32 %v419_v8, %v445_v25  ;;  %v159_v36 = vmax.f32 %v422_v9, %v448_v26 }
  0x1a   : > { %v464_v37 = vld [vmem:[%s408_s12 + $0x36] sm:$0x3]  ;;  %v160_v38 = vmax.f32 %v425_v10, %v451_v30  ;;  %v161_v39 = vmax.f32 %v428_v11, %v454_v31  ;;  %v162_v40 = vmax.f32 %v431_v12, %v457_v32  ;;  %v165_v41 = vsel %vm164_vm0, %v150_v18, -inf }
  0x1b   : > { %v163_v42 = vmax.f32 %v435_v14, %v464_v37  ;;  %v166_v43 = vrot.slane %v165_v41, 4  ;;  %v172_v44 = vsel %vm164_vm0, %v151_v22, -inf  ;;  %v179_v45 = vsel %vm164_vm0, %v152_v23, -inf }
  0x1c   : > { %v173_v46 = vrot.slane %v172_v44, 4  ;;  %v180_v47 = vrot.slane %v179_v45, 4  ;;  %v186_v48 = vsel %vm164_vm0, %v153_v27, -inf  ;;  %v193_v49 = vsel %vm164_vm0, %v154_v28, -inf }
  0x1d   : > { %v167_v50 = vmax.f32 %v165_v41, %v166_v43  ;;  %v187_v51 = vrot.slane %v186_v48, 4  ;;  %v194_v52 = vrot.slane %v193_v49, 4  ;;  %v200_v53 = vsel %vm164_vm0, %v155_v29, -inf }
  0x1e   : > { %v174_v54 = vmax.f32 %v172_v44, %v173_v46  ;;  %v181_v55 = vmax.f32 %v179_v45, %v180_v47  ;;  %v201_v56 = vrot.slane %v200_v53, 4  ;;  %v207_v57 = vsel %vm164_vm0, %v156_v33, -inf }
  0x1f   : > { %v168_v58 = vrot.slane %v167_v50, 2  ;;  %v188_v59 = vmax.f32 %v186_v48, %v187_v51  ;;  %v195_v60 = vmax.f32 %v193_v49, %v194_v52  ;;  %v208_v61 = vrot.slane %v207_v57, 4 }
  0x20   : > { %v175_v62 = vrot.slane %v174_v54, 2  ;;  %v182_v63 = vrot.slane %v181_v55, 2  ;;  %v202_v0 = vmax.f32 %v200_v53, %v201_v56  ;;  %v214_v1 = vsel %vm164_vm0, %v157_v34, -inf }
  0x21   : > { %v169_v2 = vmax.f32 %v167_v50, %v168_v58  ;;  %v189_v3 = vrot.slane %v188_v59, 2  ;;  %v196_v4 = vrot.slane %v195_v60, 2  ;;  %v209_v5 = vmax.f32 %v207_v57, %v208_v61 }
  0x22   : > { %v176_v6 = vmax.f32 %v174_v54, %v175_v62  ;;  %v183_v7 = vmax.f32 %v181_v55, %v182_v63  ;;  %v203_v13 = vrot.slane %v202_v0, 2  ;;  %v215_v15 = vrot.slane %v214_v1, 4 }
  0x23   : > { %v170_v16 = vrot.slane %v169_v2, 1  ;;  %v190_v17 = vmax.f32 %v188_v59, %v189_v3  ;;  %v197_v18 = vmax.f32 %v195_v60, %v196_v4  ;;  %v210_v19 = vrot.slane %v209_v5, 2 }
  0x24   : > { %v177_v20 = vrot.slane %v176_v6, 1  ;;  %v184_v21 = vrot.slane %v183_v7, 1  ;;  %v204_v22 = vmax.f32 %v202_v0, %v203_v13  ;;  %v216_v23 = vmax.f32 %v214_v1, %v215_v15 }
  0x25   : > { %v171_v24 = vmax.f32 %v169_v2, %v170_v16  ;;  %v191_v27 = vrot.slane %v190_v17, 1  ;;  %v198_v28 = vrot.slane %v197_v18, 1  ;;  %v211_v29 = vmax.f32 %v209_v5, %v210_v19 }
  0x26   : > { %v178_v33 = vmax.f32 %v176_v6, %v177_v20  ;;  %v185_v34 = vmax.f32 %v183_v7, %v184_v21  ;;  %v205_v41 = vrot.slane %v204_v22, 1  ;;  %v217_v43 = vrot.slane %v216_v23, 2 }
  0x27   : > { %v192_v44 = vmax.f32 %v190_v17, %v191_v27  ;;  %v199_v45 = vmax.f32 %v197_v18, %v198_v28  ;;  %v212_v46 = vrot.slane %v211_v29, 1  ;;  %v221_v47 = vsel %vm164_vm0, %v158_v35, -inf }
  0x28   : > { %v206_v48 = vmax.f32 %v204_v22, %v205_v41  ;;  %v218_v49 = vmax.f32 %v216_v23, %v217_v43  ;;  %v222_v50 = vrot.slane %v221_v47, 4  ;;  %v228_v51 = vsel %vm164_vm0, %v159_v36, -inf }
  0x29   : > { %v213_v52 = vmax.f32 %v211_v29, %v212_v46  ;;  %v229_v53 = vrot.slane %v228_v51, 4  ;;  %v235_v8 = vsel %vm164_vm0, %v160_v38, -inf  ;;  %v242_v25 = vsel %vm164_vm0, %v161_v39, -inf }
  0x2a   : > { %v219_v35 = vrot.slane %v218_v49, 1  ;;  %v223_v9 = vmax.f32 %v221_v47, %v222_v50  ;;  %v236_v26 = vrot.slane %v235_v8, 4  ;;  %v243_v36 = vrot.slane %v242_v25, 4 }
  0x2b   : > { %v230_v54 = vmax.f32 %v228_v51, %v229_v53  ;;  %v249_v55 = vsel %vm164_vm0, %v162_v40, -inf  ;;  %v256_v10 = vsel %vm164_vm0, %v163_v42, -inf  ;;  %v278_v30 = vsel %vm277_vm1, %v178_v33, %v171_v24 }
  0x2c   : > { %v220_v11 = vmax.f32 %v218_v49, %v219_v35  ;;  %v224_v31 = vrot.slane %v223_v9, 2  ;;  %v237_v38 = vmax.f32 %v235_v8, %v236_v26  ;;  %v244_v39 = vmax.f32 %v242_v25, %v243_v36 }
  0x2d   : > { %v231_v56 = vrot.slane %v230_v54, 2  ;;  %v250_v57 = vrot.slane %v249_v55, 4  ;;  %v257_v58 = vrot.slane %v256_v10, 4  ;;  %v280_v59 = vsel %vm279_vm2, %v185_v34, %v278_v30 }
  0x2e   : > { %v225_v12 = vmax.f32 %v223_v9, %v224_v31  ;;  %v238_v32 = vrot.slane %v237_v38, 2  ;;  %v245_v40 = vrot.slane %v244_v39, 2  ;;  %v282_v60 = vsel %vm281_vm3, %v192_v44, %v280_v59 }
  0x2f   : > { %v232_v14 = vmax.f32 %v230_v54, %v231_v56  ;;  %v251_v37 = vmax.f32 %v249_v55, %v250_v57  ;;  %v258_v42 = vmax.f32 %v256_v10, %v257_v58  ;;  %v284_v61 = vsel %vm283_vm4, %v199_v45, %v282_v60 }
  0x30   : > { %v226_v62 = vrot.slane %v225_v12, 1  ;;  %v239_v63 = vmax.f32 %v237_v38, %v238_v32  ;;  %v246_v0 = vmax.f32 %v244_v39, %v245_v40  ;;  %v286_v1 = vsel %vm285_vm5, %v206_v48, %v284_v61 }
  0x31   : > { %v233_v2 = vrot.slane %v232_v14, 1  ;;  %v252_v3 = vrot.slane %v251_v37, 2  ;;  %v259_v4 = vrot.slane %v258_v42, 2  ;;  %v288_v5 = vsel %vm287_vm6, %v213_v52, %v286_v1 }
  0x32   : > { %v227_v6 = vmax.f32 %v225_v12, %v226_v62  ;;  %v240_v7 = vrot.slane %v239_v63, 1  ;;  %v247_v13 = vrot.slane %v246_v0, 1  ;;  %v290_v15 = vsel %vm289_vm7, %v220_v11, %v288_v5 }
  0x33   : > { %v234_v16 = vmax.f32 %v232_v14, %v233_v2  ;;  %v253_v17 = vmax.f32 %v251_v37, %v252_v3  ;;  %v260_v18 = vmax.f32 %v258_v42, %v259_v4  ;;  %298 = vst [vmem:[%s121_s16] sm:$0xff] %v290_v15 }
  0x34   : > { %v241_v19 = vmax.f32 %v239_v63, %v240_v7  ;;  %v248_v20 = vmax.f32 %v246_v0, %v247_v13 }
  0x35   : > { %v254_v21 = vrot.slane %v253_v17, 1  ;;  %v261_v22 = vrot.slane %v260_v18, 1  ;;  %v291_v23 = vsel %vm277_vm1, %v234_v16, %v227_v6 }
  0x36   : > { %v292_v24 = vsel %vm279_vm2, %v241_v19, %v291_v23 }
  0x37   : > { %v255_v27 = vmax.f32 %v253_v17, %v254_v21  ;;  %v262_v28 = vmax.f32 %v260_v18, %v261_v22  ;;  %v293_v29 = vsel %vm281_vm3, %v248_v20, %v292_v24 }
  0x39   : > { %v294_v33 = vsel %vm283_vm4, %v255_v27, %v293_v29 }
  0x3a   : > { %v295_v34 = vsel %vm285_vm5, %v262_v28, %v294_v33 }
  0x3b   : > { %299 = vst [vmem:[%s121_s16 + $0x8] sm:$0x3f] %v295_v34 }
  0x3c PF: > { %s11_s6 = sadd.s32 1, %s382_s6  }
  0x3d   : > { %p8_p5 = scmp.ge.s32.totalorder %s11_s6, 30  }
  0x3f   :  { %10 = sbr.rel (!%p8_p5) target bundleno = 1 (0x1), region = 54 }

// kernel: lenet_forward.5
= control target key start
LH: loop header
LB: loop body
LE: loop exit
PB: predicated region body
PF: predicated region fallthrough
CT: control target
= control target key end

     0   :  { %s1134_s12 = smov 0   ;;  %s1407_s0 = inlined_call_operand.vmem [shape: f32[2048,128], index: 0, kind: input, shape index: {}]   ;;  %s1408_s1 = inlined_call_operand.vmem [shape: f32[128,128], index: 1, kind: input, shape index: {}]   ;;  %s1409_s2 = inlined_call_operand.vmem [shape: f32[1,128], index: 2, kind: input, shape index: {}]   ;;  %s1410_s3 = inlined_call_operand.vmem [shape: f32[2048,128], index: 3, kind: output, shape index: {}]  }
   0x1 LB: > { %s830_s13 = sadd.s32 4294967295, %s1112_s12   ;;  %p834_p0 = scmp.ge.s32.totalorder %s1112_s12, 1  ;;  %s1112_s12 = sphi %s1134_s12, %s13_s12  }
   0x2   : > { %p138_p1 = scmp.lt.s32.totalorder %s1112_s12, 5 }
   0x4   : > { %p139_p2 = pnand %p834_p0, %p138_p1 }
   0x5   : > { %v238_v0 = vld [vmem:[%s1408_s1] sm:$0xff] (!%p139_p2)  ;;  %v239_v1 = vld [vmem:[%s1408_s1 + $0x8] sm:$0xff] (!%p139_p2)  ;;  %v240_v2 = vld [vmem:[%s1408_s1 + $0x10] sm:$0xff] (!%p139_p2)  ;;  %s835_s20 = sshll.u32 (!%p139_p2), %s830_s13, 6 }
   0x6   : > { %142 = sbr.rel (%p139_p2) target bundleno = 319 (0x13f), region = 32  ;;  %v1050_v3 = vpack.c.bf16 (!%p139_p2), %v239_v1, %v238_v0  ;;  %v241_v4 = vld [vmem:[%s1408_s1 + $0x18] sm:$0xff] (!%p139_p2)  ;;  %p163_p3 = scmp.lt.s32.totalorder (!%p139_p2), %s835_s20, 255  ;;  %v242_v6 = vld [vmem:[%s1408_s1 + $0x20] sm:$0xff] (!%p139_p2)  ;;  %v243_v7 = vld [vmem:[%s1408_s1 + $0x28] sm:$0xff] (!%p139_p2) }
   0x7   : > { %v1054_v5 = vpack.c.bf16 (!%p139_p2), %v241_v4, %v240_v2  ;;  %v1058_v8 = vpack.c.bf16 (!%p139_p2), %v243_v7, %v242_v6  ;;  %v244_v9 = vld [vmem:[%s1408_s1 + $0x30] sm:$0xff] (!%p139_p2)  ;;  %v245_v10 = vld [vmem:[%s1408_s1 + $0x38] sm:$0xff] (!%p139_p2)  ;;  %v246_v14 = vld [vmem:[%s1408_s1 + $0x40] sm:$0xff] (!%p139_p2) }
   0x8   : > { %1051 = vmatprep.subr.bf16.mxu0 (!%p139_p2), %v1050_v3  ;;  %1082 = vmatprep.subr.bf16.mxu1 (!%p139_p2), %v1050_v3  ;;  %v1062_v13 = vpack.c.bf16 (!%p139_p2), %v245_v10, %v244_v9  ;;  %v247_v15 = vld [vmem:[%s1408_s1 + $0x48] sm:$0xff] (!%p139_p2)  ;;  %v248_v17 = vld [vmem:[%s1408_s1 + $0x50] sm:$0xff] (!%p139_p2)  ;;  %v249_v18 = vld [vmem:[%s1408_s1 + $0x58] sm:$0xff] (!%p139_p2) }
   0x9   : > { %1053 = vmatpush3.bf16.msra.mxu0 (!%p139_p2), %v1050_v3  ;;  %1090 = vmatpush3.bf16.msra.mxu1 (!%p139_p2), %v1050_v3  ;;  %v1066_v16 = vpack.c.bf16 (!%p139_p2), %v247_v15, %v246_v14  ;;  %v1070_v19 = vpack.c.bf16 (!%p139_p2), %v249_v18, %v248_v17  ;;  %v250_v20 = vld [vmem:[%s1408_s1 + $0x60] sm:$0xff] (!%p139_p2)  ;;  %v251_v21 = vld [vmem:[%s1408_s1 + $0x68] sm:$0xff] (!%p139_p2)  ;;  %v252_v23 = vld [vmem:[%s1408_s1 + $0x70] sm:$0xff] (!%p139_p2) }
   0xa   : > { %1055 = vmatprep.subr.bf16.mxu0 (!%p139_p2), %v1054_v5  ;;  %1083 = vmatprep.subr.bf16.mxu1 (!%p139_p2), %v1054_v5  ;;  %v1074_v22 = vpack.c.bf16 (!%p139_p2), %v251_v21, %v250_v20  ;;  %v253_v24 = vld [vmem:[%s1408_s1 + $0x78] sm:$0xff] (!%p139_p2) }
   0xb   : > { %v1078_v25 = vpack.c.bf16 (!%p139_p2), %v253_v24, %v252_v23  ;;  %v1267_v24 = vld [vmem:[%s1409_s2] ss:$0 sm:$0xff] (!%p139_p2) }
   0xd   : > { %s1412_s20 = smov (!%p163_p3, %s835_s20), 255  ;;  %1057 = vmatpush3.bf16.msra.mxu0 %v1054_v5  ;;  %1091 = vmatpush3.bf16.msra.mxu1 %v1054_v5 }
   0xe   : > { %s836_s27 = sshll.u32 %s1412_s20, 3  ;;  %1059 = vmatprep.subr.bf16.mxu0 %v1058_v8  ;;  %1084 = vmatprep.subr.bf16.mxu1 %v1058_v8 }
   0xf   : > { %s1174_s7 = scalar_lea.vmem %s1407_s0, %s836_s27  ;;  %s1276_s4 = scalar_lea.vmem %s1410_s3, %s836_s27 }
  0x10   : > { %v174_v11 = vld [vmem:[%s1174_s7] sm:$0xff]  ;;  %v175_v26 = vld [vmem:[%s1174_s7 + $0x8] sm:$0xff]  ;;  %v176_v28 = vld [vmem:[%s1174_s7 + $0x10] sm:$0xff] }
  0x11   : > { %v206_v12 = vld [vmem:[%s1174_s7 + $0x100] sm:$0xff]  ;;  %954 = vmatprep.mubr.f32.mxu0 %v174_v11  ;;  %1061 = vmatpush3.bf16.msra.mxu0 %v1058_v8  ;;  %v207_v27 = vld [vmem:[%s1174_s7 + $0x108] sm:$0xff]  ;;  %v208_v29 = vld [vmem:[%s1174_s7 + $0x110] sm:$0xff] }
  0x12   : > { %1002 = vmatprep.mubr.f32.mxu1 %v206_v12  ;;  %1092 = vmatpush3.bf16.msra.mxu1 %v1058_v8  ;;  %v177_v30 = vld [vmem:[%s1174_s7 + $0x18] sm:$0xff]  ;;  %v178_v32 = vld [vmem:[%s1174_s7 + $0x20] sm:$0xff]  ;;  %v179_v34 = vld [vmem:[%s1174_s7 + $0x28] sm:$0xff] }
  0x13   : > { %1063 = vmatprep.subr.bf16.mxu0 %v1062_v13  ;;  %1085 = vmatprep.subr.bf16.mxu1 %v1062_v13  ;;  %v209_v31 = vld [vmem:[%s1174_s7 + $0x118] sm:$0xff]  ;;  %v210_v33 = vld [vmem:[%s1174_s7 + $0x120] sm:$0xff]  ;;  %v211_v35 = vld [vmem:[%s1174_s7 + $0x128] sm:$0xff] }
  0x14   : > { %v180_v36 = vld [vmem:[%s1174_s7 + $0x30] sm:$0xff]  ;;  %v181_v38 = vld [vmem:[%s1174_s7 + $0x38] sm:$0xff]  ;;  %v182_v40 = vld [vmem:[%s1174_s7 + $0x40] sm:$0xff] }
  0x15   : > { %1065 = vmatpush3.bf16.msra.mxu0 %v1062_v13  ;;  %v212_v37 = vld [vmem:[%s1174_s7 + $0x130] sm:$0xff]  ;;  %v213_v39 = vld [vmem:[%s1174_s7 + $0x138] sm:$0xff]  ;;  %v214_v41 = vld [vmem:[%s1174_s7 + $0x140] sm:$0xff] }
  0x16   : > { %1093 = vmatpush3.bf16.msra.mxu1 %v1062_v13  ;;  %1067 = vmatprep.subr.bf16.mxu0 %v1066_v16  ;;  %v183_v42 = vld [vmem:[%s1174_s7 + $0x48] sm:$0xff]  ;;  %v184_v44 = vld [vmem:[%s1174_s7 + $0x50] sm:$0xff]  ;;  %v185_v46 = vld [vmem:[%s1174_s7 + $0x58] sm:$0xff] }
  0x17   : > { %1086 = vmatprep.subr.bf16.mxu1 %v1066_v16  ;;  %v215_v43 = vld [vmem:[%s1174_s7 + $0x148] sm:$0xff]  ;;  %v216_v45 = vld [vmem:[%s1174_s7 + $0x150] sm:$0xff]  ;;  %v217_v47 = vld [vmem:[%s1174_s7 + $0x158] sm:$0xff] }
  0x18   : > { %v186_v48 = vld [vmem:[%s1174_s7 + $0x60] sm:$0xff]  ;;  %v187_v50 = vld [vmem:[%s1174_s7 + $0x68] sm:$0xff]  ;;  %v188_v52 = vld [vmem:[%s1174_s7 + $0x70] sm:$0xff] }
  0x19   : > { %1069 = vmatpush3.bf16.msra.mxu0 %v1066_v16  ;;  %v218_v49 = vld [vmem:[%s1174_s7 + $0x160] sm:$0xff]  ;;  %v219_v51 = vld [vmem:[%s1174_s7 + $0x168] sm:$0xff]  ;;  %v220_v53 = vld [vmem:[%s1174_s7 + $0x170] sm:$0xff] }
  0x1a   : > { %1094 = vmatpush3.bf16.msra.mxu1 %v1066_v16  ;;  %1071 = vmatprep.subr.bf16.mxu0 %v1070_v19  ;;  %v189_v54 = vld [vmem:[%s1174_s7 + $0x78] sm:$0xff]  ;;  %v190_v56 = vld [vmem:[%s1174_s7 + $0x80] sm:$0xff]  ;;  %v191_v58 = vld [vmem:[%s1174_s7 + $0x88] sm:$0xff] }
  0x1b   : > { %1087 = vmatprep.subr.bf16.mxu1 %v1070_v19  ;;  %v221_v55 = vld [vmem:[%s1174_s7 + $0x178] sm:$0xff]  ;;  %v222_v57 = vld [vmem:[%s1174_s7 + $0x180] sm:$0xff]  ;;  %v223_v59 = vld [vmem:[%s1174_s7 + $0x188] sm:$0xff] }
  0x1c   : > { %v192_v60 = vld [vmem:[%s1174_s7 + $0x90] sm:$0xff]  ;;  %v193_v62 = vld [vmem:[%s1174_s7 + $0x98] sm:$0xff]  ;;  %v194_v0 = vld [vmem:[%s1174_s7 + $0xa0] sm:$0xff] }
  0x1d   : > { %1073 = vmatpush3.bf16.msra.mxu0 %v1070_v19  ;;  %v224_v61 = vld [vmem:[%s1174_s7 + $0x190] sm:$0xff]  ;;  %v225_v63 = vld [vmem:[%s1174_s7 + $0x198] sm:$0xff]  ;;  %v226_v1 = vld [vmem:[%s1174_s7 + $0x1a0] sm:$0xff] }
  0x1e   : > { %1095 = vmatpush3.bf16.msra.mxu1 %v1070_v19  ;;  %1075 = vmatprep.subr.bf16.mxu0 %v1074_v22  ;;  %v195_v2 = vld [vmem:[%s1174_s7 + $0xa8] sm:$0xff]  ;;  %v196_v4 = vld [vmem:[%s1174_s7 + $0xb0] sm:$0xff]  ;;  %v197_v6 = vld [vmem:[%s1174_s7 + $0xb8] sm:$0xff] }
  0x1f   : > { %1088 = vmatprep.subr.bf16.mxu1 %v1074_v22  ;;  %v227_v3 = vld [vmem:[%s1174_s7 + $0x1a8] sm:$0xff]  ;;  %v228_v5 = vld [vmem:[%s1174_s7 + $0x1b0] sm:$0xff]  ;;  %v229_v7 = vld [vmem:[%s1174_s7 + $0x1b8] sm:$0xff] }
  0x20   : > { %v198_v8 = vld [vmem:[%s1174_s7 + $0xc0] sm:$0xff]  ;;  %v199_v10 = vld [vmem:[%s1174_s7 + $0xc8] sm:$0xff]  ;;  %v200_v12 = vld [vmem:[%s1174_s7 + $0xd0] sm:$0xff] }
  0x21   : > { %1077 = vmatpush3.bf16.msra.mxu0 %v1074_v22  ;;  %v230_v9 = vld [vmem:[%s1174_s7 + $0x1c0] sm:$0xff]  ;;  %v231_v11 = vld [vmem:[%s1174_s7 + $0x1c8] sm:$0xff]  ;;  %v232_v13 = vld [vmem:[%s1174_s7 + $0x1d0] sm:$0xff] }
  0x22   : > { %1096 = vmatpush3.bf16.msra.mxu1 %v1074_v22  ;;  %1079 = vmatprep.subr.bf16.mxu0 %v1078_v25  ;;  %v201_v14 = vld [vmem:[%s1174_s7 + $0xd8] sm:$0xff]  ;;  %v202_v16 = vld [vmem:[%s1174_s7 + $0xe0] sm:$0xff]  ;;  %v203_v18 = vld [vmem:[%s1174_s7 + $0xe8] sm:$0xff] }
  0x23   : > { %1089 = vmatprep.subr.bf16.mxu1 %v1078_v25  ;;  %v233_v15 = vld [vmem:[%s1174_s7 + $0x1d8] sm:$0xff]  ;;  %v234_v17 = vld [vmem:[%s1174_s7 + $0x1e0] sm:$0xff]  ;;  %v235_v19 = vld [vmem:[%s1174_s7 + $0x1e8] sm:$0xff] }
  0x24   : > { %v204_v20 = vld [vmem:[%s1174_s7 + $0xf0] sm:$0xff]  ;;  %v205_v22 = vld [vmem:[%s1174_s7 + $0xf8] sm:$0xff] }
  0x25   : > { %1081 = vmatpush3.bf16.msra.mxu0 %v1078_v25  ;;  %v236_v21 = vld [vmem:[%s1174_s7 + $0x1f0] sm:$0xff]  ;;  %v237_v23 = vld [vmem:[%s1174_s7 + $0x1f8] sm:$0xff] }
  0x26   : > { %1097 = vmatpush3.bf16.msra.mxu1 %v1078_v25 }
  0x28   : > { %955 = vmatmul.mubr.f32.vlgmr.msra.gmra.mrb[0].mxu0 %v175_v26 }
  0x29   : > { %1003 = vmatmul.mubr.f32.vlgmr.msra.gmra.mrb[0].mxu1 %v207_v27  ;;  %957 = vmatprep.mubr.f32.mxu0 %v176_v28 }
  0x2a   : > { %1005 = vmatprep.mubr.f32.mxu1 %v208_v29 }
  0x2c   : > { %958 = vmatmul.mubr.f32.gmra.mrb[2].mxu0 %v177_v30 }
  0x2d   : > { %1006 = vmatmul.mubr.f32.gmra.mrb[2].mxu1 %v209_v31  ;;  %960 = vmatprep.mubr.f32.mxu0 %v178_v32 }
  0x2e   : > { %1008 = vmatprep.mubr.f32.mxu1 %v210_v33 }
  0x30   : > { %961 = vmatmul.mubr.f32.gmra.mrb[4].mxu0 %v179_v34 }
  0x31   : > { %1009 = vmatmul.mubr.f32.gmra.mrb[4].mxu1 %v211_v35  ;;  %963 = vmatprep.mubr.f32.mxu0 %v180_v36 }
  0x32   : > { %1011 = vmatprep.mubr.f32.mxu1 %v212_v37 }
  0x34   : > { %964 = vmatmul.mubr.f32.gmra.mrb[6].mxu0 %v181_v38 }
  0x35   : > { %1012 = vmatmul.mubr.f32.gmra.mrb[6].mxu1 %v213_v39  ;;  %966 = vmatprep.mubr.f32.mxu0 %v182_v40 }
  0x36   : > { %1014 = vmatprep.mubr.f32.mxu1 %v214_v41 }
  0x38   : > { %967 = vmatmul.mubr.f32.gmra.mrb[8].mxu0 %v183_v42 }
  0x39   : > { %1015 = vmatmul.mubr.f32.gmra.mrb[8].mxu1 %v215_v43  ;;  %969 = vmatprep.mubr.f32.mxu0 %v184_v44 }
  0x3a   : > { %1017 = vmatprep.mubr.f32.mxu1 %v216_v45 }
  0x3c   : > { %970 = vmatmul.mubr.f32.gmra.mrb[10].mxu0 %v185_v46 }
  0x3d   : > { %1018 = vmatmul.mubr.f32.gmra.mrb[10].mxu1 %v217_v47  ;;  %972 = vmatprep.mubr.f32.mxu0 %v186_v48 }
  0x3e   : > { %1020 = vmatprep.mubr.f32.mxu1 %v218_v49 }
  0x40   : > { %973 = vmatmul.mubr.f32.gmra.mrb[12].mxu0 %v187_v50 }
  0x41   : > { %1021 = vmatmul.mubr.f32.gmra.mrb[12].mxu1 %v219_v51  ;;  %975 = vmatprep.mubr.f32.mxu0 %v188_v52 }
  0x42   : > { %1023 = vmatprep.mubr.f32.mxu1 %v220_v53 }
  0x44   : > { %976 = vmatmul.mubr.f32.gmra.mrb[14].mxu0 %v189_v54 }
  0x45   : > { %1024 = vmatmul.mubr.f32.gmra.mrb[14].mxu1 %v221_v55  ;;  %978 = vmatprep.mubr.f32.mxu0 %v190_v56 }
  0x46   : > { %1026 = vmatprep.mubr.f32.mxu1 %v222_v57 }
  0x48   : > { %979 = vmatmul.mubr.f32.gmra.mrb[16].mxu0 %v191_v58 }
  0x49   : > { %1027 = vmatmul.mubr.f32.gmra.mrb[16].mxu1 %v223_v59  ;;  %981 = vmatprep.mubr.f32.mxu0 %v192_v60 }
  0x4a   : > { %1029 = vmatprep.mubr.f32.mxu1 %v224_v61 }
  0x4c   : > { %982 = vmatmul.mubr.f32.gmra.mrb[18].mxu0 %v193_v62 }
  0x4d   : > { %1030 = vmatmul.mubr.f32.gmra.mrb[18].mxu1 %v225_v63  ;;  %984 = vmatprep.mubr.f32.mxu0 %v194_v0 }
  0x4e   : > { %1032 = vmatprep.mubr.f32.mxu1 %v226_v1 }
  0x50   : > { %985 = vmatmul.mubr.f32.gmra.mrb[20].mxu0 %v195_v2 }
  0x51   : > { %1033 = vmatmul.mubr.f32.gmra.mrb[20].mxu1 %v227_v3  ;;  %987 = vmatprep.mubr.f32.mxu0 %v196_v4 }
  0x52   : > { %1035 = vmatprep.mubr.f32.mxu1 %v228_v5 }
  0x54   : > { %988 = vmatmul.mubr.f32.gmra.mrb[22].mxu0 %v197_v6 }
  0x55   : > { %1036 = vmatmul.mubr.f32.gmra.mrb[22].mxu1 %v229_v7  ;;  %990 = vmatprep.mubr.f32.mxu0 %v198_v8 }
  0x56   : > { %1038 = vmatprep.mubr.f32.mxu1 %v230_v9 }
  0x58   : > { %991 = vmatmul.mubr.f32.gmra.mrb[24].mxu0 %v199_v10 }
  0x59   : > { %1039 = vmatmul.mubr.f32.gmra.mrb[24].mxu1 %v231_v11  ;;  %993 = vmatprep.mubr.f32.mxu0 %v200_v12 }
  0x5a   : > { %1041 = vmatprep.mubr.f32.mxu1 %v232_v13 }
  0x5c   : > { %994 = vmatmul.mubr.f32.gmra.mrb[26].mxu0 %v201_v14 }
  0x5d   : > { %1042 = vmatmul.mubr.f32.gmra.mrb[26].mxu1 %v233_v15  ;;  %996 = vmatprep.mubr.f32.mxu0 %v202_v16 }
  0x5e   : > { %1044 = vmatprep.mubr.f32.mxu1 %v234_v17 }
  0x60   : > { %997 = vmatmul.mubr.f32.gmra.mrb[28].mxu0 %v203_v18 }
  0x61   : > { %1045 = vmatmul.mubr.f32.gmra.mrb[28].mxu1 %v235_v19  ;;  %999 = vmatprep.mubr.f32.mxu0 %v204_v20 }
  0x62   : > { %1047 = vmatprep.mubr.f32.mxu1 %v236_v21 }
  0x64   : > { %1000 = vmatmul.mubr.f32.gmra.mrb[30].mxu0 %v205_v22 }
  0x65   : > { %1048 = vmatmul.mubr.f32.gmra.mrb[30].mxu1 %v237_v23 }
  0xfb   : > { %v956_v25 = vpop.f32.mrb[0].mxu0 }
  0xfc   : > { %v1004_v26 = vpop.f32.mrb[0].mxu1  ;;  %v333_v27 = vadd.f32 %v956_v25, %v1267_v24  ;;  %v327_v29 = vpop.f32.mrb[1].mxu0 }
  0xfd   : > { %v493_v28 = vadd.f32 %v1004_v26, %v1267_v24  ;;  %v487_v30 = vpop.f32.mrb[1].mxu1  ;;  %v328_v31 = vadd.f32 %v1267_v24, %v327_v29 }
  0xfe   : > { %v488_v32 = vadd.f32 %v1267_v24, %v487_v30  ;;  %v647_v33 = vmax.f32 %v333_v27, 0.0 }
  0xff   : > { %v679_v34 = vmax.f32 %v493_v28, 0.0  ;;  %v646_v35 = vmax.f32 %v328_v31, 0.0  ;;  %v959_v37 = vpop.f32.mrb[2].mxu0 }
 0x100   : > { %v678_v36 = vmax.f32 %v488_v32, 0.0  ;;  %v1007_v38 = vpop.f32.mrb[2].mxu1  ;;  %711 = vst [vmem:[%s1276_s4 + $0x8] sm:$0xff] %v647_v33  ;;  %v343_v39 = vadd.f32 %v959_v37, %v1267_v24  ;;  %v337_v41 = vpop.f32.mrb[3].mxu0 }
 0x101   : > { %743 = vst [vmem:[%s1276_s4 + $0x108] sm:$0xff] %v679_v34  ;;  %v503_v40 = vadd.f32 %v1007_v38, %v1267_v24  ;;  %v497_v42 = vpop.f32.mrb[3].mxu1  ;;  %710 = vst [vmem:[%s1276_s4] sm:$0xff] %v646_v35  ;;  %v338_v43 = vadd.f32 %v1267_v24, %v337_v41 }
 0x102   : > { %742 = vst [vmem:[%s1276_s4 + $0x100] sm:$0xff] %v678_v36  ;;  %v498_v44 = vadd.f32 %v1267_v24, %v497_v42  ;;  %v649_v45 = vmax.f32 %v343_v39, 0.0 }
 0x103   : > { %v681_v46 = vmax.f32 %v503_v40, 0.0  ;;  %v648_v47 = vmax.f32 %v338_v43, 0.0  ;;  %v962_v49 = vpop.f32.mrb[4].mxu0 }
 0x104   : > { %v680_v48 = vmax.f32 %v498_v44, 0.0  ;;  %v1010_v50 = vpop.f32.mrb[4].mxu1  ;;  %713 = vst [vmem:[%s1276_s4 + $0x18] sm:$0xff] %v649_v45  ;;  %v353_v51 = vadd.f32 %v962_v49, %v1267_v24  ;;  %v347_v53 = vpop.f32.mrb[5].mxu0 }
 0x105   : > { %745 = vst [vmem:[%s1276_s4 + $0x118] sm:$0xff] %v681_v46  ;;  %v513_v52 = vadd.f32 %v1010_v50, %v1267_v24  ;;  %v507_v54 = vpop.f32.mrb[5].mxu1  ;;  %712 = vst [vmem:[%s1276_s4 + $0x10] sm:$0xff] %v648_v47  ;;  %v348_v55 = vadd.f32 %v1267_v24, %v347_v53 }
 0x106   : > { %744 = vst [vmem:[%s1276_s4 + $0x110] sm:$0xff] %v680_v48  ;;  %v508_v56 = vadd.f32 %v1267_v24, %v507_v54  ;;  %v651_v57 = vmax.f32 %v353_v51, 0.0 }
 0x107   : > { %v683_v58 = vmax.f32 %v513_v52, 0.0  ;;  %v650_v59 = vmax.f32 %v348_v55, 0.0  ;;  %v965_v61 = vpop.f32.mrb[6].mxu0 }
 0x108   : > { %v682_v60 = vmax.f32 %v508_v56, 0.0  ;;  %v1013_v62 = vpop.f32.mrb[6].mxu1  ;;  %715 = vst [vmem:[%s1276_s4 + $0x28] sm:$0xff] %v651_v57  ;;  %v363_v63 = vadd.f32 %v965_v61, %v1267_v24  ;;  %v357_v1 = vpop.f32.mrb[7].mxu0 }
 0x109   : > { %747 = vst [vmem:[%s1276_s4 + $0x128] sm:$0xff] %v683_v58  ;;  %v523_v0 = vadd.f32 %v1013_v62, %v1267_v24  ;;  %v517_v2 = vpop.f32.mrb[7].mxu1  ;;  %714 = vst [vmem:[%s1276_s4 + $0x20] sm:$0xff] %v650_v59  ;;  %v358_v3 = vadd.f32 %v1267_v24, %v357_v1 }
 0x10a   : > { %746 = vst [vmem:[%s1276_s4 + $0x120] sm:$0xff] %v682_v60  ;;  %v518_v4 = vadd.f32 %v1267_v24, %v517_v2  ;;  %v653_v5 = vmax.f32 %v363_v63, 0.0 }
 0x10b   : > { %v685_v6 = vmax.f32 %v523_v0, 0.0  ;;  %v652_v7 = vmax.f32 %v358_v3, 0.0  ;;  %v968_v9 = vpop.f32.mrb[8].mxu0 }
 0x10c   : > { %v684_v8 = vmax.f32 %v518_v4, 0.0  ;;  %v1016_v10 = vpop.f32.mrb[8].mxu1  ;;  %717 = vst [vmem:[%s1276_s4 + $0x38] sm:$0xff] %v653_v5  ;;  %v373_v11 = vadd.f32 %v968_v9, %v1267_v24  ;;  %v367_v13 = vpop.f32.mrb[9].mxu0 }
 0x10d   : > { %749 = vst [vmem:[%s1276_s4 + $0x138] sm:$0xff] %v685_v6  ;;  %v533_v12 = vadd.f32 %v1016_v10, %v1267_v24  ;;  %v527_v14 = vpop.f32.mrb[9].mxu1  ;;  %716 = vst [vmem:[%s1276_s4 + $0x30] sm:$0xff] %v652_v7  ;;  %v368_v15 = vadd.f32 %v1267_v24, %v367_v13 }
 0x10e   : > { %748 = vst [vmem:[%s1276_s4 + $0x130] sm:$0xff] %v684_v8  ;;  %v528_v16 = vadd.f32 %v1267_v24, %v527_v14  ;;  %v655_v17 = vmax.f32 %v373_v11, 0.0 }
 0x10f   : > { %v687_v18 = vmax.f32 %v533_v12, 0.0  ;;  %v654_v19 = vmax.f32 %v368_v15, 0.0  ;;  %v971_v21 = vpop.f32.mrb[10].mxu0 }
 0x110   : > { %v686_v20 = vmax.f32 %v528_v16, 0.0  ;;  %v1019_v22 = vpop.f32.mrb[10].mxu1  ;;  %719 = vst [vmem:[%s1276_s4 + $0x48] sm:$0xff] %v655_v17  ;;  %v383_v23 = vadd.f32 %v971_v21, %v1267_v24  ;;  %v377_v26 = vpop.f32.mrb[11].mxu0 }
 0x111   : > { %751 = vst [vmem:[%s1276_s4 + $0x148] sm:$0xff] %v687_v18  ;;  %v543_v25 = vadd.f32 %v1019_v22, %v1267_v24  ;;  %v537_v27 = vpop.f32.mrb[11].mxu1  ;;  %718 = vst [vmem:[%s1276_s4 + $0x40] sm:$0xff] %v654_v19  ;;  %v378_v28 = vadd.f32 %v1267_v24, %v377_v26 }
 0x112   : > { %750 = vst [vmem:[%s1276_s4 + $0x140] sm:$0xff] %v686_v20  ;;  %v538_v29 = vadd.f32 %v1267_v24, %v537_v27  ;;  %v657_v30 = vmax.f32 %v383_v23, 0.0 }
 0x113   : > { %v689_v31 = vmax.f32 %v543_v25, 0.0  ;;  %v656_v32 = vmax.f32 %v378_v28, 0.0  ;;  %v974_v34 = vpop.f32.mrb[12].mxu0 }
 0x114   : > { %v688_v33 = vmax.f32 %v538_v29, 0.0  ;;  %v1022_v35 = vpop.f32.mrb[12].mxu1  ;;  %721 = vst [vmem:[%s1276_s4 + $0x58] sm:$0xff] %v657_v30  ;;  %v393_v36 = vadd.f32 %v974_v34, %v1267_v24  ;;  %v387_v38 = vpop.f32.mrb[13].mxu0 }
 0x115   : > { %753 = vst [vmem:[%s1276_s4 + $0x158] sm:$0xff] %v689_v31  ;;  %v553_v37 = vadd.f32 %v1022_v35, %v1267_v24  ;;  %v547_v39 = vpop.f32.mrb[13].mxu1  ;;  %720 = vst [vmem:[%s1276_s4 + $0x50] sm:$0xff] %v656_v32  ;;  %v388_v40 = vadd.f32 %v1267_v24, %v387_v38 }
 0x116   : > { %752 = vst [vmem:[%s1276_s4 + $0x150] sm:$0xff] %v688_v33  ;;  %v548_v41 = vadd.f32 %v1267_v24, %v547_v39  ;;  %v659_v42 = vmax.f32 %v393_v36, 0.0 }
 0x117   : > { %v691_v43 = vmax.f32 %v553_v37, 0.0  ;;  %v658_v44 = vmax.f32 %v388_v40, 0.0  ;;  %v977_v46 = vpop.f32.mrb[14].mxu0 }
 0x118   : > { %v690_v45 = vmax.f32 %v548_v41, 0.0  ;;  %v1025_v47 = vpop.f32.mrb[14].mxu1  ;;  %723 = vst [vmem:[%s1276_s4 + $0x68] sm:$0xff] %v659_v42  ;;  %v403_v48 = vadd.f32 %v977_v46, %v1267_v24  ;;  %v397_v50 = vpop.f32.mrb[15].mxu0 }
 0x119   : > { %755 = vst [vmem:[%s1276_s4 + $0x168] sm:$0xff] %v691_v43  ;;  %v563_v49 = vadd.f32 %v1025_v47, %v1267_v24  ;;  %v557_v51 = vpop.f32.mrb[15].mxu1  ;;  %722 = vst [vmem:[%s1276_s4 + $0x60] sm:$0xff] %v658_v44  ;;  %v398_v52 = vadd.f32 %v1267_v24, %v397_v50 }
 0x11a   : > { %754 = vst [vmem:[%s1276_s4 + $0x160] sm:$0xff] %v690_v45  ;;  %v558_v53 = vadd.f32 %v1267_v24, %v557_v51  ;;  %v661_v54 = vmax.f32 %v403_v48, 0.0 }
 0x11b   : > { %v693_v55 = vmax.f32 %v563_v49, 0.0  ;;  %v660_v56 = vmax.f32 %v398_v52, 0.0  ;;  %v980_v58 = vpop.f32.mrb[16].mxu0 }
 0x11c   : > { %v692_v57 = vmax.f32 %v558_v53, 0.0  ;;  %v1028_v59 = vpop.f32.mrb[16].mxu1  ;;  %725 = vst [vmem:[%s1276_s4 + $0x78] sm:$0xff] %v661_v54  ;;  %v413_v60 = vadd.f32 %v980_v58, %v1267_v24  ;;  %v407_v62 = vpop.f32.mrb[17].mxu0 }
 0x11d   : > { %757 = vst [vmem:[%s1276_s4 + $0x178] sm:$0xff] %v693_v55  ;;  %v573_v61 = vadd.f32 %v1028_v59, %v1267_v24  ;;  %v567_v63 = vpop.f32.mrb[17].mxu1  ;;  %724 = vst [vmem:[%s1276_s4 + $0x70] sm:$0xff] %v660_v56  ;;  %v408_v0 = vadd.f32 %v1267_v24, %v407_v62 }
 0x11e   : > { %756 = vst [vmem:[%s1276_s4 + $0x170] sm:$0xff] %v692_v57  ;;  %v568_v1 = vadd.f32 %v1267_v24, %v567_v63  ;;  %v663_v2 = vmax.f32 %v413_v60, 0.0 }
 0x11f   : > { %v695_v3 = vmax.f32 %v573_v61, 0.0  ;;  %v662_v4 = vmax.f32 %v408_v0, 0.0  ;;  %v983_v6 = vpop.f32.mrb[18].mxu0 }
 0x120   : > { %v694_v5 = vmax.f32 %v568_v1, 0.0  ;;  %v1031_v7 = vpop.f32.mrb[18].mxu1  ;;  %727 = vst [vmem:[%s1276_s4 + $0x88] sm:$0xff] %v663_v2  ;;  %v423_v8 = vadd.f32 %v983_v6, %v1267_v24  ;;  %v417_v10 = vpop.f32.mrb[19].mxu0 }
 0x121   : > { %759 = vst [vmem:[%s1276_s4 + $0x188] sm:$0xff] %v695_v3  ;;  %v583_v9 = vadd.f32 %v1031_v7, %v1267_v24  ;;  %v577_v11 = vpop.f32.mrb[19].mxu1  ;;  %726 = vst [vmem:[%s1276_s4 + $0x80] sm:$0xff] %v662_v4  ;;  %v418_v12 = vadd.f32 %v1267_v24, %v417_v10 }
 0x122   : > { %758 = vst [vmem:[%s1276_s4 + $0x180] sm:$0xff] %v694_v5  ;;  %v578_v13 = vadd.f32 %v1267_v24, %v577_v11  ;;  %v665_v14 = vmax.f32 %v423_v8, 0.0 }
 0x123   : > { %v697_v15 = vmax.f32 %v583_v9, 0.0  ;;  %v664_v16 = vmax.f32 %v418_v12, 0.0  ;;  %v986_v18 = vpop.f32.mrb[20].mxu0 }
 0x124   : > { %v696_v17 = vmax.f32 %v578_v13, 0.0  ;;  %v1034_v19 = vpop.f32.mrb[20].mxu1  ;;  %729 = vst [vmem:[%s1276_s4 + $0x98] sm:$0xff] %v665_v14  ;;  %v433_v20 = vadd.f32 %v986_v18, %v1267_v24  ;;  %v427_v22 = vpop.f32.mrb[21].mxu0 }
 0x125   : > { %761 = vst [vmem:[%s1276_s4 + $0x198] sm:$0xff] %v697_v15  ;;  %v593_v21 = vadd.f32 %v1034_v19, %v1267_v24  ;;  %v587_v23 = vpop.f32.mrb[21].mxu1  ;;  %728 = vst [vmem:[%s1276_s4 + $0x90] sm:$0xff] %v664_v16  ;;  %v428_v25 = vadd.f32 %v1267_v24, %v427_v22 }
 0x126   : > { %760 = vst [vmem:[%s1276_s4 + $0x190] sm:$0xff] %v696_v17  ;;  %v588_v26 = vadd.f32 %v1267_v24, %v587_v23  ;;  %v667_v27 = vmax.f32 %v433_v20, 0.0 }
 0x127   : > { %v699_v28 = vmax.f32 %v593_v21, 0.0  ;;  %v666_v29 = vmax.f32 %v428_v25, 0.0  ;;  %v989_v31 = vpop.f32.mrb[22].mxu0 }
 0x128   : > { %v698_v30 = vmax.f32 %v588_v26, 0.0  ;;  %v1037_v32 = vpop.f32.mrb[22].mxu1  ;;  %731 = vst [vmem:[%s1276_s4 + $0xa8] sm:$0xff] %v667_v27  ;;  %v443_v33 = vadd.f32 %v989_v31, %v1267_v24  ;;  %v437_v35 = vpop.f32.mrb[23].mxu0 }
 0x129   : > { %763 = vst [vmem:[%s1276_s4 + $0x1a8] sm:$0xff] %v699_v28  ;;  %v603_v34 = vadd.f32 %v1037_v32, %v1267_v24  ;;  %v597_v36 = vpop.f32.mrb[23].mxu1  ;;  %730 = vst [vmem:[%s1276_s4 + $0xa0] sm:$0xff] %v666_v29  ;;  %v438_v37 = vadd.f32 %v1267_v24, %v437_v35 }
 0x12a   : > { %762 = vst [vmem:[%s1276_s4 + $0x1a0] sm:$0xff] %v698_v30  ;;  %v598_v38 = vadd.f32 %v1267_v24, %v597_v36  ;;  %v669_v39 = vmax.f32 %v443_v33, 0.0 }
 0x12b   : > { %v701_v40 = vmax.f32 %v603_v34, 0.0  ;;  %v668_v41 = vmax.f32 %v438_v37, 0.0  ;;  %v992_v43 = vpop.f32.mrb[24].mxu0 }
 0x12c   : > { %v700_v42 = vmax.f32 %v598_v38, 0.0  ;;  %v1040_v44 = vpop.f32.mrb[24].mxu1  ;;  %733 = vst [vmem:[%s1276_s4 + $0xb8] sm:$0xff] %v669_v39  ;;  %v453_v45 = vadd.f32 %v992_v43, %v1267_v24  ;;  %v447_v47 = vpop.f32.mrb[25].mxu0 }
 0x12d   : > { %765 = vst [vmem:[%s1276_s4 + $0x1b8] sm:$0xff] %v701_v40  ;;  %v613_v46 = vadd.f32 %v1040_v44, %v1267_v24  ;;  %v607_v48 = vpop.f32.mrb[25].mxu1  ;;  %732 = vst [vmem:[%s1276_s4 + $0xb0] sm:$0xff] %v668_v41  ;;  %v448_v49 = vadd.f32 %v1267_v24, %v447_v47 }
 0x12e   : > { %764 = vst [vmem:[%s1276_s4 + $0x1b0] sm:$0xff] %v700_v42  ;;  %v608_v50 = vadd.f32 %v1267_v24, %v607_v48  ;;  %v671_v51 = vmax.f32 %v453_v45, 0.0 }
 0x12f   : > { %v703_v52 = vmax.f32 %v613_v46, 0.0  ;;  %v670_v53 = vmax.f32 %v448_v49, 0.0  ;;  %v995_v55 = vpop.f32.mrb[26].mxu0 }
 0x130   : > { %v702_v54 = vmax.f32 %v608_v50, 0.0  ;;  %v1043_v56 = vpop.f32.mrb[26].mxu1  ;;  %735 = vst [vmem:[%s1276_s4 + $0xc8] sm:$0xff] %v671_v51  ;;  %v463_v57 = vadd.f32 %v995_v55, %v1267_v24  ;;  %v457_v59 = vpop.f32.mrb[27].mxu0 }
 0x131   : > { %767 = vst [vmem:[%s1276_s4 + $0x1c8] sm:$0xff] %v703_v52  ;;  %v623_v58 = vadd.f32 %v1043_v56, %v1267_v24  ;;  %v617_v60 = vpop.f32.mrb[27].mxu1  ;;  %734 = vst [vmem:[%s1276_s4 + $0xc0] sm:$0xff] %v670_v53  ;;  %v458_v61 = vadd.f32 %v1267_v24, %v457_v59 }
 0x132   : > { %766 = vst [vmem:[%s1276_s4 + $0x1c0] sm:$0xff] %v702_v54  ;;  %v618_v62 = vadd.f32 %v1267_v24, %v617_v60  ;;  %v673_v63 = vmax.f32 %v463_v57, 0.0 }
 0x133   : > { %v705_v0 = vmax.f32 %v623_v58, 0.0  ;;  %v672_v1 = vmax.f32 %v458_v61, 0.0  ;;  %v998_v3 = vpop.f32.mrb[28].mxu0 }
 0x134   : > { %v704_v2 = vmax.f32 %v618_v62, 0.0  ;;  %v1046_v4 = vpop.f32.mrb[28].mxu1  ;;  %737 = vst [vmem:[%s1276_s4 + $0xd8] sm:$0xff] %v673_v63  ;;  %v473_v5 = vadd.f32 %v998_v3, %v1267_v24  ;;  %v467_v7 = vpop.f32.mrb[29].mxu0 }
 0x135   : > { %769 = vst [vmem:[%s1276_s4 + $0x1d8] sm:$0xff] %v705_v0  ;;  %v633_v6 = vadd.f32 %v1046_v4, %v1267_v24  ;;  %v627_v8 = vpop.f32.mrb[29].mxu1  ;;  %736 = vst [vmem:[%s1276_s4 + $0xd0] sm:$0xff] %v672_v1  ;;  %v468_v9 = vadd.f32 %v1267_v24, %v467_v7 }
 0x136   : > { %768 = vst [vmem:[%s1276_s4 + $0x1d0] sm:$0xff] %v704_v2  ;;  %v628_v10 = vadd.f32 %v1267_v24, %v627_v8  ;;  %v675_v11 = vmax.f32 %v473_v5, 0.0 }
 0x137   : > { %v707_v12 = vmax.f32 %v633_v6, 0.0  ;;  %v674_v13 = vmax.f32 %v468_v9, 0.0  ;;  %v1001_v15 = vpop.f32.mrb[30].mxu0 }
 0x138   : > { %v706_v14 = vmax.f32 %v628_v10, 0.0  ;;  %v1049_v16 = vpop.f32.mrb[30].mxu1  ;;  %739 = vst [vmem:[%s1276_s4 + $0xe8] sm:$0xff] %v675_v11  ;;  %v483_v17 = vadd.f32 %v1001_v15, %v1267_v24  ;;  %v477_v19 = vpop.f32.mrb[31].mxu0 }
 0x139   : > { %771 = vst [vmem:[%s1276_s4 + $0x1e8] sm:$0xff] %v707_v12  ;;  %v643_v18 = vadd.f32 %v1049_v16, %v1267_v24  ;;  %v637_v20 = vpop.f32.mrb[31].mxu1  ;;  %738 = vst [vmem:[%s1276_s4 + $0xe0] sm:$0xff] %v674_v13  ;;  %v478_v21 = vadd.f32 %v1267_v24, %v477_v19 }
 0x13a   : > { %770 = vst [vmem:[%s1276_s4 + $0x1e0] sm:$0xff] %v706_v14  ;;  %v638_v22 = vadd.f32 %v1267_v24, %v637_v20  ;;  %v677_v23 = vmax.f32 %v483_v17, 0.0 }
 0x13b   : > { %v709_v25 = vmax.f32 %v643_v18, 0.0  ;;  %v676_v26 = vmax.f32 %v478_v21, 0.0 }
 0x13c   : > { %v708_v27 = vmax.f32 %v638_v22, 0.0  ;;  %741 = vst [vmem:[%s1276_s4 + $0xf8] sm:$0xff] %v677_v23 }
 0x13d   : > { %773 = vst [vmem:[%s1276_s4 + $0x1f8] sm:$0xff] %v709_v25  ;;  %740 = vst [vmem:[%s1276_s4 + $0xf0] sm:$0xff] %v676_v26 }
 0x13e   : > { %772 = vst [vmem:[%s1276_s4 + $0x1f0] sm:$0xff] %v708_v27 }
 0x13f PF: > { %s13_s12 = sadd.s32 1, %s1112_s12  }
 0x140   : > { %p10_p4 = scmp.ge.s32.totalorder %s13_s12, 6  }
 0x142   :  { %12 = sbr.rel (!%p10_p4) target bundleno = 1 (0x1), region = 62 }

// kernel: lenet_forward.7
= control target key start
LH: loop header
LB: loop body
LE: loop exit
PB: predicated region body
PF: predicated region fallthrough
CT: control target
= control target key end

     0   :  { %v429_v0 = vmov 0.0|0.0   ;;  %s833_s1 = inlined_call_operand.vmem [shape: f32[256,128], index: 1, kind: input, shape index: {}]   ;;  %s834_s0 = inlined_call_operand.vmem [shape: f32[200,256], index: 0, kind: input, shape index: {}]   ;;  %s835_s2 = inlined_call_operand.vmem [shape: f32[1,128], index: 2, kind: input, shape index: {}]   ;;  %s836_s3 = inlined_call_operand.vmem [shape: f32[200,128], index: 3, kind: output, shape index: {}]  }
   0x1   :  { %348 = vmatprep.subr.bf16.mxu0 %v429_v0  ;;  %v64_v1 = vld [vmem:[%s833_s1] sm:$0xff]  ;;  %v65_v2 = vld [vmem:[%s833_s1 + $0x8] sm:$0xff]  ;;  %396 = vmatprep.subr.bf16.mxu1 %v429_v0  ;;  %v66_v3 = vld [vmem:[%s833_s1 + $0x10] sm:$0xff] }
   0x2   :  { %v349_v4 = vpack.c.bf16 %v65_v2, %v64_v1  ;;  %v67_v5 = vld [vmem:[%s833_s1 + $0x18] sm:$0xff]  ;;  %v68_v7 = vld [vmem:[%s833_s1 + $0x20] sm:$0xff]  ;;  %v69_v8 = vld [vmem:[%s833_s1 + $0x28] sm:$0xff] }
   0x3   :  { %v352_v6 = vpack.c.bf16 %v67_v5, %v66_v3  ;;  %v355_v9 = vpack.c.bf16 %v69_v8, %v68_v7  ;;  %v70_v10 = vld [vmem:[%s833_s1 + $0x30] sm:$0xff]  ;;  %v71_v11 = vld [vmem:[%s833_s1 + $0x38] sm:$0xff]  ;;  %v15_v12 = vld [vmem:[%s834_s0 + $0x8] sm:$0xff] }
   0x4   :  { %350 = vmatpush1.bf16.msra.mxu0 %v349_v4  ;;  %412 = vmatpush1.bf16.msra.mxu1 %v349_v4  ;;  %v358_v13 = vpack.c.bf16 %v71_v11, %v70_v10  ;;  %v41_v14 = vld [vmem:[%s834_s0 + $0xd8] sm:$0xff]  ;;  %v72_v15 = vld [vmem:[%s833_s1 + $0x40] sm:$0xff]  ;;  %v73_v16 = vld [vmem:[%s833_s1 + $0x48] sm:$0xff] }
   0x5   :  { %351 = vmatprep.subr.bf16.mxu0 %v429_v0  ;;  %397 = vmatprep.subr.bf16.mxu1 %v429_v0  ;;  %v361_v17 = vpack.c.bf16 %v73_v16, %v72_v15  ;;  %v74_v18 = vld [vmem:[%s833_s1 + $0x50] sm:$0xff]  ;;  %v75_v19 = vld [vmem:[%s833_s1 + $0x58] sm:$0xff]  ;;  %v76_v21 = vld [vmem:[%s833_s1 + $0x60] sm:$0xff] }
   0x6   :  { %167 = vmatprep.mubr.f32.mxu0 %v15_v12  ;;  %232 = vmatprep.mubr.f32.mxu1 %v41_v14  ;;  %v364_v20 = vpack.c.bf16 %v75_v19, %v74_v18  ;;  %v77_v22 = vld [vmem:[%s833_s1 + $0x68] sm:$0xff]  ;;  %v78_v24 = vld [vmem:[%s833_s1 + $0x70] sm:$0xff]  ;;  %v79_v25 = vld [vmem:[%s833_s1 + $0x78] sm:$0xff] }
   0x7   :  { %v367_v23 = vpack.c.bf16 %v77_v22, %v76_v21  ;;  %v370_v26 = vpack.c.bf16 %v79_v25, %v78_v24  ;;  %v80_v27 = vld [vmem:[%s833_s1 + $0x80] sm:$0xff]  ;;  %v81_v28 = vld [vmem:[%s833_s1 + $0x88] sm:$0xff]  ;;  %v82_v30 = vld [vmem:[%s833_s1 + $0x90] sm:$0xff] }
   0x8   :  { %353 = vmatpush1.bf16.msra.mxu0 %v352_v6  ;;  %413 = vmatpush1.bf16.msra.mxu1 %v352_v6  ;;  %v373_v29 = vpack.c.bf16 %v81_v28, %v80_v27  ;;  %v83_v31 = vld [vmem:[%s833_s1 + $0x98] sm:$0xff]  ;;  %v84_v33 = vld [vmem:[%s833_s1 + $0xa0] sm:$0xff]  ;;  %v85_v34 = vld [vmem:[%s833_s1 + $0xa8] sm:$0xff] }
   0x9   :  { %354 = vmatprep.subr.bf16.mxu0 %v429_v0  ;;  %398 = vmatprep.subr.bf16.mxu1 %v429_v0  ;;  %v376_v32 = vpack.c.bf16 %v83_v31, %v82_v30  ;;  %v379_v35 = vpack.c.bf16 %v85_v34, %v84_v33  ;;  %v86_v36 = vld [vmem:[%s833_s1 + $0xb0] sm:$0xff]  ;;  %v87_v37 = vld [vmem:[%s833_s1 + $0xb8] sm:$0xff]  ;;  %v88_v39 = vld [vmem:[%s833_s1 + $0xc0] sm:$0xff] }
   0xa   :  { %v382_v38 = vpack.c.bf16 %v87_v37, %v86_v36  ;;  %v89_v40 = vld [vmem:[%s833_s1 + $0xc8] sm:$0xff]  ;;  %v90_v42 = vld [vmem:[%s833_s1 + $0xd0] sm:$0xff]  ;;  %v91_v43 = vld [vmem:[%s833_s1 + $0xd8] sm:$0xff] }
   0xb   :  { %v385_v41 = vpack.c.bf16 %v89_v40, %v88_v39  ;;  %v388_v44 = vpack.c.bf16 %v91_v43, %v90_v42  ;;  %v92_v45 = vld [vmem:[%s833_s1 + $0xe0] sm:$0xff]  ;;  %v93_v46 = vld [vmem:[%s833_s1 + $0xe8] sm:$0xff]  ;;  %v94_v48 = vld [vmem:[%s833_s1 + $0xf0] sm:$0xff] }
   0xc   :  { %356 = vmatpush1.bf16.msra.mxu0 %v355_v9  ;;  %414 = vmatpush1.bf16.msra.mxu1 %v355_v9  ;;  %v391_v47 = vpack.c.bf16 %v93_v46, %v92_v45  ;;  %v95_v49 = vld [vmem:[%s833_s1 + $0xf8] sm:$0xff]  ;;  %v14_v51 = vld [vmem:[%s834_s0] sm:$0xff]  ;;  %v40_v52 = vld [vmem:[%s834_s0 + $0xd0] sm:$0xff] }
   0xd   :  { %357 = vmatprep.subr.bf16.mxu0 %v429_v0  ;;  %399 = vmatprep.subr.bf16.mxu1 %v429_v0  ;;  %v394_v50 = vpack.c.bf16 %v95_v49, %v94_v48  ;;  %v17_v53 = vld [vmem:[%s834_s0 + $0x18] sm:$0xff]  ;;  %v43_v54 = vld [vmem:[%s834_s0 + $0xe8] sm:$0xff]  ;;  %v16_v55 = vld [vmem:[%s834_s0 + $0x10] sm:$0xff] }
   0xe   :  { %v42_v56 = vld [vmem:[%s834_s0 + $0xe0] sm:$0xff]  ;;  %v19_v57 = vld [vmem:[%s834_s0 + $0x28] sm:$0xff]  ;;  %v45_v58 = vld [vmem:[%s834_s0 + $0xf8] sm:$0xff] }
   0xf   :  { %v18_v59 = vld [vmem:[%s834_s0 + $0x20] sm:$0xff]  ;;  %v44_v60 = vld [vmem:[%s834_s0 + $0xf0] sm:$0xff]  ;;  %v21_v61 = vld [vmem:[%s834_s0 + $0x38] sm:$0xff] }
  0x10   :  { %359 = vmatpush1.bf16.msra.mxu0 %v358_v13  ;;  %415 = vmatpush1.bf16.msra.mxu1 %v358_v13  ;;  %v47_v62 = vld [vmem:[%s834_s0 + $0x108] sm:$0xff]  ;;  %v20_v63 = vld [vmem:[%s834_s0 + $0x30] sm:$0xff]  ;;  %v49_v2 = vld [vmem:[%s834_s0 + $0x118] sm:$0xff] }
  0x11   :  { %360 = vmatprep.subr.bf16.mxu0 %v429_v0  ;;  %400 = vmatprep.subr.bf16.mxu1 %v429_v0  ;;  %v23_v1 = vld [vmem:[%s834_s0 + $0x48] sm:$0xff]  ;;  %v22_v3 = vld [vmem:[%s834_s0 + $0x40] sm:$0xff]  ;;  %v48_v4 = vld [vmem:[%s834_s0 + $0x110] sm:$0xff] }
  0x12   :  { %v25_v5 = vld [vmem:[%s834_s0 + $0x58] sm:$0xff]  ;;  %v51_v6 = vld [vmem:[%s834_s0 + $0x128] sm:$0xff]  ;;  %v24_v7 = vld [vmem:[%s834_s0 + $0x50] sm:$0xff] }
  0x13   :  { %v50_v8 = vld [vmem:[%s834_s0 + $0x120] sm:$0xff]  ;;  %v27_v9 = vld [vmem:[%s834_s0 + $0x68] sm:$0xff]  ;;  %v53_v10 = vld [vmem:[%s834_s0 + $0x138] sm:$0xff] }
  0x14   :  { %362 = vmatpush1.bf16.msra.mxu0 %v361_v17  ;;  %416 = vmatpush1.bf16.msra.mxu1 %v361_v17  ;;  %v26_v11 = vld [vmem:[%s834_s0 + $0x60] sm:$0xff]  ;;  %v52_v12 = vld [vmem:[%s834_s0 + $0x130] sm:$0xff]  ;;  %v29_v13 = vld [vmem:[%s834_s0 + $0x78] sm:$0xff] }
  0x15   :  { %363 = vmatprep.subr.bf16.mxu0 %v429_v0  ;;  %401 = vmatprep.subr.bf16.mxu1 %v429_v0  ;;  %v55_v14 = vld [vmem:[%s834_s0 + $0x148] sm:$0xff]  ;;  %v28_v15 = vld [vmem:[%s834_s0 + $0x70] sm:$0xff]  ;;  %v54_v16 = vld [vmem:[%s834_s0 + $0x140] sm:$0xff] }
  0x16   :  { %v31_v17 = vld [vmem:[%s834_s0 + $0x88] sm:$0xff]  ;;  %v57_v18 = vld [vmem:[%s834_s0 + $0x158] sm:$0xff]  ;;  %v30_v19 = vld [vmem:[%s834_s0 + $0x80] sm:$0xff] }
  0x17   :  { %v33_v21 = vld [vmem:[%s834_s0 + $0x98] sm:$0xff]  ;;  %v59_v22 = vld [vmem:[%s834_s0 + $0x168] sm:$0xff]  ;;  %v58_v24 = vld [vmem:[%s834_s0 + $0x160] sm:$0xff] }
  0x18   :  { %365 = vmatpush1.bf16.msra.mxu0 %v364_v20  ;;  %417 = vmatpush1.bf16.msra.mxu1 %v364_v20  ;;  %v56_v20 = vld [vmem:[%s834_s0 + $0x150] sm:$0xff]  ;;  %v35_v25 = vld [vmem:[%s834_s0 + $0xa8] sm:$0xff]  ;;  %v34_v27 = vld [vmem:[%s834_s0 + $0xa0] sm:$0xff] }
  0x19   :  { %366 = vmatprep.subr.bf16.mxu0 %v429_v0  ;;  %402 = vmatprep.subr.bf16.mxu1 %v429_v0  ;;  %v60_v28 = vld [vmem:[%s834_s0 + $0x170] sm:$0xff]  ;;  %v63_v30 = vld [vmem:[%s834_s0 + $0x188] sm:$0xff]  ;;  %v38_v34 = vld [vmem:[%s834_s0 + $0xc0] sm:$0xff] }
  0x1a   :  { %v36_v31 = vld [vmem:[%s834_s0 + $0xb0] sm:$0xff]  ;;  %v39_v33 = vld [vmem:[%s834_s0 + $0xc8] sm:$0xff] }
  0x1c   :  { %368 = vmatpush1.bf16.msra.mxu0 %v367_v23  ;;  %418 = vmatpush1.bf16.msra.mxu1 %v367_v23  ;;  %v32_v23 = vld [vmem:[%s834_s0 + $0x90] sm:$0xff] }
  0x1d   :  { %369 = vmatprep.subr.bf16.mxu0 %v429_v0  ;;  %403 = vmatprep.subr.bf16.mxu1 %v429_v0 }
  0x20   :  { %371 = vmatpush1.bf16.msra.mxu0 %v370_v26  ;;  %419 = vmatpush1.bf16.msra.mxu1 %v370_v26  ;;  %v61_v26 = vld [vmem:[%s834_s0 + $0x178] sm:$0xff] }
  0x21   :  { %372 = vmatprep.subr.bf16.mxu0 %v429_v0  ;;  %404 = vmatprep.subr.bf16.mxu1 %v429_v0 }
  0x24   :  { %374 = vmatpush1.bf16.msra.mxu0 %v373_v29  ;;  %420 = vmatpush1.bf16.msra.mxu1 %v373_v29  ;;  %v37_v29 = vld [vmem:[%s834_s0 + $0xb8] sm:$0xff] }
  0x25   :  { %375 = vmatprep.subr.bf16.mxu0 %v429_v0  ;;  %405 = vmatprep.subr.bf16.mxu1 %v429_v0 }
  0x28   :  { %377 = vmatpush1.bf16.msra.mxu0 %v376_v32  ;;  %421 = vmatpush1.bf16.msra.mxu1 %v376_v32  ;;  %v62_v32 = vld [vmem:[%s834_s0 + $0x180] sm:$0xff] }
  0x29   :  { %378 = vmatprep.subr.bf16.mxu0 %v429_v0  ;;  %406 = vmatprep.subr.bf16.mxu1 %v429_v0 }
  0x2c   :  { %380 = vmatpush1.bf16.msra.mxu0 %v379_v35  ;;  %422 = vmatpush1.bf16.msra.mxu1 %v379_v35  ;;  %v731_v35 = vld [vmem:[%s835_s2] ss:$0 sm:$0xff] }
  0x2d   :  { %381 = vmatprep.subr.bf16.mxu0 %v429_v0  ;;  %407 = vmatprep.subr.bf16.mxu1 %v429_v0 }
  0x30   :  { %383 = vmatpush1.bf16.msra.mxu0 %v382_v38  ;;  %423 = vmatpush1.bf16.msra.mxu1 %v382_v38 }
  0x31   :  { %384 = vmatprep.subr.bf16.mxu0 %v429_v0  ;;  %408 = vmatprep.subr.bf16.mxu1 %v429_v0 }
  0x34   :  { %386 = vmatpush1.bf16.msra.mxu0 %v385_v41  ;;  %424 = vmatpush1.bf16.msra.mxu1 %v385_v41 }
  0x35   :  { %387 = vmatprep.subr.bf16.mxu0 %v429_v0  ;;  %409 = vmatprep.subr.bf16.mxu1 %v429_v0 }
  0x38   :  { %389 = vmatpush1.bf16.msra.mxu0 %v388_v44  ;;  %425 = vmatpush1.bf16.msra.mxu1 %v388_v44 }
  0x39   :  { %390 = vmatprep.subr.bf16.mxu0 %v429_v0  ;;  %410 = vmatprep.subr.bf16.mxu1 %v429_v0 }
  0x3c   :  { %392 = vmatpush1.bf16.msra.mxu0 %v391_v47  ;;  %426 = vmatpush1.bf16.msra.mxu1 %v391_v47 }
  0x3d   :  { %393 = vmatprep.subr.bf16.mxu0 %v429_v0  ;;  %411 = vmatprep.subr.bf16.mxu1 %v429_v0  ;;  %v46_v0 = vld [vmem:[%s834_s0 + $0x100] sm:$0xff] }
  0x40   :  { %395 = vmatpush1.bf16.msra.mxu0 %v394_v50  ;;  %427 = vmatpush1.bf16.msra.mxu1 %v394_v50 }
  0x43   :  { %168 = vmatmul.mubr.f32.vlgmr.msra.gmra.mrb[0].mxu0 %v14_v51  ;;  %233 = vmatmul.mubr.f32.vlgmr.msra.gmra.mrb[0].mxu1 %v40_v52 }
  0x44   :  { %172 = vmatprep.mubr.f32.mxu0 %v17_v53  ;;  %237 = vmatprep.mubr.f32.mxu1 %v43_v54 }
  0x47   :  { %173 = vmatmul.mubr.f32.gmra.mrb[2].mxu0 %v16_v55  ;;  %238 = vmatmul.mubr.f32.gmra.mrb[2].mxu1 %v42_v56 }
  0x48   :  { %177 = vmatprep.mubr.f32.mxu0 %v19_v57  ;;  %242 = vmatprep.mubr.f32.mxu1 %v45_v58 }
  0x4b   :  { %178 = vmatmul.mubr.f32.gmra.mrb[4].mxu0 %v18_v59  ;;  %243 = vmatmul.mubr.f32.gmra.mrb[4].mxu1 %v44_v60 }
  0x4c   :  { %182 = vmatprep.mubr.f32.mxu0 %v21_v61  ;;  %247 = vmatprep.mubr.f32.mxu1 %v47_v62 }
  0x4f   :  { %183 = vmatmul.mubr.f32.gmra.mrb[6].mxu0 %v20_v63  ;;  %248 = vmatmul.mubr.f32.gmra.mrb[6].mxu1 %v46_v0 }
  0x50   :  { %187 = vmatprep.mubr.f32.mxu0 %v23_v1  ;;  %252 = vmatprep.mubr.f32.mxu1 %v49_v2 }
  0x53   :  { %188 = vmatmul.mubr.f32.gmra.mrb[8].mxu0 %v22_v3  ;;  %253 = vmatmul.mubr.f32.gmra.mrb[8].mxu1 %v48_v4 }
  0x54   :  { %192 = vmatprep.mubr.f32.mxu0 %v25_v5  ;;  %257 = vmatprep.mubr.f32.mxu1 %v51_v6 }
  0x57   :  { %193 = vmatmul.mubr.f32.gmra.mrb[10].mxu0 %v24_v7  ;;  %258 = vmatmul.mubr.f32.gmra.mrb[10].mxu1 %v50_v8 }
  0x58   :  { %197 = vmatprep.mubr.f32.mxu0 %v27_v9  ;;  %262 = vmatprep.mubr.f32.mxu1 %v53_v10 }
  0x5b   :  { %198 = vmatmul.mubr.f32.gmra.mrb[12].mxu0 %v26_v11  ;;  %263 = vmatmul.mubr.f32.gmra.mrb[12].mxu1 %v52_v12 }
  0x5c   :  { %202 = vmatprep.mubr.f32.mxu0 %v29_v13  ;;  %267 = vmatprep.mubr.f32.mxu1 %v55_v14 }
  0x5f   :  { %203 = vmatmul.mubr.f32.gmra.mrb[14].mxu0 %v28_v15  ;;  %268 = vmatmul.mubr.f32.gmra.mrb[14].mxu1 %v54_v16 }
  0x60   :  { %207 = vmatprep.mubr.f32.mxu0 %v31_v17  ;;  %272 = vmatprep.mubr.f32.mxu1 %v57_v18 }
  0x63   :  { %208 = vmatmul.mubr.f32.gmra.mrb[16].mxu0 %v30_v19  ;;  %273 = vmatmul.mubr.f32.gmra.mrb[16].mxu1 %v56_v20 }
  0x64   :  { %212 = vmatprep.mubr.f32.mxu0 %v33_v21  ;;  %277 = vmatprep.mubr.f32.mxu1 %v59_v22 }
  0x67   :  { %213 = vmatmul.mubr.f32.gmra.mrb[18].mxu0 %v32_v23  ;;  %278 = vmatmul.mubr.f32.gmra.mrb[18].mxu1 %v58_v24 }
  0x68   :  { %217 = vmatprep.mubr.f32.mxu0 %v35_v25  ;;  %282 = vmatprep.mubr.f32.mxu1 %v61_v26 }
  0x6b   :  { %218 = vmatmul.mubr.f32.gmra.mrb[20].mxu0 %v34_v27  ;;  %283 = vmatmul.mubr.f32.gmra.mrb[20].mxu1 %v60_v28 }
  0x6c   :  { %222 = vmatprep.mubr.f32.mxu0 %v37_v29  ;;  %287 = vmatprep.mubr.f32.mxu1 %v63_v30 }
  0x6f   :  { %223 = vmatmul.mubr.f32.gmra.mrb[22].mxu0 %v36_v31  ;;  %288 = vmatmul.mubr.f32.gmra.mrb[22].mxu1 %v62_v32 }
  0x70   :  { %227 = vmatprep.mubr.f32.mxu0 %v39_v33 }
  0x73   :  { %228 = vmatmul.mubr.f32.gmra.mrb[24].mxu0 %v38_v34 }
 0x116   :  { %v169_v36 = vpop.f32.mrb[0].mxu0  ;;  %v234_v37 = vpop.f32.mrb[0].mxu1 }
 0x117   :  { %v170_v38 = vadd.f32 %v731_v35, %v169_v36  ;;  %v171_v39 = vpop.f32.mrb[1].mxu0  ;;  %v235_v40 = vadd.f32 %v731_v35, %v234_v37  ;;  %v236_v41 = vpop.f32.mrb[1].mxu1 }
 0x119   :  { %v293_v42 = vmax.f32 %v170_v38, 0.0  ;;  %v306_v43 = vmax.f32 %v235_v40, 0.0 }
 0x11a   :  { %v174_v44 = vpop.f32.mrb[2].mxu0  ;;  %v239_v45 = vpop.f32.mrb[2].mxu1 }
 0x11b   :  { %318 = vst [vmem:[%s836_s3] sm:$0xff] %v293_v42  ;;  %331 = vst [vmem:[%s836_s3 + $0x68] sm:$0xff] %v306_v43  ;;  %v175_v46 = vadd.f32 %v731_v35, %v174_v44  ;;  %v176_v47 = vpop.f32.mrb[3].mxu0  ;;  %v240_v48 = vadd.f32 %v731_v35, %v239_v45  ;;  %v241_v49 = vpop.f32.mrb[3].mxu1 }
 0x11d   :  { %v294_v50 = vmax.f32 %v175_v46, 0.0  ;;  %v307_v51 = vmax.f32 %v240_v48, 0.0 }
 0x11e   :  { %v179_v52 = vpop.f32.mrb[4].mxu0  ;;  %v244_v53 = vpop.f32.mrb[4].mxu1 }
 0x11f   :  { %319 = vst [vmem:[%s836_s3 + $0x8] sm:$0xff] %v294_v50  ;;  %332 = vst [vmem:[%s836_s3 + $0x70] sm:$0xff] %v307_v51  ;;  %v180_v54 = vadd.f32 %v731_v35, %v179_v52  ;;  %v181_v55 = vpop.f32.mrb[5].mxu0  ;;  %v245_v56 = vadd.f32 %v731_v35, %v244_v53  ;;  %v246_v57 = vpop.f32.mrb[5].mxu1 }
 0x121   :  { %v295_v58 = vmax.f32 %v180_v54, 0.0  ;;  %v308_v59 = vmax.f32 %v245_v56, 0.0 }
 0x122   :  { %v184_v60 = vpop.f32.mrb[6].mxu0  ;;  %v249_v61 = vpop.f32.mrb[6].mxu1 }
 0x123   :  { %320 = vst [vmem:[%s836_s3 + $0x10] sm:$0xff] %v295_v58  ;;  %333 = vst [vmem:[%s836_s3 + $0x78] sm:$0xff] %v308_v59  ;;  %v185_v62 = vadd.f32 %v731_v35, %v184_v60  ;;  %v186_v63 = vpop.f32.mrb[7].mxu0  ;;  %v250_v0 = vadd.f32 %v731_v35, %v249_v61  ;;  %v251_v1 = vpop.f32.mrb[7].mxu1 }
 0x125   :  { %v296_v2 = vmax.f32 %v185_v62, 0.0  ;;  %v309_v3 = vmax.f32 %v250_v0, 0.0 }
 0x126   :  { %v189_v4 = vpop.f32.mrb[8].mxu0  ;;  %v254_v5 = vpop.f32.mrb[8].mxu1 }
 0x127   :  { %321 = vst [vmem:[%s836_s3 + $0x18] sm:$0xff] %v296_v2  ;;  %334 = vst [vmem:[%s836_s3 + $0x80] sm:$0xff] %v309_v3  ;;  %v190_v6 = vadd.f32 %v731_v35, %v189_v4  ;;  %v191_v7 = vpop.f32.mrb[9].mxu0  ;;  %v255_v8 = vadd.f32 %v731_v35, %v254_v5  ;;  %v256_v9 = vpop.f32.mrb[9].mxu1 }
 0x129   :  { %v297_v10 = vmax.f32 %v190_v6, 0.0  ;;  %v310_v11 = vmax.f32 %v255_v8, 0.0 }
 0x12a   :  { %v194_v12 = vpop.f32.mrb[10].mxu0  ;;  %v259_v13 = vpop.f32.mrb[10].mxu1 }
 0x12b   :  { %322 = vst [vmem:[%s836_s3 + $0x20] sm:$0xff] %v297_v10  ;;  %335 = vst [vmem:[%s836_s3 + $0x88] sm:$0xff] %v310_v11  ;;  %v195_v14 = vadd.f32 %v731_v35, %v194_v12  ;;  %v196_v15 = vpop.f32.mrb[11].mxu0  ;;  %v260_v16 = vadd.f32 %v731_v35, %v259_v13  ;;  %v261_v17 = vpop.f32.mrb[11].mxu1 }
 0x12d   :  { %v298_v18 = vmax.f32 %v195_v14, 0.0  ;;  %v311_v19 = vmax.f32 %v260_v16, 0.0 }
 0x12e   :  { %v199_v20 = vpop.f32.mrb[12].mxu0  ;;  %v264_v21 = vpop.f32.mrb[12].mxu1 }
 0x12f   :  { %323 = vst [vmem:[%s836_s3 + $0x28] sm:$0xff] %v298_v18  ;;  %336 = vst [vmem:[%s836_s3 + $0x90] sm:$0xff] %v311_v19  ;;  %v200_v22 = vadd.f32 %v731_v35, %v199_v20  ;;  %v201_v23 = vpop.f32.mrb[13].mxu0  ;;  %v265_v24 = vadd.f32 %v731_v35, %v264_v21  ;;  %v266_v25 = vpop.f32.mrb[13].mxu1 }
 0x131   :  { %v299_v26 = vmax.f32 %v200_v22, 0.0  ;;  %v312_v27 = vmax.f32 %v265_v24, 0.0 }
 0x132   :  { %v204_v28 = vpop.f32.mrb[14].mxu0  ;;  %v269_v29 = vpop.f32.mrb[14].mxu1 }
 0x133   :  { %324 = vst [vmem:[%s836_s3 + $0x30] sm:$0xff] %v299_v26  ;;  %337 = vst [vmem:[%s836_s3 + $0x98] sm:$0xff] %v312_v27  ;;  %v205_v30 = vadd.f32 %v731_v35, %v204_v28  ;;  %v206_v31 = vpop.f32.mrb[15].mxu0  ;;  %v270_v32 = vadd.f32 %v731_v35, %v269_v29  ;;  %v271_v33 = vpop.f32.mrb[15].mxu1 }
 0x135   :  { %v300_v34 = vmax.f32 %v205_v30, 0.0  ;;  %v313_v36 = vmax.f32 %v270_v32, 0.0 }
 0x136   :  { %v209_v37 = vpop.f32.mrb[16].mxu0  ;;  %v274_v38 = vpop.f32.mrb[16].mxu1 }
 0x137   :  { %325 = vst [vmem:[%s836_s3 + $0x38] sm:$0xff] %v300_v34  ;;  %338 = vst [vmem:[%s836_s3 + $0xa0] sm:$0xff] %v313_v36  ;;  %v210_v39 = vadd.f32 %v731_v35, %v209_v37  ;;  %v211_v40 = vpop.f32.mrb[17].mxu0  ;;  %v275_v41 = vadd.f32 %v731_v35, %v274_v38  ;;  %v276_v42 = vpop.f32.mrb[17].mxu1 }
 0x139   :  { %v301_v43 = vmax.f32 %v210_v39, 0.0  ;;  %v314_v44 = vmax.f32 %v275_v41, 0.0 }
 0x13a   :  { %v214_v45 = vpop.f32.mrb[18].mxu0  ;;  %v279_v46 = vpop.f32.mrb[18].mxu1 }
 0x13b   :  { %326 = vst [vmem:[%s836_s3 + $0x40] sm:$0xff] %v301_v43  ;;  %339 = vst [vmem:[%s836_s3 + $0xa8] sm:$0xff] %v314_v44  ;;  %v215_v47 = vadd.f32 %v731_v35, %v214_v45  ;;  %v216_v48 = vpop.f32.mrb[19].mxu0  ;;  %v280_v49 = vadd.f32 %v731_v35, %v279_v46  ;;  %v281_v50 = vpop.f32.mrb[19].mxu1 }
 0x13d   :  { %v302_v51 = vmax.f32 %v215_v47, 0.0  ;;  %v315_v52 = vmax.f32 %v280_v49, 0.0 }
 0x13e   :  { %v219_v53 = vpop.f32.mrb[20].mxu0  ;;  %v284_v54 = vpop.f32.mrb[20].mxu1 }
 0x13f   :  { %327 = vst [vmem:[%s836_s3 + $0x48] sm:$0xff] %v302_v51  ;;  %340 = vst [vmem:[%s836_s3 + $0xb0] sm:$0xff] %v315_v52  ;;  %v220_v55 = vadd.f32 %v731_v35, %v219_v53  ;;  %v221_v56 = vpop.f32.mrb[21].mxu0  ;;  %v285_v57 = vadd.f32 %v731_v35, %v284_v54  ;;  %v286_v58 = vpop.f32.mrb[21].mxu1 }
 0x141   :  { %v303_v59 = vmax.f32 %v220_v55, 0.0  ;;  %v316_v60 = vmax.f32 %v285_v57, 0.0 }
 0x142   :  { %v224_v61 = vpop.f32.mrb[22].mxu0  ;;  %v289_v62 = vpop.f32.mrb[22].mxu1 }
 0x143   :  { %328 = vst [vmem:[%s836_s3 + $0x50] sm:$0xff] %v303_v59  ;;  %341 = vst [vmem:[%s836_s3 + $0xb8] sm:$0xff] %v316_v60  ;;  %v225_v63 = vadd.f32 %v731_v35, %v224_v61  ;;  %v226_v0 = vpop.f32.mrb[23].mxu0  ;;  %v290_v1 = vadd.f32 %v731_v35, %v289_v62  ;;  %v291_v2 = vpop.f32.mrb[23].mxu1 }
 0x145   :  { %v304_v3 = vmax.f32 %v225_v63, 0.0  ;;  %v317_v4 = vmax.f32 %v290_v1, 0.0 }
 0x146   :  { %v229_v5 = vpop.f32.mrb[24].mxu0 }
 0x147   :  { %329 = vst [vmem:[%s836_s3 + $0x58] sm:$0xff] %v304_v3  ;;  %342 = vst [vmem:[%s836_s3 + $0xc0] sm:$0xff] %v317_v4  ;;  %v230_v6 = vadd.f32 %v731_v35, %v229_v5  ;;  %v231_v7 = vpop.f32.mrb[25].mxu0 }
 0x149   :  { %v305_v8 = vmax.f32 %v230_v6, 0.0 }
 0x14b   :  { %330 = vst [vmem:[%s836_s3 + $0x60] sm:$0xff] %v305_v8 }

// kernel: lenet_forward.8
= control target key start
LH: loop header
LB: loop body
LE: loop exit
PB: predicated region body
PF: predicated region fallthrough
CT: control target
= control target key end

     0   :  { %s276_s6 = smov 0   ;;  %s303_s0 = inlined_call_operand.vmem [shape: f32[20,5,2,128], index: 0, kind: input, shape index: {}]   ;;  %s304_s1 = inlined_call_operand.vmem [shape: f32[10,5,128], index: 1, kind: output, shape index: {}]  }
   0x1 LB: > { %s282_s7 = sadd.s32 4294967295, %s264_s6   ;;  %p243_p0 = scmp.ge.s32.totalorder %s264_s6, 1  ;;  %s264_s6 = sphi %s276_s6, %s11_s6  }
   0x2   : > { %p89_p1 = scmp.lt.s32.totalorder %s264_s6, 11 }
   0x4   : > { %p90_p2 = pnand %p243_p0, %p89_p1 }
   0x5   : > { %s244_s8 = sshll.u32 (!%p90_p2), %s282_s7, 1  ;;  %vm135_vm0 = vcmask (!%p90_p2), 1041408   ;;  %p116_p4 = scmp.lt.s32.totalorder (!%p90_p2), %s282_s7, 9  ;;  %vm176_vm1 = vcmask (!%p90_p2), 1041409   ;;  %vm178_vm2 = vcmask (!%p90_p2), 1042434   ;;  %vm180_vm3 = vcmask (!%p90_p2), 1043459  }
   0x6   : > { %93 = sbr.rel (%p90_p2) target bundleno = 40 (0x28), region = 24  ;;  %p110_p3 = scmp.lt.s32.totalorder (!%p90_p2), %s244_s8, 19  ;;  %vm182_vm4 = vcmask (!%p90_p2), 1044484  }
   0xd   : > { %s306_s8 = smov (!%p110_p3, %s244_s8), 19  ;;  %s308_s7 = smov (!%p116_p4, %s282_s7), 9 }
   0xe   : > { %s249_s9 = smul.u32 10, %s306_s8  ;;  %s246_s13 = sshll.u32 %s308_s7, 3 }
   0xf   : > { %s119_s16 = scalar_lea.vmem %s304_s1, %s246_s13 }
  0x10   : > { %s114_s12 = scalar_lea.vmem %s303_s0, %s249_s9 }
  0x11   : > { %v120_v0 = vld [vmem:[%s114_s12] sm:$0x3]  ;;  %v121_v1 = vld [vmem:[%s114_s12 + $0x2] sm:$0x3]  ;;  %v122_v2 = vld [vmem:[%s114_s12 + $0x4] sm:$0x3] }
  0x12   : > { %v123_v3 = vld [vmem:[%s114_s12 + $0x6] sm:$0x3]  ;;  %v124_v4 = vld [vmem:[%s114_s12 + $0x8] sm:$0x3]  ;;  %v125_v5 = vld [vmem:[%s114_s12 + $0xa] sm:$0x3] }
  0x13   : > { %v126_v6 = vld [vmem:[%s114_s12 + $0xc] sm:$0x3]  ;;  %v127_v7 = vld [vmem:[%s114_s12 + $0xe] sm:$0x3]  ;;  %v128_v8 = vld [vmem:[%s114_s12 + $0x10] sm:$0x3]  ;;  %v130_v9 = vmax.f32 %v120_v0, %v125_v5 }
  0x14   : > { %v129_v10 = vld [vmem:[%s114_s12 + $0x12] sm:$0x3]  ;;  %v131_v11 = vmax.f32 %v121_v1, %v126_v6  ;;  %v132_v12 = vmax.f32 %v122_v2, %v127_v7  ;;  %v133_v13 = vmax.f32 %v123_v3, %v128_v8 }
  0x15   : > { %v134_v14 = vmax.f32 %v124_v4, %v129_v10  ;;  %v136_v15 = vsel %vm135_vm0, %v130_v9, -inf }
  0x16   : > { %v137_v16 = vrot.slane %v136_v15, 4  ;;  %v143_v17 = vsel %vm135_vm0, %v131_v11, -inf  ;;  %v150_v18 = vsel %vm135_vm0, %v132_v12, -inf  ;;  %v157_v19 = vsel %vm135_vm0, %v133_v13, -inf }
  0x17   : > { %v144_v20 = vrot.slane %v143_v17, 4  ;;  %v151_v21 = vrot.slane %v150_v18, 4  ;;  %v158_v22 = vrot.slane %v157_v19, 4  ;;  %v164_v23 = vsel %vm135_vm0, %v134_v14, -inf }
  0x18   : > { %v138_v24 = vmax.f32 %v136_v15, %v137_v16  ;;  %v165_v25 = vrot.slane %v164_v23, 4 }
  0x19   : > { %v145_v26 = vmax.f32 %v143_v17, %v144_v20  ;;  %v152_v27 = vmax.f32 %v150_v18, %v151_v21  ;;  %v159_v28 = vmax.f32 %v157_v19, %v158_v22 }
  0x1a   : > { %v139_v29 = vrot.slane %v138_v24, 2  ;;  %v166_v30 = vmax.f32 %v164_v23, %v165_v25 }
  0x1b   : > { %v146_v31 = vrot.slane %v145_v26, 2  ;;  %v153_v32 = vrot.slane %v152_v27, 2  ;;  %v160_v33 = vrot.slane %v159_v28, 2 }
  0x1c   : > { %v140_v34 = vmax.f32 %v138_v24, %v139_v29  ;;  %v167_v35 = vrot.slane %v166_v30, 2 }
  0x1d   : > { %v147_v36 = vmax.f32 %v145_v26, %v146_v31  ;;  %v154_v37 = vmax.f32 %v152_v27, %v153_v32  ;;  %v161_v38 = vmax.f32 %v159_v28, %v160_v33 }
  0x1e   : > { %v141_v39 = vrot.slane %v140_v34, 1  ;;  %v168_v40 = vmax.f32 %v166_v30, %v167_v35 }
  0x1f   : > { %v148_v41 = vrot.slane %v147_v36, 1  ;;  %v155_v42 = vrot.slane %v154_v37, 1  ;;  %v162_v43 = vrot.slane %v161_v38, 1 }
  0x20   : > { %v142_v44 = vmax.f32 %v140_v34, %v141_v39  ;;  %v169_v45 = vrot.slane %v168_v40, 1 }
  0x21   : > { %v149_v46 = vmax.f32 %v147_v36, %v148_v41  ;;  %v156_v47 = vmax.f32 %v154_v37, %v155_v42  ;;  %v163_v48 = vmax.f32 %v161_v38, %v162_v43 }
  0x22   : > { %v170_v49 = vmax.f32 %v168_v40, %v169_v45 }
  0x23   : > { %v177_v50 = vsel %vm176_vm1, %v149_v46, %v142_v44 }
  0x24   : > { %v179_v51 = vsel %vm178_vm2, %v156_v47, %v177_v50 }
  0x25   : > { %v181_v52 = vsel %vm180_vm3, %v163_v48, %v179_v51 }
  0x26   : > { %v183_v53 = vsel %vm182_vm4, %v170_v49, %v181_v52 }
  0x27   : > { %185 = vst [vmem:[%s119_s16] sm:$0x1f] %v183_v53 }
  0x28 PF: > { %s11_s6 = sadd.s32 1, %s264_s6  }
  0x29   : > { %p8_p5 = scmp.ge.s32.totalorder %s11_s6, 12  }
  0x2b   :  { %10 = sbr.rel (!%p8_p5) target bundleno = 1 (0x1), region = 54 }

// kernel: lenet_forward.9
= control target key start
LH: loop header
LB: loop body
LE: loop exit
PB: predicated region body
PF: predicated region fallthrough
CT: control target
= control target key end

     0   :  { %vm2600_vm0 = vmmov 0   ;;  %s4052_s1 = inlined_call_operand.vmem [shape: f32[3200,128], index: 1, kind: input, shape index: {}]   ;;  %s4053_s0 = inlined_call_operand.vmem [shape: f32[8,3200], index: 0, kind: input, shape index: {}]   ;;  %s4054_s2 = inlined_call_operand.vmem [shape: f32[1,128], index: 2, kind: input, shape index: {}]   ;;  %s4055_s3 = inlined_call_operand.vmem [shape: f32[128,128], index: 3, kind: input, shape index: {}]   ;;  %s4056_s5 = inlined_call_operand.vmem [shape: f32[128,128], index: 5, kind: input, shape index: {}]   ;;  %s4057_s4 = inlined_call_operand.vmem [shape: f32[1,128], index: 4, kind: input, shape index: {}]   ;;  %s4058_s6 = inlined_call_operand.vmem [shape: f32[1,128], index: 6, kind: input, shape index: {}]   ;;  %s4059_s7 = inlined_call_operand.vmem [shape: f32[8,128], index: 7, kind: output, shape index: {}]  }
   0x1   :  { %v67_v0 = vld [vmem:[%s4052_s1 + $0x80] sm:$0xff]  ;;  %v68_v1 = vld [vmem:[%s4052_s1 + $0x88] sm:$0xff]  ;;  %v69_v11 = vld [vmem:[%s4052_s1 + $0x90] sm:$0xff] }
   0x2   :  { %v51_v2 = vld [vmem:[%s4052_s1] sm:$0xff]  ;;  %v2140_v3 = vpack.c.bf16 %v68_v1, %v67_v0  ;;  %v52_v4 = vld [vmem:[%s4052_s1 + $0x8] sm:$0xff]  ;;  %v70_v13 = vld [vmem:[%s4052_s1 + $0x98] sm:$0xff] }
   0x3   :  { %v99_v5 = vld [vmem:[%s4052_s1 + $0x180] sm:$0xff]  ;;  %v100_v6 = vld [vmem:[%s4052_s1 + $0x188] sm:$0xff]  ;;  %v2142_v7 = vpack.c.bf16 %v52_v4, %v51_v2  ;;  %v53_v14 = vld [vmem:[%s4052_s1 + $0x10] sm:$0xff]  ;;  %v2144_v16 = vpack.c.bf16 %v70_v13, %v69_v11 }
   0x4   :  { %v2172_v8 = vpack.c.bf16 %v100_v6, %v99_v5  ;;  %v83_v9 = vld [vmem:[%s4052_s1 + $0x100] sm:$0xff]  ;;  %v84_v10 = vld [vmem:[%s4052_s1 + $0x108] sm:$0xff]  ;;  %2141 = vmatprep.subr.bf16.mxu0 %v2140_v3  ;;  %v54_v15 = vld [vmem:[%s4052_s1 + $0x18] sm:$0xff] }
   0x5   :  { %v2174_v12 = vpack.c.bf16 %v84_v10, %v83_v9  ;;  %2143 = vmatpush3.bf16.msra.mxu0 %v2142_v7  ;;  %v2146_v17 = vpack.c.bf16 %v54_v15, %v53_v14  ;;  %v101_v18 = vld [vmem:[%s4052_s1 + $0x190] sm:$0xff]  ;;  %v102_v19 = vld [vmem:[%s4052_s1 + $0x198] sm:$0xff]  ;;  %v71_v23 = vld [vmem:[%s4052_s1 + $0xa0] sm:$0xff] }
   0x6   :  { %2173 = vmatprep.subr.bf16.mxu1 %v2172_v8  ;;  %v85_v20 = vld [vmem:[%s4052_s1 + $0x110] sm:$0xff]  ;;  %v2176_v21 = vpack.c.bf16 %v102_v19, %v101_v18  ;;  %v86_v22 = vld [vmem:[%s4052_s1 + $0x118] sm:$0xff]  ;;  %v72_v24 = vld [vmem:[%s4052_s1 + $0xa8] sm:$0xff]  ;;  %2145 = vmatprep.subr.bf16.mxu0 %v2144_v16 }
   0x7   :  { %2175 = vmatpush3.bf16.msra.mxu1 %v2174_v12  ;;  %v2178_v25 = vpack.c.bf16 %v86_v22, %v85_v20  ;;  %v2148_v26 = vpack.c.bf16 %v72_v24, %v71_v23  ;;  %v55_v27 = vld [vmem:[%s4052_s1 + $0x20] sm:$0xff]  ;;  %v56_v28 = vld [vmem:[%s4052_s1 + $0x28] sm:$0xff]  ;;  %v73_v35 = vld [vmem:[%s4052_s1 + $0xb0] sm:$0xff] }
   0x8   :  { %v103_v29 = vld [vmem:[%s4052_s1 + $0x1a0] sm:$0xff]  ;;  %2177 = vmatprep.subr.bf16.mxu1 %v2176_v21  ;;  %v104_v30 = vld [vmem:[%s4052_s1 + $0x1a8] sm:$0xff]  ;;  %v2150_v33 = vpack.c.bf16 %v56_v28, %v55_v27  ;;  %v74_v36 = vld [vmem:[%s4052_s1 + $0xb8] sm:$0xff] }
   0x9   :  { %v87_v31 = vld [vmem:[%s4052_s1 + $0x120] sm:$0xff]  ;;  %v88_v32 = vld [vmem:[%s4052_s1 + $0x128] sm:$0xff]  ;;  %2147 = vmatpush3.bf16.msra.mxu0 %v2146_v17  ;;  %v2180_v34 = vpack.c.bf16 %v104_v30, %v103_v29  ;;  %v57_v37 = vld [vmem:[%s4052_s1 + $0x30] sm:$0xff]  ;;  %v2152_v39 = vpack.c.bf16 %v74_v36, %v73_v35 }
   0xa   :  { %2149 = vmatprep.subr.bf16.mxu0 %v2148_v26  ;;  %v2182_v38 = vpack.c.bf16 %v88_v32, %v87_v31  ;;  %v58_v40 = vld [vmem:[%s4052_s1 + $0x38] sm:$0xff]  ;;  %v105_v41 = vld [vmem:[%s4052_s1 + $0x1b0] sm:$0xff]  ;;  %v75_v46 = vld [vmem:[%s4052_s1 + $0xc0] sm:$0xff] }
   0xb   :  { %2179 = vmatpush3.bf16.msra.mxu1 %v2178_v25  ;;  %v106_v42 = vld [vmem:[%s4052_s1 + $0x1b8] sm:$0xff]  ;;  %v89_v44 = vld [vmem:[%s4052_s1 + $0x130] sm:$0xff]  ;;  %v76_v47 = vld [vmem:[%s4052_s1 + $0xc8] sm:$0xff]  ;;  %v2154_v48 = vpack.c.bf16 %v58_v40, %v57_v37 }
   0xc   :  { %2181 = vmatprep.subr.bf16.mxu1 %v2180_v34  ;;  %v2184_v43 = vpack.c.bf16 %v106_v42, %v105_v41  ;;  %v90_v45 = vld [vmem:[%s4052_s1 + $0x138] sm:$0xff]  ;;  %v107_v49 = vld [vmem:[%s4052_s1 + $0x1c0] sm:$0xff]  ;;  %v108_v50 = vld [vmem:[%s4052_s1 + $0x1c8] sm:$0xff]  ;;  %v2156_v52 = vpack.c.bf16 %v76_v47, %v75_v46 }
   0xd   :  { %2151 = vmatpush3.bf16.msra.mxu0 %v2150_v33  ;;  %v2186_v51 = vpack.c.bf16 %v90_v45, %v89_v44  ;;  %v59_v53 = vld [vmem:[%s4052_s1 + $0x40] sm:$0xff]  ;;  %v60_v54 = vld [vmem:[%s4052_s1 + $0x48] sm:$0xff]  ;;  %v2188_v56 = vpack.c.bf16 %v108_v50, %v107_v49  ;;  %v77_v58 = vld [vmem:[%s4052_s1 + $0xd0] sm:$0xff] }
   0xe   :  { %2153 = vmatprep.subr.bf16.mxu0 %v2152_v39  ;;  %v91_v55 = vld [vmem:[%s4052_s1 + $0x140] sm:$0xff]  ;;  %v92_v57 = vld [vmem:[%s4052_s1 + $0x148] sm:$0xff]  ;;  %v78_v59 = vld [vmem:[%s4052_s1 + $0xd8] sm:$0xff]  ;;  %v2158_v62 = vpack.c.bf16 %v60_v54, %v59_v53 }
   0xf   :  { %2183 = vmatpush3.bf16.msra.mxu1 %v2182_v38  ;;  %v109_v60 = vld [vmem:[%s4052_s1 + $0x1d0] sm:$0xff]  ;;  %v110_v61 = vld [vmem:[%s4052_s1 + $0x1d8] sm:$0xff]  ;;  %v2190_v63 = vpack.c.bf16 %v92_v57, %v91_v55  ;;  %v2160_v0 = vpack.c.bf16 %v78_v59, %v77_v58  ;;  %v79_v6 = vld [vmem:[%s4052_s1 + $0xe0] sm:$0xff] }
  0x10   :  { %2185 = vmatprep.subr.bf16.mxu1 %v2184_v43  ;;  %v61_v1 = vld [vmem:[%s4052_s1 + $0x50] sm:$0xff]  ;;  %v62_v2 = vld [vmem:[%s4052_s1 + $0x58] sm:$0xff]  ;;  %v2192_v4 = vpack.c.bf16 %v110_v61, %v109_v60  ;;  %v80_v7 = vld [vmem:[%s4052_s1 + $0xe8] sm:$0xff] }
  0x11   :  { %2155 = vmatpush3.bf16.msra.mxu0 %v2154_v48  ;;  %v93_v3 = vld [vmem:[%s4052_s1 + $0x150] sm:$0xff]  ;;  %v94_v5 = vld [vmem:[%s4052_s1 + $0x158] sm:$0xff]  ;;  %v111_v8 = vld [vmem:[%s4052_s1 + $0x1e0] sm:$0xff]  ;;  %v2162_v10 = vpack.c.bf16 %v62_v2, %v61_v1  ;;  %v2164_v14 = vpack.c.bf16 %v80_v7, %v79_v6 }
  0x12   :  { %2157 = vmatprep.subr.bf16.mxu0 %v2156_v52  ;;  %v112_v9 = vld [vmem:[%s4052_s1 + $0x1e8] sm:$0xff]  ;;  %v63_v11 = vld [vmem:[%s4052_s1 + $0x60] sm:$0xff]  ;;  %v2194_v13 = vpack.c.bf16 %v94_v5, %v93_v3  ;;  %v81_v19 = vld [vmem:[%s4052_s1 + $0xf0] sm:$0xff] }
  0x13   :  { %2187 = vmatpush3.bf16.msra.mxu1 %v2186_v51  ;;  %v27_v12 = vld [vmem:[%s4053_s0 + $0x8] sm:$0xff]  ;;  %v95_v16 = vld [vmem:[%s4052_s1 + $0x160] sm:$0xff]  ;;  %v2196_v18 = vpack.c.bf16 %v112_v9, %v111_v8  ;;  %v82_v20 = vld [vmem:[%s4052_s1 + $0xf8] sm:$0xff] }
  0x14   :  { %2189 = vmatprep.subr.bf16.mxu1 %v2188_v56  ;;  %v64_v15 = vld [vmem:[%s4052_s1 + $0x68] sm:$0xff]  ;;  %522 = vmatprep.mubr.f32.mxu0 %v27_v12  ;;  %v29_v21 = vld [vmem:[%s4053_s0 + $0x18] sm:$0xff]  ;;  %v113_v22 = vld [vmem:[%s4052_s1 + $0x1f0] sm:$0xff]  ;;  %v2168_v26 = vpack.c.bf16 %v82_v20, %v81_v19 }
  0x15   :  { %2159 = vmatpush3.bf16.msra.mxu0 %v2158_v62  ;;  %v96_v17 = vld [vmem:[%s4052_s1 + $0x168] sm:$0xff]  ;;  %v114_v23 = vld [vmem:[%s4052_s1 + $0x1f8] sm:$0xff]  ;;  %592 = vmatprep.mubr.f32.mxu1 %v29_v21  ;;  %v2166_v24 = vpack.c.bf16 %v64_v15, %v63_v11  ;;  %v65_v27 = vld [vmem:[%s4052_s1 + $0x70] sm:$0xff] }
  0x16   :  { %2161 = vmatprep.subr.bf16.mxu0 %v2160_v0  ;;  %v2198_v25 = vpack.c.bf16 %v96_v17, %v95_v16  ;;  %v66_v28 = vld [vmem:[%s4052_s1 + $0x78] sm:$0xff]  ;;  %v97_v29 = vld [vmem:[%s4052_s1 + $0x170] sm:$0xff]  ;;  %v2200_v30 = vpack.c.bf16 %v114_v23, %v113_v22  ;;  %v131_v32 = vld [vmem:[%s4052_s1 + $0x280] sm:$0xff] }
  0x17   :  { %2191 = vmatpush3.bf16.msra.mxu1 %v2190_v63  ;;  %v98_v31 = vld [vmem:[%s4052_s1 + $0x178] sm:$0xff]  ;;  %v132_v33 = vld [vmem:[%s4052_s1 + $0x288] sm:$0xff]  ;;  %v163_v34 = vld [vmem:[%s4052_s1 + $0x380] sm:$0xff]  ;;  %v2170_v36 = vpack.c.bf16 %v66_v28, %v65_v27 }
  0x18   :  { %2193 = vmatprep.subr.bf16.mxu1 %v2192_v4  ;;  %v164_v35 = vld [vmem:[%s4052_s1 + $0x388] sm:$0xff]  ;;  %v2202_v37 = vpack.c.bf16 %v98_v31, %v97_v29  ;;  %v2204_v38 = vpack.c.bf16 %v132_v33, %v131_v32  ;;  %v115_v39 = vld [vmem:[%s4052_s1 + $0x200] sm:$0xff]  ;;  %v133_v44 = vld [vmem:[%s4052_s1 + $0x290] sm:$0xff] }
  0x19   :  { %2163 = vmatpush3.bf16.msra.mxu0 %v2162_v10  ;;  %v116_v40 = vld [vmem:[%s4052_s1 + $0x208] sm:$0xff]  ;;  %v147_v41 = vld [vmem:[%s4052_s1 + $0x300] sm:$0xff]  ;;  %v2236_v42 = vpack.c.bf16 %v164_v35, %v163_v34  ;;  %v134_v45 = vld [vmem:[%s4052_s1 + $0x298] sm:$0xff] }
  0x1a   :  { %2165 = vmatprep.subr.bf16.mxu0 %v2164_v14  ;;  %v148_v43 = vld [vmem:[%s4052_s1 + $0x308] sm:$0xff]  ;;  %v165_v46 = vld [vmem:[%s4052_s1 + $0x390] sm:$0xff]  ;;  %v166_v47 = vld [vmem:[%s4052_s1 + $0x398] sm:$0xff]  ;;  %v2206_v49 = vpack.c.bf16 %v116_v40, %v115_v39  ;;  %v2208_v52 = vpack.c.bf16 %v134_v45, %v133_v44 }
  0x1b   :  { %2195 = vmatpush3.bf16.msra.mxu1 %v2194_v13  ;;  %v26_v48 = vld [vmem:[%s4053_s0] sm:$0xff]  ;;  %v28_v50 = vld [vmem:[%s4053_s0 + $0x10] sm:$0xff]  ;;  %v2238_v51 = vpack.c.bf16 %v148_v43, %v147_v41  ;;  %v118_v54 = vld [vmem:[%s4052_s1 + $0x218] sm:$0xff]  ;;  %v2240_v56 = vpack.c.bf16 %v166_v47, %v165_v46 }
  0x1c   :  { %2197 = vmatprep.subr.bf16.mxu1 %v2196_v18  ;;  %v117_v53 = vld [vmem:[%s4052_s1 + $0x210] sm:$0xff]  ;;  %v150_v57 = vld [vmem:[%s4052_s1 + $0x318] sm:$0xff]  ;;  %v135_v58 = vld [vmem:[%s4052_s1 + $0x2a0] sm:$0xff] }
  0x1d   :  { %2167 = vmatpush3.bf16.msra.mxu0 %v2166_v24  ;;  %v149_v55 = vld [vmem:[%s4052_s1 + $0x310] sm:$0xff]  ;;  %v136_v59 = vld [vmem:[%s4052_s1 + $0x2a8] sm:$0xff]  ;;  %v167_v60 = vld [vmem:[%s4052_s1 + $0x3a0] sm:$0xff]  ;;  %v2210_v62 = vpack.c.bf16 %v118_v54, %v117_v53 }
  0x1e   :  { %2169 = vmatprep.subr.bf16.mxu0 %v2168_v26  ;;  %v168_v61 = vld [vmem:[%s4052_s1 + $0x3a8] sm:$0xff]  ;;  %v2242_v63 = vpack.c.bf16 %v150_v57, %v149_v55  ;;  %v2212_v0 = vpack.c.bf16 %v136_v59, %v135_v58  ;;  %v119_v1 = vld [vmem:[%s4052_s1 + $0x220] sm:$0xff]  ;;  %v137_v6 = vld [vmem:[%s4052_s1 + $0x2b0] sm:$0xff] }
  0x1f   :  { %2199 = vmatpush3.bf16.msra.mxu1 %v2198_v25  ;;  %v120_v2 = vld [vmem:[%s4052_s1 + $0x228] sm:$0xff]  ;;  %v151_v3 = vld [vmem:[%s4052_s1 + $0x320] sm:$0xff]  ;;  %v2244_v4 = vpack.c.bf16 %v168_v61, %v167_v60  ;;  %v138_v7 = vld [vmem:[%s4052_s1 + $0x2b8] sm:$0xff] }
  0x20   :  { %2201 = vmatprep.subr.bf16.mxu1 %v2200_v30  ;;  %v152_v5 = vld [vmem:[%s4052_s1 + $0x328] sm:$0xff]  ;;  %v169_v8 = vld [vmem:[%s4052_s1 + $0x3b0] sm:$0xff]  ;;  %v170_v9 = vld [vmem:[%s4052_s1 + $0x3b8] sm:$0xff]  ;;  %v2214_v10 = vpack.c.bf16 %v120_v2, %v119_v1  ;;  %v2216_v12 = vpack.c.bf16 %v138_v7, %v137_v6 }
  0x21   :  { %2171 = vmatpush3.bf16.msra.mxu0 %v2170_v36  ;;  %v2246_v11 = vpack.c.bf16 %v152_v5, %v151_v3  ;;  %v121_v13 = vld [vmem:[%s4052_s1 + $0x230] sm:$0xff]  ;;  %v122_v14 = vld [vmem:[%s4052_s1 + $0x238] sm:$0xff]  ;;  %v2248_v16 = vpack.c.bf16 %v170_v9, %v169_v8  ;;  %v139_v18 = vld [vmem:[%s4052_s1 + $0x2c0] sm:$0xff] }
  0x22   :  { %2205 = vmatprep.subr.bf16.mxu0 %v2204_v38  ;;  %v153_v15 = vld [vmem:[%s4052_s1 + $0x330] sm:$0xff]  ;;  %v154_v17 = vld [vmem:[%s4052_s1 + $0x338] sm:$0xff]  ;;  %v140_v19 = vld [vmem:[%s4052_s1 + $0x2c8] sm:$0xff]  ;;  %v2218_v23 = vpack.c.bf16 %v122_v14, %v121_v13 }
  0x23   :  { %2203 = vmatpush3.bf16.msra.mxu1 %v2202_v37  ;;  %v171_v20 = vld [vmem:[%s4052_s1 + $0x3c0] sm:$0xff]  ;;  %v172_v21 = vld [vmem:[%s4052_s1 + $0x3c8] sm:$0xff]  ;;  %v2250_v25 = vpack.c.bf16 %v154_v17, %v153_v15  ;;  %v2220_v26 = vpack.c.bf16 %v140_v19, %v139_v18  ;;  %v33_v29 = vld [vmem:[%s4053_s0 + $0x38] sm:$0xff] }
  0x24   :  { %2237 = vmatprep.subr.bf16.mxu1 %v2236_v42  ;;  %523 = vmatmul.mubr.f32.vlgmr.msra.gmra.mrb[0].mxu0 %v26_v48  ;;  %v31_v22 = vld [vmem:[%s4053_s0 + $0x28] sm:$0xff]  ;;  %v123_v24 = vld [vmem:[%s4052_s1 + $0x240] sm:$0xff]  ;;  %v2252_v30 = vpack.c.bf16 %v172_v21, %v171_v20  ;;  %v141_v32 = vld [vmem:[%s4052_s1 + $0x2d0] sm:$0xff] }
  0x25   :  { %2207 = vmatpush3.bf16.msra.mxu0 %v2206_v49  ;;  %662 = vmatprep.mubr.f32.mxu0 %v31_v22  ;;  %v124_v27 = vld [vmem:[%s4052_s1 + $0x248] sm:$0xff]  ;;  %v155_v28 = vld [vmem:[%s4052_s1 + $0x340] sm:$0xff]  ;;  %v142_v33 = vld [vmem:[%s4052_s1 + $0x2d8] sm:$0xff] }
  0x26   :  { %593 = vmatmul.mubr.f32.vlgmr.msra.gmra.mrb[0].mxu1 %v28_v50  ;;  %2209 = vmatprep.subr.bf16.mxu0 %v2208_v52  ;;  %v156_v31 = vld [vmem:[%s4052_s1 + $0x348] sm:$0xff]  ;;  %v173_v34 = vld [vmem:[%s4052_s1 + $0x3d0] sm:$0xff]  ;;  %v174_v35 = vld [vmem:[%s4052_s1 + $0x3d8] sm:$0xff]  ;;  %v2222_v36 = vpack.c.bf16 %v124_v27, %v123_v24  ;;  %v2224_v38 = vpack.c.bf16 %v142_v33, %v141_v32 }
  0x27   :  { %2239 = vmatpush3.bf16.msra.mxu1 %v2238_v51  ;;  %732 = vmatprep.mubr.f32.mxu1 %v33_v29  ;;  %v2254_v37 = vpack.c.bf16 %v156_v31, %v155_v28  ;;  %v125_v39 = vld [vmem:[%s4052_s1 + $0x250] sm:$0xff]  ;;  %v126_v40 = vld [vmem:[%s4052_s1 + $0x258] sm:$0xff]  ;;  %v2256_v42 = vpack.c.bf16 %v174_v35, %v173_v34  ;;  %v143_v44 = vld [vmem:[%s4052_s1 + $0x2e0] sm:$0xff] }
  0x28   :  { %2241 = vmatprep.subr.bf16.mxu1 %v2240_v56  ;;  %v157_v41 = vld [vmem:[%s4052_s1 + $0x350] sm:$0xff]  ;;  %v158_v43 = vld [vmem:[%s4052_s1 + $0x358] sm:$0xff]  ;;  %v144_v45 = vld [vmem:[%s4052_s1 + $0x2e8] sm:$0xff]  ;;  %v2226_v48 = vpack.c.bf16 %v126_v40, %v125_v39 }
  0x29   :  { %2211 = vmatpush3.bf16.msra.mxu0 %v2210_v62  ;;  %v175_v46 = vld [vmem:[%s4052_s1 + $0x3e0] sm:$0xff]  ;;  %v176_v47 = vld [vmem:[%s4052_s1 + $0x3e8] sm:$0xff]  ;;  %v2258_v49 = vpack.c.bf16 %v158_v43, %v157_v41  ;;  %v2228_v50 = vpack.c.bf16 %v144_v45, %v143_v44  ;;  %v145_v56 = vld [vmem:[%s4052_s1 + $0x2f0] sm:$0xff] }
  0x2a   :  { %2213 = vmatprep.subr.bf16.mxu0 %v2212_v0  ;;  %v127_v51 = vld [vmem:[%s4052_s1 + $0x260] sm:$0xff]  ;;  %v128_v52 = vld [vmem:[%s4052_s1 + $0x268] sm:$0xff]  ;;  %v2260_v54 = vpack.c.bf16 %v176_v47, %v175_v46  ;;  %v146_v57 = vld [vmem:[%s4052_s1 + $0x2f8] sm:$0xff] }
  0x2b   :  { %2243 = vmatpush3.bf16.msra.mxu1 %v2242_v63  ;;  %v159_v53 = vld [vmem:[%s4052_s1 + $0x360] sm:$0xff]  ;;  %v160_v55 = vld [vmem:[%s4052_s1 + $0x368] sm:$0xff]  ;;  %v177_v58 = vld [vmem:[%s4052_s1 + $0x3f0] sm:$0xff]  ;;  %v2230_v60 = vpack.c.bf16 %v128_v52, %v127_v51  ;;  %v2232_v62 = vpack.c.bf16 %v146_v57, %v145_v56 }
  0x2c   :  { %2245 = vmatprep.subr.bf16.mxu1 %v2244_v4  ;;  %v178_v59 = vld [vmem:[%s4052_s1 + $0x3f8] sm:$0xff]  ;;  %v2262_v61 = vpack.c.bf16 %v160_v55, %v159_v53  ;;  %v129_v63 = vld [vmem:[%s4052_s1 + $0x270] sm:$0xff]  ;;  %v195_v4 = vld [vmem:[%s4052_s1 + $0x480] sm:$0xff] }
  0x2d   :  { %2215 = vmatpush3.bf16.msra.mxu0 %v2214_v10  ;;  %v130_v0 = vld [vmem:[%s4052_s1 + $0x278] sm:$0xff]  ;;  %v161_v1 = vld [vmem:[%s4052_s1 + $0x370] sm:$0xff]  ;;  %v2264_v2 = vpack.c.bf16 %v178_v59, %v177_v58  ;;  %v196_v5 = vld [vmem:[%s4052_s1 + $0x488] sm:$0xff] }
  0x2e   :  { %2217 = vmatprep.subr.bf16.mxu0 %v2216_v12  ;;  %v162_v3 = vld [vmem:[%s4052_s1 + $0x378] sm:$0xff]  ;;  %v227_v6 = vld [vmem:[%s4052_s1 + $0x580] sm:$0xff]  ;;  %v228_v7 = vld [vmem:[%s4052_s1 + $0x588] sm:$0xff]  ;;  %v2234_v8 = vpack.c.bf16 %v130_v0, %v129_v63  ;;  %v2268_v10 = vpack.c.bf16 %v196_v5, %v195_v4 }
  0x2f   :  { %2247 = vmatpush3.bf16.msra.mxu1 %v2246_v11  ;;  %v2266_v9 = vpack.c.bf16 %v162_v3, %v161_v1  ;;  %v179_v11 = vld [vmem:[%s4052_s1 + $0x400] sm:$0xff]  ;;  %v180_v12 = vld [vmem:[%s4052_s1 + $0x408] sm:$0xff]  ;;  %v2300_v14 = vpack.c.bf16 %v228_v7, %v227_v6  ;;  %v198_v17 = vld [vmem:[%s4052_s1 + $0x498] sm:$0xff] }
  0x30   :  { %2249 = vmatprep.subr.bf16.mxu1 %v2248_v16  ;;  %v211_v13 = vld [vmem:[%s4052_s1 + $0x500] sm:$0xff]  ;;  %v212_v15 = vld [vmem:[%s4052_s1 + $0x508] sm:$0xff]  ;;  %v197_v16 = vld [vmem:[%s4052_s1 + $0x490] sm:$0xff]  ;;  %v2270_v21 = vpack.c.bf16 %v180_v12, %v179_v11 }
  0x31   :  { %2219 = vmatpush3.bf16.msra.mxu0 %v2218_v23  ;;  %v229_v18 = vld [vmem:[%s4052_s1 + $0x590] sm:$0xff]  ;;  %v230_v19 = vld [vmem:[%s4052_s1 + $0x598] sm:$0xff]  ;;  %v30_v20 = vld [vmem:[%s4053_s0 + $0x20] sm:$0xff]  ;;  %v2302_v23 = vpack.c.bf16 %v212_v15, %v211_v13  ;;  %v2272_v24 = vpack.c.bf16 %v198_v17, %v197_v16 }
  0x32   :  { %2221 = vmatprep.subr.bf16.mxu0 %v2220_v26  ;;  %v32_v22 = vld [vmem:[%s4053_s0 + $0x30] sm:$0xff]  ;;  %v182_v26 = vld [vmem:[%s4052_s1 + $0x418] sm:$0xff]  ;;  %v2304_v28 = vpack.c.bf16 %v230_v19, %v229_v18  ;;  %v200_v31 = vld [vmem:[%s4052_s1 + $0x4a8] sm:$0xff] }
  0x33   :  { %2251 = vmatpush3.bf16.msra.mxu1 %v2250_v25  ;;  %v181_v25 = vld [vmem:[%s4052_s1 + $0x410] sm:$0xff]  ;;  %v214_v29 = vld [vmem:[%s4052_s1 + $0x518] sm:$0xff]  ;;  %v231_v32 = vld [vmem:[%s4052_s1 + $0x5a0] sm:$0xff] }
  0x34   :  { %2253 = vmatprep.subr.bf16.mxu1 %v2252_v30  ;;  %v213_v27 = vld [vmem:[%s4052_s1 + $0x510] sm:$0xff]  ;;  %v199_v30 = vld [vmem:[%s4052_s1 + $0x4a0] sm:$0xff]  ;;  %v232_v33 = vld [vmem:[%s4052_s1 + $0x5a8] sm:$0xff]  ;;  %v2274_v35 = vpack.c.bf16 %v182_v26, %v181_v25 }
  0x35   :  { %2223 = vmatpush3.bf16.msra.mxu0 %v2222_v36  ;;  %v35_v34 = vld [vmem:[%s4053_s0 + $0x48] sm:$0xff]  ;;  %v37_v36 = vld [vmem:[%s4053_s0 + $0x58] sm:$0xff]  ;;  %v183_v39 = vld [vmem:[%s4052_s1 + $0x420] sm:$0xff] }
  0x36   :  { %2225 = vmatprep.subr.bf16.mxu0 %v2224_v38  ;;  %v2276_v38 = vpack.c.bf16 %v200_v31, %v199_v30  ;;  %v184_v40 = vld [vmem:[%s4052_s1 + $0x428] sm:$0xff]  ;;  %v215_v41 = vld [vmem:[%s4052_s1 + $0x520] sm:$0xff]  ;;  %v201_v44 = vld [vmem:[%s4052_s1 + $0x4b0] sm:$0xff] }
  0x37   :  { %2255 = vmatpush3.bf16.msra.mxu1 %v2254_v37  ;;  %v2306_v37 = vpack.c.bf16 %v214_v29, %v213_v27  ;;  %v216_v43 = vld [vmem:[%s4052_s1 + $0x528] sm:$0xff]  ;;  %v202_v45 = vld [vmem:[%s4052_s1 + $0x4b8] sm:$0xff]  ;;  %v233_v46 = vld [vmem:[%s4052_s1 + $0x5b0] sm:$0xff] }
  0x38   :  { %2257 = vmatprep.subr.bf16.mxu1 %v2256_v42  ;;  %v2308_v42 = vpack.c.bf16 %v232_v33, %v231_v32  ;;  %v234_v47 = vld [vmem:[%s4052_s1 + $0x5b8] sm:$0xff]  ;;  %v185_v51 = vld [vmem:[%s4052_s1 + $0x430] sm:$0xff]  ;;  %v203_v56 = vld [vmem:[%s4052_s1 + $0x4c0] sm:$0xff] }
  0x39   :  { %2227 = vmatpush3.bf16.msra.mxu0 %v2226_v48  ;;  %v2278_v48 = vpack.c.bf16 %v184_v40, %v183_v39  ;;  %v186_v52 = vld [vmem:[%s4052_s1 + $0x438] sm:$0xff]  ;;  %v217_v53 = vld [vmem:[%s4052_s1 + $0x530] sm:$0xff]  ;;  %v204_v57 = vld [vmem:[%s4052_s1 + $0x4c8] sm:$0xff] }
  0x3a   :  { %2229 = vmatprep.subr.bf16.mxu0 %v2228_v50  ;;  %v2280_v50 = vpack.c.bf16 %v202_v45, %v201_v44  ;;  %v218_v55 = vld [vmem:[%s4052_s1 + $0x538] sm:$0xff]  ;;  %v235_v58 = vld [vmem:[%s4052_s1 + $0x5c0] sm:$0xff]  ;;  %v236_v59 = vld [vmem:[%s4052_s1 + $0x5c8] sm:$0xff] }
  0x3b   :  { %2259 = vmatpush3.bf16.msra.mxu1 %v2258_v49  ;;  %v2310_v49 = vpack.c.bf16 %v216_v43, %v215_v41  ;;  %v187_v63 = vld [vmem:[%s4052_s1 + $0x440] sm:$0xff]  ;;  %v188_v0 = vld [vmem:[%s4052_s1 + $0x448] sm:$0xff]  ;;  %v205_v4 = vld [vmem:[%s4052_s1 + $0x4d0] sm:$0xff] }
  0x3c   :  { %2261 = vmatprep.subr.bf16.mxu1 %v2260_v54  ;;  %v2312_v54 = vpack.c.bf16 %v234_v47, %v233_v46  ;;  %v219_v1 = vld [vmem:[%s4052_s1 + $0x540] sm:$0xff]  ;;  %v220_v3 = vld [vmem:[%s4052_s1 + $0x548] sm:$0xff]  ;;  %v206_v5 = vld [vmem:[%s4052_s1 + $0x4d8] sm:$0xff] }
  0x3d   :  { %2231 = vmatpush3.bf16.msra.mxu0 %v2230_v60  ;;  %v2282_v60 = vpack.c.bf16 %v186_v52, %v185_v51  ;;  %v237_v6 = vld [vmem:[%s4052_s1 + $0x5d0] sm:$0xff]  ;;  %v238_v7 = vld [vmem:[%s4052_s1 + $0x5d8] sm:$0xff]  ;;  %v207_v16 = vld [vmem:[%s4052_s1 + $0x4e0] sm:$0xff] }
  0x3e   :  { %2233 = vmatprep.subr.bf16.mxu0 %v2232_v62  ;;  %v2284_v62 = vpack.c.bf16 %v204_v57, %v203_v56  ;;  %v189_v11 = vld [vmem:[%s4052_s1 + $0x450] sm:$0xff]  ;;  %v190_v12 = vld [vmem:[%s4052_s1 + $0x458] sm:$0xff]  ;;  %v208_v17 = vld [vmem:[%s4052_s1 + $0x4e8] sm:$0xff] }
  0x3f   :  { %2263 = vmatpush3.bf16.msra.mxu1 %v2262_v61  ;;  %v2314_v61 = vpack.c.bf16 %v218_v55, %v217_v53  ;;  %v221_v13 = vld [vmem:[%s4052_s1 + $0x550] sm:$0xff]  ;;  %v222_v15 = vld [vmem:[%s4052_s1 + $0x558] sm:$0xff]  ;;  %v239_v18 = vld [vmem:[%s4052_s1 + $0x5e0] sm:$0xff] }
  0x40   :  { %2265 = vmatprep.subr.bf16.mxu1 %v2264_v2  ;;  %v2316_v2 = vpack.c.bf16 %v236_v59, %v235_v58  ;;  %v240_v19 = vld [vmem:[%s4052_s1 + $0x5e8] sm:$0xff]  ;;  %v223_v25 = vld [vmem:[%s4052_s1 + $0x560] sm:$0xff]  ;;  %v210_v29 = vld [vmem:[%s4052_s1 + $0x4f8] sm:$0xff] }
  0x41   :  { %2235 = vmatpush3.bf16.msra.mxu0 %v2234_v8  ;;  %v2286_v8 = vpack.c.bf16 %v188_v0, %v187_v63  ;;  %v2324_v26 = vpack.c.bf16 %v240_v19, %v239_v18  ;;  %v224_v27 = vld [vmem:[%s4052_s1 + $0x568] sm:$0xff]  ;;  %v241_v30 = vld [vmem:[%s4052_s1 + $0x5f0] sm:$0xff]  ;;  %v242_v31 = vld [vmem:[%s4052_s1 + $0x5f8] sm:$0xff] }
  0x42   :  { %2269 = vmatprep.subr.bf16.mxu0 %v2268_v10  ;;  %v2288_v10 = vpack.c.bf16 %v206_v5, %v205_v4  ;;  %v2326_v33 = vpack.c.bf16 %v224_v27, %v223_v25  ;;  %v226_v39 = vld [vmem:[%s4052_s1 + $0x578] sm:$0xff]  ;;  %v259_v40 = vld [vmem:[%s4052_s1 + $0x680] sm:$0xff]  ;;  %v260_v41 = vld [vmem:[%s4052_s1 + $0x688] sm:$0xff] }
  0x43   :  { %2267 = vmatpush3.bf16.msra.mxu1 %v2266_v9  ;;  %v2318_v9 = vpack.c.bf16 %v220_v3, %v219_v1  ;;  %v292_v43 = vld [vmem:[%s4052_s1 + $0x788] sm:$0xff]  ;;  %v2332_v46 = vpack.c.bf16 %v260_v41, %v259_v40  ;;  %v243_v47 = vld [vmem:[%s4052_s1 + $0x600] sm:$0xff]  ;;  %v261_v52 = vld [vmem:[%s4052_s1 + $0x690] sm:$0xff] }
  0x44   :  { %2301 = vmatprep.subr.bf16.mxu1 %v2300_v14  ;;  %663 = vmatmul.mubr.f32.vlgmr.msra.gmra.mrb[2].mxu0 %v30_v20  ;;  %v2320_v14 = vpack.c.bf16 %v238_v7, %v237_v6  ;;  %v2290_v20 = vpack.c.bf16 %v190_v12, %v189_v11  ;;  %v276_v51 = vld [vmem:[%s4052_s1 + $0x708] sm:$0xff]  ;;  %v262_v53 = vld [vmem:[%s4052_s1 + $0x698] sm:$0xff]  ;;  %v34_v56 = vld [vmem:[%s4053_s0 + $0x40] sm:$0xff] }
  0x45   :  { %2271 = vmatpush3.bf16.msra.mxu0 %v2270_v21  ;;  %802 = vmatprep.mubr.f32.mxu0 %v35_v34  ;;  %v2322_v21 = vpack.c.bf16 %v222_v15, %v221_v13  ;;  %v294_v55 = vld [vmem:[%s4052_s1 + $0x798] sm:$0xff]  ;;  %v36_v58 = vld [vmem:[%s4053_s0 + $0x50] sm:$0xff]  ;;  %v264_v3 = vld [vmem:[%s4052_s1 + $0x6a8] sm:$0xff] }
  0x46   :  { %733 = vmatmul.mubr.f32.vlgmr.msra.gmra.mrb[2].mxu1 %v32_v22  ;;  %2273 = vmatprep.subr.bf16.mxu0 %v2272_v24  ;;  %v2292_v22 = vpack.c.bf16 %v208_v17, %v207_v16  ;;  %v192_v24 = vld [vmem:[%s4052_s1 + $0x468] sm:$0xff]  ;;  %v277_v63 = vld [vmem:[%s4052_s1 + $0x710] sm:$0xff]  ;;  %v278_v1 = vld [vmem:[%s4052_s1 + $0x718] sm:$0xff] }
  0x47   :  { %2303 = vmatpush3.bf16.msra.mxu1 %v2302_v23  ;;  %872 = vmatprep.mubr.f32.mxu1 %v37_v36  ;;  %v191_v23 = vld [vmem:[%s4052_s1 + $0x460] sm:$0xff]  ;;  %v194_v36 = vld [vmem:[%s4052_s1 + $0x478] sm:$0xff]  ;;  %v296_v5 = vld [vmem:[%s4052_s1 + $0x7a8] sm:$0xff] }
  0x48   :  { %2305 = vmatprep.subr.bf16.mxu1 %v2304_v28  ;;  %v209_v28 = vld [vmem:[%s4052_s1 + $0x4f0] sm:$0xff]  ;;  %v2294_v32 = vpack.c.bf16 %v192_v24, %v191_v23  ;;  %v295_v4 = vld [vmem:[%s4052_s1 + $0x7a0] sm:$0xff]  ;;  %v39_v6 = vld [vmem:[%s4053_s0 + $0x68] sm:$0xff] }
  0x49   :  { %2275 = vmatpush3.bf16.msra.mxu0 %v2274_v35  ;;  %v2296_v34 = vpack.c.bf16 %v210_v29, %v209_v28  ;;  %v193_v35 = vld [vmem:[%s4052_s1 + $0x470] sm:$0xff]  ;;  %v247_v11 = vld [vmem:[%s4052_s1 + $0x620] sm:$0xff]  ;;  %v248_v12 = vld [vmem:[%s4052_s1 + $0x628] sm:$0xff] }
  0x4a   :  { %2277 = vmatprep.subr.bf16.mxu0 %v2276_v38  ;;  %v2328_v38 = vpack.c.bf16 %v242_v31, %v241_v30  ;;  %v2298_v44 = vpack.c.bf16 %v194_v36, %v193_v35  ;;  %v279_v13 = vld [vmem:[%s4052_s1 + $0x720] sm:$0xff]  ;;  %v280_v15 = vld [vmem:[%s4052_s1 + $0x728] sm:$0xff]  ;;  %v265_v16 = vld [vmem:[%s4052_s1 + $0x6b0] sm:$0xff] }
  0x4b   :  { %2307 = vmatpush3.bf16.msra.mxu1 %v2306_v37  ;;  %v225_v37 = vld [vmem:[%s4052_s1 + $0x570] sm:$0xff]  ;;  %v266_v17 = vld [vmem:[%s4052_s1 + $0x6b8] sm:$0xff]  ;;  %v267_v28 = vld [vmem:[%s4052_s1 + $0x6c0] sm:$0xff] }
  0x4c   :  { %2309 = vmatprep.subr.bf16.mxu1 %v2308_v42  ;;  %v291_v42 = vld [vmem:[%s4052_s1 + $0x780] sm:$0xff]  ;;  %v2330_v45 = vpack.c.bf16 %v226_v39, %v225_v37  ;;  %v297_v18 = vld [vmem:[%s4052_s1 + $0x7b0] sm:$0xff]  ;;  %v298_v19 = vld [vmem:[%s4052_s1 + $0x7b8] sm:$0xff] }
  0x4d   :  { %2279 = vmatpush3.bf16.msra.mxu0 %v2278_v48  ;;  %v244_v48 = vld [vmem:[%s4052_s1 + $0x608] sm:$0xff]  ;;  %v249_v23 = vld [vmem:[%s4052_s1 + $0x630] sm:$0xff]  ;;  %v250_v24 = vld [vmem:[%s4052_s1 + $0x638] sm:$0xff] }
  0x4e   :  { %2281 = vmatprep.subr.bf16.mxu0 %v2280_v50  ;;  %v2364_v50 = vpack.c.bf16 %v292_v43, %v291_v42  ;;  %v2334_v57 = vpack.c.bf16 %v244_v48, %v243_v47  ;;  %v281_v25 = vld [vmem:[%s4052_s1 + $0x730] sm:$0xff]  ;;  %v282_v27 = vld [vmem:[%s4052_s1 + $0x738] sm:$0xff]  ;;  %v268_v29 = vld [vmem:[%s4052_s1 + $0x6c8] sm:$0xff] }
  0x4f   :  { %2311 = vmatpush3.bf16.msra.mxu1 %v2310_v49  ;;  %v275_v49 = vld [vmem:[%s4052_s1 + $0x700] sm:$0xff]  ;;  %v300_v31 = vld [vmem:[%s4052_s1 + $0x7c8] sm:$0xff]  ;;  %v269_v40 = vld [vmem:[%s4052_s1 + $0x6d0] sm:$0xff] }
  0x50   :  { %2313 = vmatprep.subr.bf16.mxu1 %v2312_v54  ;;  %v293_v54 = vld [vmem:[%s4052_s1 + $0x790] sm:$0xff]  ;;  %v2366_v59 = vpack.c.bf16 %v276_v51, %v275_v49  ;;  %v299_v30 = vld [vmem:[%s4052_s1 + $0x7c0] sm:$0xff]  ;;  %v252_v36 = vld [vmem:[%s4052_s1 + $0x648] sm:$0xff] }
  0x51   :  { %2283 = vmatpush3.bf16.msra.mxu0 %v2282_v60  ;;  %v2336_v60 = vpack.c.bf16 %v262_v53, %v261_v52  ;;  %v2368_v0 = vpack.c.bf16 %v294_v55, %v293_v54  ;;  %v251_v35 = vld [vmem:[%s4052_s1 + $0x640] sm:$0xff]  ;;  %v284_v39 = vld [vmem:[%s4052_s1 + $0x748] sm:$0xff]  ;;  %v270_v41 = vld [vmem:[%s4052_s1 + $0x6d8] sm:$0xff] }
  0x52   :  { %2285 = vmatprep.subr.bf16.mxu0 %v2284_v62  ;;  %v246_v62 = vld [vmem:[%s4052_s1 + $0x618] sm:$0xff]  ;;  %v283_v37 = vld [vmem:[%s4052_s1 + $0x740] sm:$0xff]  ;;  %v301_v42 = vld [vmem:[%s4052_s1 + $0x7d0] sm:$0xff] }
  0x53   :  { %2315 = vmatpush3.bf16.msra.mxu1 %v2314_v61  ;;  %v245_v61 = vld [vmem:[%s4052_s1 + $0x610] sm:$0xff]  ;;  %v302_v43 = vld [vmem:[%s4052_s1 + $0x7d8] sm:$0xff]  ;;  %v271_v52 = vld [vmem:[%s4052_s1 + $0x6e0] sm:$0xff] }
  0x54   :  { %2317 = vmatprep.subr.bf16.mxu1 %v2316_v2  ;;  %v263_v2 = vld [vmem:[%s4052_s1 + $0x6a0] sm:$0xff]  ;;  %v2338_v7 = vpack.c.bf16 %v246_v62, %v245_v61  ;;  %v253_v47 = vld [vmem:[%s4052_s1 + $0x650] sm:$0xff]  ;;  %v254_v48 = vld [vmem:[%s4052_s1 + $0x658] sm:$0xff] }
  0x55   :  { %2287 = vmatpush3.bf16.msra.mxu0 %v2286_v8  ;;  %v41_v8 = vld [vmem:[%s4053_s0 + $0x78] sm:$0xff]  ;;  %v285_v49 = vld [vmem:[%s4052_s1 + $0x750] sm:$0xff]  ;;  %v272_v53 = vld [vmem:[%s4052_s1 + $0x6e8] sm:$0xff] }
  0x56   :  { %2289 = vmatprep.subr.bf16.mxu0 %v2288_v10  ;;  %v2340_v10 = vpack.c.bf16 %v264_v3, %v263_v2  ;;  %v286_v51 = vld [vmem:[%s4052_s1 + $0x758] sm:$0xff]  ;;  %v303_v54 = vld [vmem:[%s4052_s1 + $0x7e0] sm:$0xff]  ;;  %v304_v55 = vld [vmem:[%s4052_s1 + $0x7e8] sm:$0xff] }
  0x57   :  { %2319 = vmatpush3.bf16.msra.mxu1 %v2318_v9  ;;  %v2370_v9 = vpack.c.bf16 %v278_v1, %v277_v63  ;;  %v287_v61 = vld [vmem:[%s4052_s1 + $0x760] sm:$0xff]  ;;  %v2388_v62 = vpack.c.bf16 %v304_v55, %v303_v54  ;;  %v288_v63 = vld [vmem:[%s4052_s1 + $0x768] sm:$0xff]  ;;  %v274_v1 = vld [vmem:[%s4052_s1 + $0x6f8] sm:$0xff] }
  0x58   :  { %2321 = vmatprep.subr.bf16.mxu1 %v2320_v14  ;;  %v2372_v14 = vpack.c.bf16 %v296_v5, %v295_v4  ;;  %v305_v2 = vld [vmem:[%s4052_s1 + $0x7f0] sm:$0xff]  ;;  %v306_v3 = vld [vmem:[%s4052_s1 + $0x7f8] sm:$0xff]  ;;  %v2390_v5 = vpack.c.bf16 %v288_v63, %v287_v61 }
  0x59   :  { %2291 = vmatpush3.bf16.msra.mxu0 %v2290_v20  ;;  %v2342_v20 = vpack.c.bf16 %v248_v12, %v247_v11  ;;  %v290_v11 = vld [vmem:[%s4052_s1 + $0x778] sm:$0xff]  ;;  %v323_v12 = vld [vmem:[%s4052_s1 + $0x880] sm:$0xff]  ;;  %v361_v54 = vld [vmem:[%s4052_s1 + $0x9b0] sm:$0xff] }
  0x5a   :  { %2293 = vmatprep.subr.bf16.mxu0 %v2292_v22  ;;  %v2344_v22 = vpack.c.bf16 %v266_v17, %v265_v16  ;;  %v362_v55 = vld [vmem:[%s4052_s1 + $0x9b8] sm:$0xff]  ;;  %v345_v61 = vld [vmem:[%s4052_s1 + $0x930] sm:$0xff] }
  0x5b   :  { %2323 = vmatpush3.bf16.msra.mxu1 %v2322_v21  ;;  %v2374_v21 = vpack.c.bf16 %v280_v15, %v279_v13  ;;  %v324_v13 = vld [vmem:[%s4052_s1 + $0x888] sm:$0xff]  ;;  %v346_v63 = vld [vmem:[%s4052_s1 + $0x938] sm:$0xff] }
  0x5c   :  { %2325 = vmatprep.subr.bf16.mxu1 %v2324_v26  ;;  %v2376_v26 = vpack.c.bf16 %v298_v19, %v297_v18  ;;  %v356_v15 = vld [vmem:[%s4052_s1 + $0x988] sm:$0xff]  ;;  %v2396_v18 = vpack.c.bf16 %v324_v13, %v323_v12  ;;  %v307_v19 = vld [vmem:[%s4052_s1 + $0x800] sm:$0xff]  ;;  %v333_v12 = vld [vmem:[%s4052_s1 + $0x8d0] sm:$0xff] }
  0x5d   :  { %2295 = vmatpush3.bf16.msra.mxu0 %v2294_v32  ;;  %v2346_v32 = vpack.c.bf16 %v250_v24, %v249_v23  ;;  %v340_v23 = vld [vmem:[%s4052_s1 + $0x908] sm:$0xff]  ;;  %v325_v24 = vld [vmem:[%s4052_s1 + $0x890] sm:$0xff]  ;;  %v334_v13 = vld [vmem:[%s4052_s1 + $0x8d8] sm:$0xff] }
  0x5e   :  { %2297 = vmatprep.subr.bf16.mxu0 %v2296_v34  ;;  %v2348_v34 = vpack.c.bf16 %v268_v29, %v267_v28  ;;  %v38_v28 = vld [vmem:[%s4053_s0 + $0x60] sm:$0xff] }
  0x5f   :  { %2327 = vmatpush3.bf16.msra.mxu1 %v2326_v33  ;;  %v2378_v33 = vpack.c.bf16 %v282_v27, %v281_v25  ;;  %v326_v25 = vld [vmem:[%s4052_s1 + $0x898] sm:$0xff] }
  0x60   :  { %2329 = vmatprep.subr.bf16.mxu1 %v2328_v38  ;;  %v2380_v38 = vpack.c.bf16 %v300_v31, %v299_v30  ;;  %v358_v27 = vld [vmem:[%s4052_s1 + $0x998] sm:$0xff]  ;;  %v40_v30 = vld [vmem:[%s4053_s0 + $0x70] sm:$0xff] }
  0x61   :  { %2299 = vmatpush3.bf16.msra.mxu0 %v2298_v44  ;;  %v2350_v44 = vpack.c.bf16 %v252_v36, %v251_v35  ;;  %v341_v35 = vld [vmem:[%s4052_s1 + $0x910] sm:$0xff] }
  0x62   :  { %2333 = vmatprep.subr.bf16.mxu0 %v2332_v46  ;;  %v2352_v46 = vpack.c.bf16 %v270_v41, %v269_v40  ;;  %v359_v40 = vld [vmem:[%s4052_s1 + $0x9a0] sm:$0xff]  ;;  %v360_v41 = vld [vmem:[%s4052_s1 + $0x9a8] sm:$0xff] }
  0x63   :  { %2331 = vmatpush3.bf16.msra.mxu1 %v2330_v45  ;;  %v2382_v45 = vpack.c.bf16 %v284_v39, %v283_v37  ;;  %v342_v37 = vld [vmem:[%s4052_s1 + $0x918] sm:$0xff]  ;;  %v328_v39 = vld [vmem:[%s4052_s1 + $0x8a8] sm:$0xff] }
  0x64   :  { %2365 = vmatprep.subr.bf16.mxu1 %v2364_v50  ;;  %803 = vmatmul.mubr.f32.vlgmr.msra.gmra.mrb[4].mxu0 %v34_v56  ;;  %v2384_v50 = vpack.c.bf16 %v302_v43, %v301_v42  ;;  %v2354_v56 = vpack.c.bf16 %v254_v48, %v253_v47  ;;  %v43_v42 = vld [vmem:[%s4053_s0 + $0x88] sm:$0xff]  ;;  %v311_v47 = vld [vmem:[%s4052_s1 + $0x820] sm:$0xff] }
  0x65   :  { %2335 = vmatpush3.bf16.msra.mxu0 %v2334_v57  ;;  %942 = vmatprep.mubr.f32.mxu0 %v39_v6  ;;  %v2386_v57 = vpack.c.bf16 %v286_v51, %v285_v49  ;;  %v312_v48 = vld [vmem:[%s4052_s1 + $0x828] sm:$0xff]  ;;  %v343_v49 = vld [vmem:[%s4052_s1 + $0x920] sm:$0xff] }
  0x66   :  { %873 = vmatmul.mubr.f32.vlgmr.msra.gmra.mrb[4].mxu1 %v36_v58  ;;  %2337 = vmatprep.subr.bf16.mxu0 %v2336_v60  ;;  %v2356_v58 = vpack.c.bf16 %v272_v53, %v271_v52  ;;  %v256_v60 = vld [vmem:[%s4052_s1 + $0x668] sm:$0xff]  ;;  %v329_v52 = vld [vmem:[%s4052_s1 + $0x8b0] sm:$0xff]  ;;  %v330_v53 = vld [vmem:[%s4052_s1 + $0x8b8] sm:$0xff] }
  0x67   :  { %2367 = vmatpush3.bf16.msra.mxu1 %v2366_v59  ;;  %1012 = vmatprep.mubr.f32.mxu1 %v41_v8  ;;  %v255_v59 = vld [vmem:[%s4052_s1 + $0x660] sm:$0xff]  ;;  %v258_v8 = vld [vmem:[%s4052_s1 + $0x678] sm:$0xff]  ;;  %v344_v51 = vld [vmem:[%s4052_s1 + $0x928] sm:$0xff] }
  0x68   :  { %2369 = vmatprep.subr.bf16.mxu1 %v2368_v0  ;;  %v273_v0 = vld [vmem:[%s4052_s1 + $0x6f0] sm:$0xff]  ;;  %v2358_v4 = vpack.c.bf16 %v256_v60, %v255_v59  ;;  %v314_v60 = vld [vmem:[%s4052_s1 + $0x838] sm:$0xff] }
  0x69   :  { %2339 = vmatpush3.bf16.msra.mxu0 %v2338_v7  ;;  %v2360_v6 = vpack.c.bf16 %v274_v1, %v273_v0  ;;  %v257_v7 = vld [vmem:[%s4052_s1 + $0x670] sm:$0xff]  ;;  %v331_v0 = vld [vmem:[%s4052_s1 + $0x8c0] sm:$0xff]  ;;  %v332_v1 = vld [vmem:[%s4052_s1 + $0x8c8] sm:$0xff] }
  0x6a   :  { %2341 = vmatprep.subr.bf16.mxu0 %v2340_v10  ;;  %v2392_v10 = vpack.c.bf16 %v306_v3, %v305_v2  ;;  %v2362_v16 = vpack.c.bf16 %v258_v8, %v257_v7  ;;  %v313_v59 = vld [vmem:[%s4052_s1 + $0x830] sm:$0xff]  ;;  %v363_v2 = vld [vmem:[%s4052_s1 + $0x9c0] sm:$0xff]  ;;  %v364_v3 = vld [vmem:[%s4052_s1 + $0x9c8] sm:$0xff] }
  0x6b   :  { %2371 = vmatpush3.bf16.msra.mxu1 %v2370_v9  ;;  %v289_v9 = vld [vmem:[%s4052_s1 + $0x770] sm:$0xff]  ;;  %v315_v7 = vld [vmem:[%s4052_s1 + $0x840] sm:$0xff]  ;;  %v316_v8 = vld [vmem:[%s4052_s1 + $0x848] sm:$0xff] }
  0x6c   :  { %2373 = vmatprep.subr.bf16.mxu1 %v2372_v14  ;;  %v355_v14 = vld [vmem:[%s4052_s1 + $0x980] sm:$0xff]  ;;  %v2394_v17 = vpack.c.bf16 %v290_v11, %v289_v9  ;;  %v348_v11 = vld [vmem:[%s4052_s1 + $0x948] sm:$0xff] }
  0x6d   :  { %2343 = vmatpush3.bf16.msra.mxu0 %v2342_v20  ;;  %v308_v20 = vld [vmem:[%s4052_s1 + $0x808] sm:$0xff]  ;;  %v347_v9 = vld [vmem:[%s4052_s1 + $0x940] sm:$0xff] }
  0x6e   :  { %2345 = vmatprep.subr.bf16.mxu0 %v2344_v22  ;;  %v2428_v22 = vpack.c.bf16 %v356_v15, %v355_v14  ;;  %v2398_v29 = vpack.c.bf16 %v308_v20, %v307_v19  ;;  %v365_v14 = vld [vmem:[%s4052_s1 + $0x9d0] sm:$0xff]  ;;  %v366_v15 = vld [vmem:[%s4052_s1 + $0x9d8] sm:$0xff] }
  0x6f   :  { %2375 = vmatpush3.bf16.msra.mxu1 %v2374_v21  ;;  %v339_v21 = vld [vmem:[%s4052_s1 + $0x900] sm:$0xff]  ;;  %v317_v19 = vld [vmem:[%s4052_s1 + $0x850] sm:$0xff]  ;;  %v318_v20 = vld [vmem:[%s4052_s1 + $0x858] sm:$0xff] }
  0x70   :  { %2377 = vmatprep.subr.bf16.mxu1 %v2376_v26  ;;  %v357_v26 = vld [vmem:[%s4052_s1 + $0x990] sm:$0xff]  ;;  %v2430_v31 = vpack.c.bf16 %v340_v23, %v339_v21  ;;  %v350_v23 = vld [vmem:[%s4052_s1 + $0x958] sm:$0xff] }
  0x71   :  { %2347 = vmatpush3.bf16.msra.mxu0 %v2346_v32  ;;  %v2400_v32 = vpack.c.bf16 %v326_v25, %v325_v24  ;;  %v2432_v36 = vpack.c.bf16 %v358_v27, %v357_v26  ;;  %v349_v21 = vld [vmem:[%s4052_s1 + $0x950] sm:$0xff]  ;;  %v335_v24 = vld [vmem:[%s4052_s1 + $0x8e0] sm:$0xff]  ;;  %v336_v25 = vld [vmem:[%s4052_s1 + $0x8e8] sm:$0xff] }
  0x72   :  { %2349 = vmatprep.subr.bf16.mxu0 %v2348_v34  ;;  %v310_v34 = vld [vmem:[%s4052_s1 + $0x818] sm:$0xff]  ;;  %v367_v26 = vld [vmem:[%s4052_s1 + $0x9e0] sm:$0xff]  ;;  %v368_v27 = vld [vmem:[%s4052_s1 + $0x9e8] sm:$0xff] }
  0x73   :  { %2379 = vmatpush3.bf16.msra.mxu1 %v2378_v33  ;;  %v309_v33 = vld [vmem:[%s4052_s1 + $0x810] sm:$0xff] }
  0x74   :  { %2381 = vmatprep.subr.bf16.mxu1 %v2380_v38  ;;  %v327_v38 = vld [vmem:[%s4052_s1 + $0x8a0] sm:$0xff]  ;;  %v2402_v43 = vpack.c.bf16 %v310_v34, %v309_v33  ;;  %v2452_v34 = vpack.c.bf16 %v368_v27, %v367_v26  ;;  %v425_v26 = vld [vmem:[%s4052_s1 + $0xbb0] sm:$0xff]  ;;  %v426_v27 = vld [vmem:[%s4052_s1 + $0xbb8] sm:$0xff] }
  0x75   :  { %2351 = vmatpush3.bf16.msra.mxu0 %v2350_v44  ;;  %v45_v44 = vld [vmem:[%s4053_s0 + $0x98] sm:$0xff]  ;;  %v351_v33 = vld [vmem:[%s4052_s1 + $0x960] sm:$0xff] }
  0x76   :  { %2353 = vmatprep.subr.bf16.mxu0 %v2352_v46  ;;  %v2404_v46 = vpack.c.bf16 %v328_v39, %v327_v38  ;;  %v369_v38 = vld [vmem:[%s4052_s1 + $0x9f0] sm:$0xff]  ;;  %v370_v39 = vld [vmem:[%s4052_s1 + $0x9f8] sm:$0xff] }
  0x77   :  { %2383 = vmatpush3.bf16.msra.mxu1 %v2382_v45  ;;  %v2434_v45 = vpack.c.bf16 %v342_v37, %v341_v35  ;;  %v352_v35 = vld [vmem:[%s4052_s1 + $0x968] sm:$0xff]  ;;  %v338_v37 = vld [vmem:[%s4052_s1 + $0x8f8] sm:$0xff] }
  0x78   :  { %2385 = vmatprep.subr.bf16.mxu1 %v2384_v50  ;;  %v2436_v50 = vpack.c.bf16 %v360_v41, %v359_v40  ;;  %v2454_v41 = vpack.c.bf16 %v352_v35, %v351_v33  ;;  %v409_v33 = vld [vmem:[%s4052_s1 + $0xb30] sm:$0xff]  ;;  %v410_v35 = vld [vmem:[%s4052_s1 + $0xb38] sm:$0xff] }
  0x79   :  { %2355 = vmatpush3.bf16.msra.mxu0 %v2354_v56  ;;  %v2406_v56 = vpack.c.bf16 %v312_v48, %v311_v47  ;;  %v354_v47 = vld [vmem:[%s4052_s1 + $0x978] sm:$0xff]  ;;  %v387_v48 = vld [vmem:[%s4052_s1 + $0xa80] sm:$0xff] }
  0x7a   :  { %2357 = vmatprep.subr.bf16.mxu0 %v2356_v58  ;;  %v2408_v58 = vpack.c.bf16 %v330_v53, %v329_v52 }
  0x7b   :  { %2387 = vmatpush3.bf16.msra.mxu1 %v2386_v57  ;;  %v2438_v57 = vpack.c.bf16 %v344_v51, %v343_v49  ;;  %v388_v49 = vld [vmem:[%s4052_s1 + $0xa88] sm:$0xff] }
  0x7c   :  { %2389 = vmatprep.subr.bf16.mxu1 %v2388_v62  ;;  %v2440_v62 = vpack.c.bf16 %v362_v55, %v361_v54  ;;  %v420_v51 = vld [vmem:[%s4052_s1 + $0xb88] sm:$0xff]  ;;  %v2460_v54 = vpack.c.bf16 %v388_v49, %v387_v48  ;;  %v371_v55 = vld [vmem:[%s4052_s1 + $0xa00] sm:$0xff]  ;;  %v397_v48 = vld [vmem:[%s4052_s1 + $0xad0] sm:$0xff] }
  0x7d   :  { %2359 = vmatpush3.bf16.msra.mxu0 %v2358_v4  ;;  %v2410_v4 = vpack.c.bf16 %v314_v60, %v313_v59  ;;  %v404_v59 = vld [vmem:[%s4052_s1 + $0xb08] sm:$0xff]  ;;  %v389_v60 = vld [vmem:[%s4052_s1 + $0xa90] sm:$0xff]  ;;  %v398_v49 = vld [vmem:[%s4052_s1 + $0xad8] sm:$0xff] }
  0x7e   :  { %2361 = vmatprep.subr.bf16.mxu0 %v2360_v6  ;;  %v2412_v6 = vpack.c.bf16 %v332_v1, %v331_v0  ;;  %v42_v0 = vld [vmem:[%s4053_s0 + $0x80] sm:$0xff] }
  0x7f   :  { %2391 = vmatpush3.bf16.msra.mxu1 %v2390_v5  ;;  %v2442_v5 = vpack.c.bf16 %v346_v63, %v345_v61  ;;  %v390_v61 = vld [vmem:[%s4052_s1 + $0xa98] sm:$0xff] }
  0x80   :  { %2393 = vmatprep.subr.bf16.mxu1 %v2392_v10  ;;  %v2444_v10 = vpack.c.bf16 %v364_v3, %v363_v2  ;;  %v422_v63 = vld [vmem:[%s4052_s1 + $0xb98] sm:$0xff]  ;;  %v44_v2 = vld [vmem:[%s4053_s0 + $0x90] sm:$0xff] }
  0x81   :  { %2363 = vmatpush3.bf16.msra.mxu0 %v2362_v16  ;;  %v2414_v16 = vpack.c.bf16 %v316_v8, %v315_v7  ;;  %v405_v7 = vld [vmem:[%s4052_s1 + $0xb10] sm:$0xff] }
  0x82   :  { %2397 = vmatprep.subr.bf16.mxu0 %v2396_v18  ;;  %v2416_v18 = vpack.c.bf16 %v334_v13, %v333_v12  ;;  %v423_v12 = vld [vmem:[%s4052_s1 + $0xba0] sm:$0xff]  ;;  %v424_v13 = vld [vmem:[%s4052_s1 + $0xba8] sm:$0xff] }
  0x83   :  { %2395 = vmatpush3.bf16.msra.mxu1 %v2394_v17  ;;  %v2446_v17 = vpack.c.bf16 %v348_v11, %v347_v9  ;;  %v406_v9 = vld [vmem:[%s4052_s1 + $0xb18] sm:$0xff]  ;;  %v392_v11 = vld [vmem:[%s4052_s1 + $0xaa8] sm:$0xff] }
  0x84   :  { %2429 = vmatprep.subr.bf16.mxu1 %v2428_v22  ;;  %943 = vmatmul.mubr.f32.vlgmr.msra.gmra.mrb[6].mxu0 %v38_v28  ;;  %v2448_v22 = vpack.c.bf16 %v366_v15, %v365_v14  ;;  %v2418_v28 = vpack.c.bf16 %v318_v20, %v317_v19  ;;  %v47_v14 = vld [vmem:[%s4053_s0 + $0xa8] sm:$0xff]  ;;  %v375_v19 = vld [vmem:[%s4052_s1 + $0xa20] sm:$0xff] }
  0x85   :  { %2399 = vmatpush3.bf16.msra.mxu0 %v2398_v29  ;;  %1082 = vmatprep.mubr.f32.mxu0 %v43_v42  ;;  %v2450_v29 = vpack.c.bf16 %v350_v23, %v349_v21  ;;  %v376_v20 = vld [vmem:[%s4052_s1 + $0xa28] sm:$0xff]  ;;  %v407_v21 = vld [vmem:[%s4052_s1 + $0xb20] sm:$0xff] }
  0x86   :  { %1013 = vmatmul.mubr.f32.vlgmr.msra.gmra.mrb[6].mxu1 %v40_v30  ;;  %2401 = vmatprep.subr.bf16.mxu0 %v2400_v32  ;;  %v2420_v30 = vpack.c.bf16 %v336_v25, %v335_v24  ;;  %v320_v32 = vld [vmem:[%s4052_s1 + $0x868] sm:$0xff]  ;;  %v393_v24 = vld [vmem:[%s4052_s1 + $0xab0] sm:$0xff]  ;;  %v394_v25 = vld [vmem:[%s4052_s1 + $0xab8] sm:$0xff] }
  0x87   :  { %2431 = vmatpush3.bf16.msra.mxu1 %v2430_v31  ;;  %1152 = vmatprep.mubr.f32.mxu1 %v45_v44  ;;  %v319_v31 = vld [vmem:[%s4052_s1 + $0x860] sm:$0xff]  ;;  %v322_v44 = vld [vmem:[%s4052_s1 + $0x878] sm:$0xff]  ;;  %v408_v23 = vld [vmem:[%s4052_s1 + $0xb28] sm:$0xff] }
  0x88   :  { %2433 = vmatprep.subr.bf16.mxu1 %v2432_v36  ;;  %v337_v36 = vld [vmem:[%s4052_s1 + $0x8f0] sm:$0xff]  ;;  %v2422_v40 = vpack.c.bf16 %v320_v32, %v319_v31  ;;  %v378_v32 = vld [vmem:[%s4052_s1 + $0xa38] sm:$0xff] }
  0x89   :  { %2403 = vmatpush3.bf16.msra.mxu0 %v2402_v43  ;;  %v2424_v42 = vpack.c.bf16 %v338_v37, %v337_v36  ;;  %v321_v43 = vld [vmem:[%s4052_s1 + $0x870] sm:$0xff]  ;;  %v395_v36 = vld [vmem:[%s4052_s1 + $0xac0] sm:$0xff]  ;;  %v396_v37 = vld [vmem:[%s4052_s1 + $0xac8] sm:$0xff] }
  0x8a   :  { %2405 = vmatprep.subr.bf16.mxu0 %v2404_v46  ;;  %v2456_v46 = vpack.c.bf16 %v370_v39, %v369_v38  ;;  %v2426_v52 = vpack.c.bf16 %v322_v44, %v321_v43  ;;  %v377_v31 = vld [vmem:[%s4052_s1 + $0xa30] sm:$0xff]  ;;  %v427_v38 = vld [vmem:[%s4052_s1 + $0xbc0] sm:$0xff]  ;;  %v428_v39 = vld [vmem:[%s4052_s1 + $0xbc8] sm:$0xff] }
  0x8b   :  { %2435 = vmatpush3.bf16.msra.mxu1 %v2434_v45  ;;  %v353_v45 = vld [vmem:[%s4052_s1 + $0x970] sm:$0xff]  ;;  %v379_v43 = vld [vmem:[%s4052_s1 + $0xa40] sm:$0xff]  ;;  %v380_v44 = vld [vmem:[%s4052_s1 + $0xa48] sm:$0xff] }
  0x8c   :  { %2437 = vmatprep.subr.bf16.mxu1 %v2436_v50  ;;  %v419_v50 = vld [vmem:[%s4052_s1 + $0xb80] sm:$0xff]  ;;  %v2458_v53 = vpack.c.bf16 %v354_v47, %v353_v45  ;;  %v412_v47 = vld [vmem:[%s4052_s1 + $0xb48] sm:$0xff] }
  0x8d   :  { %2407 = vmatpush3.bf16.msra.mxu0 %v2406_v56  ;;  %v372_v56 = vld [vmem:[%s4052_s1 + $0xa08] sm:$0xff]  ;;  %v411_v45 = vld [vmem:[%s4052_s1 + $0xb40] sm:$0xff] }
  0x8e   :  { %2409 = vmatprep.subr.bf16.mxu0 %v2408_v58  ;;  %v2492_v58 = vpack.c.bf16 %v420_v51, %v419_v50  ;;  %v2462_v1 = vpack.c.bf16 %v372_v56, %v371_v55  ;;  %v429_v50 = vld [vmem:[%s4052_s1 + $0xbd0] sm:$0xff]  ;;  %v430_v51 = vld [vmem:[%s4052_s1 + $0xbd8] sm:$0xff] }
  0x8f   :  { %2439 = vmatpush3.bf16.msra.mxu1 %v2438_v57  ;;  %v403_v57 = vld [vmem:[%s4052_s1 + $0xb00] sm:$0xff]  ;;  %v381_v55 = vld [vmem:[%s4052_s1 + $0xa50] sm:$0xff]  ;;  %v382_v56 = vld [vmem:[%s4052_s1 + $0xa58] sm:$0xff] }
  0x90   :  { %2441 = vmatprep.subr.bf16.mxu1 %v2440_v62  ;;  %v421_v62 = vld [vmem:[%s4052_s1 + $0xb90] sm:$0xff]  ;;  %v2494_v3 = vpack.c.bf16 %v404_v59, %v403_v57  ;;  %v414_v59 = vld [vmem:[%s4052_s1 + $0xb58] sm:$0xff] }
  0x91   :  { %2411 = vmatpush3.bf16.msra.mxu0 %v2410_v4  ;;  %v2464_v4 = vpack.c.bf16 %v390_v61, %v389_v60  ;;  %v2496_v8 = vpack.c.bf16 %v422_v63, %v421_v62  ;;  %v413_v57 = vld [vmem:[%s4052_s1 + $0xb50] sm:$0xff]  ;;  %v399_v60 = vld [vmem:[%s4052_s1 + $0xae0] sm:$0xff]  ;;  %v400_v61 = vld [vmem:[%s4052_s1 + $0xae8] sm:$0xff] }
  0x92   :  { %2413 = vmatprep.subr.bf16.mxu0 %v2412_v6  ;;  %v374_v6 = vld [vmem:[%s4052_s1 + $0xa18] sm:$0xff]  ;;  %v431_v62 = vld [vmem:[%s4052_s1 + $0xbe0] sm:$0xff]  ;;  %v432_v63 = vld [vmem:[%s4052_s1 + $0xbe8] sm:$0xff] }
  0x93   :  { %2443 = vmatpush3.bf16.msra.mxu1 %v2442_v5  ;;  %v373_v5 = vld [vmem:[%s4052_s1 + $0xa10] sm:$0xff] }
  0x94   :  { %2445 = vmatprep.subr.bf16.mxu1 %v2444_v10  ;;  %v391_v10 = vld [vmem:[%s4052_s1 + $0xaa0] sm:$0xff]  ;;  %v2466_v15 = vpack.c.bf16 %v374_v6, %v373_v5  ;;  %v2516_v6 = vpack.c.bf16 %v432_v63, %v431_v62 }
  0x95   :  { %2415 = vmatpush3.bf16.msra.mxu0 %v2414_v16  ;;  %v49_v16 = vld [vmem:[%s4053_s0 + $0xb8] sm:$0xff]  ;;  %v415_v5 = vld [vmem:[%s4052_s1 + $0xb60] sm:$0xff] }
  0x96   :  { %2417 = vmatprep.subr.bf16.mxu0 %v2416_v18  ;;  %v2468_v18 = vpack.c.bf16 %v392_v11, %v391_v10  ;;  %v433_v10 = vld [vmem:[%s4052_s1 + $0xbf0] sm:$0xff]  ;;  %v434_v11 = vld [vmem:[%s4052_s1 + $0xbf8] sm:$0xff] }
  0x97   :  { %2447 = vmatpush3.bf16.msra.mxu1 %v2446_v17  ;;  %v2498_v17 = vpack.c.bf16 %v406_v9, %v405_v7  ;;  %v416_v7 = vld [vmem:[%s4052_s1 + $0xb68] sm:$0xff]  ;;  %v402_v9 = vld [vmem:[%s4052_s1 + $0xaf8] sm:$0xff] }
  0x98   :  { %2449 = vmatprep.subr.bf16.mxu1 %v2448_v22  ;;  %v2500_v22 = vpack.c.bf16 %v424_v13, %v423_v12  ;;  %v2518_v13 = vpack.c.bf16 %v416_v7, %v415_v5  ;;  %v1372_v7 = vld [vmem:[%s4055_s3 + $0x18] sm:$0xff] }
  0x99   :  { %2419 = vmatpush3.bf16.msra.mxu0 %v2418_v28  ;;  %v2470_v28 = vpack.c.bf16 %v376_v20, %v375_v19  ;;  %v418_v19 = vld [vmem:[%s4052_s1 + $0xb78] sm:$0xff] }
  0x9a   :  { %2421 = vmatprep.subr.bf16.mxu0 %v2420_v30  ;;  %v2472_v30 = vpack.c.bf16 %v394_v25, %v393_v24  ;;  %v46_v24 = vld [vmem:[%s4053_s0 + $0xa0] sm:$0xff] }
  0x9b   :  { %2451 = vmatpush3.bf16.msra.mxu1 %v2450_v29  ;;  %v2502_v29 = vpack.c.bf16 %v408_v23, %v407_v21  ;;  %v436_v23 = vld [vmem:[%s4052_s1 + $0xc08] sm:$0xff] }
  0x9c   :  { %2453 = vmatprep.subr.bf16.mxu1 %v2452_v34  ;;  %v2504_v34 = vpack.c.bf16 %v426_v27, %v425_v26  ;;  %v2599_v26 = vmov 0.0|0.0   ;;  %v48_v27 = vld [vmem:[%s4053_s0 + $0xb0] sm:$0xff] }
  0x9d   :  { %2423 = vmatpush3.bf16.msra.mxu0 %v2422_v40  ;;  %v2474_v40 = vpack.c.bf16 %v378_v32, %v377_v31  ;;  %v439_v31 = vld [vmem:[%s4052_s1 + $0xc20] sm:$0xff]  ;;  %v440_v32 = vld [vmem:[%s4052_s1 + $0xc28] sm:$0xff] }
  0x9e   :  { %2425 = vmatprep.subr.bf16.mxu0 %v2424_v42  ;;  %v2476_v42 = vpack.c.bf16 %v396_v37, %v395_v36  ;;  %v442_v36 = vld [vmem:[%s4052_s1 + $0xc38] sm:$0xff] }
  0x9f   :  { %2455 = vmatpush3.bf16.msra.mxu1 %v2454_v41  ;;  %v2506_v41 = vpack.c.bf16 %v410_v35, %v409_v33  ;;  %v2601_v33 = vmov 0.0   ;;  %v441_v35 = vld [vmem:[%s4052_s1 + $0xc30] sm:$0xff] }
  0xa0   :  { %2457 = vmatprep.subr.bf16.mxu1 %v2456_v46  ;;  %v2508_v46 = vpack.c.bf16 %v428_v39, %v427_v38  ;;  %v2534_v37 = vpack.c.bf16 %v442_v36, %v441_v35  ;;  %v443_v38 = vld [vmem:[%s4052_s1 + $0xc40] sm:$0xff]  ;;  %v444_v39 = vld [vmem:[%s4052_s1 + $0xc48] sm:$0xff] }
  0xa1   :  { %2427 = vmatpush3.bf16.msra.mxu0 %v2426_v52  ;;  %v2478_v52 = vpack.c.bf16 %v380_v44, %v379_v43  ;;  %v447_v44 = vld [vmem:[%s4052_s1 + $0xc60] sm:$0xff] }
  0xa2   :  { %2461 = vmatprep.subr.bf16.mxu0 %v2460_v54  ;;  %v2480_v54 = vpack.c.bf16 %v398_v49, %v397_v48  ;;  %v450_v48 = vld [vmem:[%s4052_s1 + $0xc78] sm:$0xff] }
  0xa3   :  { %2459 = vmatpush3.bf16.msra.mxu1 %v2458_v53  ;;  %v2510_v53 = vpack.c.bf16 %v412_v47, %v411_v45  ;;  %v448_v45 = vld [vmem:[%s4052_s1 + $0xc68] sm:$0xff]  ;;  %v449_v47 = vld [vmem:[%s4052_s1 + $0xc70] sm:$0xff] }
  0xa4   :  { %2493 = vmatprep.subr.bf16.mxu1 %v2492_v58  ;;  %1083 = vmatmul.mubr.f32.vlgmr.msra.gmra.mrb[8].mxu0 %v42_v0  ;;  %v2512_v58 = vpack.c.bf16 %v430_v51, %v429_v50  ;;  %v2482_v0 = vpack.c.bf16 %v382_v56, %v381_v55  ;;  %v2546_v49 = vpack.c.bf16 %v450_v48, %v449_v47  ;;  %v50_v50 = vld [vmem:[%s4053_s0 + $0xc0] sm:$0xff]  ;;  %v1470_v47 = vld [vmem:[%s4056_s5 + $0x38] sm:$0xff] }
  0xa5   :  { %2463 = vmatpush3.bf16.msra.mxu0 %v2462_v1  ;;  %1222 = vmatprep.mubr.f32.mxu0 %v47_v14  ;;  %v2514_v1 = vpack.c.bf16 %v414_v59, %v413_v57 }
  0xa6   :  { %1153 = vmatmul.mubr.f32.vlgmr.msra.gmra.mrb[8].mxu1 %v44_v2  ;;  %2465 = vmatprep.subr.bf16.mxu0 %v2464_v4  ;;  %v2484_v2 = vpack.c.bf16 %v400_v61, %v399_v60  ;;  %v384_v4 = vld [vmem:[%s4052_s1 + $0xa68] sm:$0xff] }
  0xa7   :  { %2495 = vmatpush3.bf16.msra.mxu1 %v2494_v3  ;;  %1292 = vmatprep.mubr.f32.mxu1 %v49_v16  ;;  %v383_v3 = vld [vmem:[%s4052_s1 + $0xa60] sm:$0xff]  ;;  %v386_v16 = vld [vmem:[%s4052_s1 + $0xa78] sm:$0xff] }
  0xa8   :  { %2497 = vmatprep.subr.bf16.mxu1 %v2496_v8  ;;  %v401_v8 = vld [vmem:[%s4052_s1 + $0xaf0] sm:$0xff]  ;;  %v2486_v12 = vpack.c.bf16 %v384_v4, %v383_v3  ;;  %v1370_v3 = vld [vmem:[%s4055_s3 + $0x8] sm:$0xff] }
  0xa9   :  { %2467 = vmatpush3.bf16.msra.mxu0 %v2466_v15  ;;  %v2488_v14 = vpack.c.bf16 %v402_v9, %v401_v8  ;;  %v385_v15 = vld [vmem:[%s4052_s1 + $0xa70] sm:$0xff] }
  0xaa   :  { %2469 = vmatprep.subr.bf16.mxu0 %v2468_v18  ;;  %v417_v18 = vld [vmem:[%s4052_s1 + $0xb70] sm:$0xff]  ;;  %v2490_v20 = vpack.c.bf16 %v386_v16, %v385_v15  ;;  %v1377_v16 = vld [vmem:[%s4055_s3 + $0x40] sm:$0xff] }
  0xab   :  { %2499 = vmatpush3.bf16.msra.mxu1 %v2498_v17  ;;  %v2520_v17 = vpack.c.bf16 %v434_v11, %v433_v10  ;;  %v2522_v21 = vpack.c.bf16 %v418_v19, %v417_v18  ;;  %v1373_v10 = vld [vmem:[%s4055_s3 + $0x20] sm:$0xff]  ;;  %v1374_v11 = vld [vmem:[%s4055_s3 + $0x28] sm:$0xff]  ;;  %v1379_v19 = vld [vmem:[%s4055_s3 + $0x50] sm:$0xff] }
  0xac   :  { %2501 = vmatprep.subr.bf16.mxu1 %v2500_v22  ;;  %v435_v22 = vld [vmem:[%s4052_s1 + $0xc00] sm:$0xff] }
  0xad   :  { %2471 = vmatpush3.bf16.msra.mxu0 %v2470_v28  ;;  %v2525_v25 = vpack.c.bf16 %v436_v23, %v435_v22  ;;  %v437_v28 = vld [vmem:[%s4052_s1 + $0xc10] sm:$0xff]  ;;  %v1381_v22 = vld [vmem:[%s4055_s3 + $0x60] sm:$0xff]  ;;  %v1382_v23 = vld [vmem:[%s4055_s3 + $0x68] sm:$0xff] }
  0xae   :  { %2473 = vmatprep.subr.bf16.mxu0 %v2472_v30 }
  0xaf   :  { %2503 = vmatpush3.bf16.msra.mxu1 %v2502_v29  ;;  %v438_v29 = vld [vmem:[%s4052_s1 + $0xc18] sm:$0xff] }
  0xb0   :  { %2505 = vmatprep.subr.bf16.mxu1 %v2504_v34  ;;  %v2528_v30 = vpack.c.bf16 %v438_v29, %v437_v28  ;;  %v2531_v34 = vpack.c.bf16 %v440_v32, %v439_v31 }
  0xb1   :  { %2475 = vmatpush3.bf16.msra.mxu0 %v2474_v40  ;;  %v2537_v40 = vpack.c.bf16 %v444_v39, %v443_v38  ;;  %v1464_v38 = vld [vmem:[%s4056_s5 + $0x8] sm:$0xff]  ;;  %v1465_v39 = vld [vmem:[%s4056_s5 + $0x10] sm:$0xff] }
  0xb2   :  { %2477 = vmatprep.subr.bf16.mxu0 %v2476_v42  ;;  %v446_v42 = vld [vmem:[%s4052_s1 + $0xc58] sm:$0xff] }
  0xb3   :  { %2507 = vmatpush3.bf16.msra.mxu1 %v2506_v41  ;;  %v445_v41 = vld [vmem:[%s4052_s1 + $0xc50] sm:$0xff] }
  0xb4   :  { %2509 = vmatprep.subr.bf16.mxu1 %v2508_v46  ;;  %v2540_v43 = vpack.c.bf16 %v446_v42, %v445_v41  ;;  %v2543_v46 = vpack.c.bf16 %v448_v45, %v447_v44  ;;  %v1466_v41 = vld [vmem:[%s4056_s5 + $0x18] sm:$0xff]  ;;  %v1468_v44 = vld [vmem:[%s4056_s5 + $0x28] sm:$0xff] }
  0xb5   :  { %2479 = vmatpush3.bf16.msra.mxu0 %v2478_v52  ;;  %v1561_v52 = vld [vmem:[%s4054_s2] ss:$0 sm:$0xff]  ;;  %v2576_v42 = vpack.c.bf16 %v1466_v41, %v1465_v39 }
  0xb6   :  { %2481 = vmatprep.subr.bf16.mxu0 %v2480_v54 }
  0xb7   :  { %2511 = vmatpush3.bf16.msra.mxu1 %v2510_v53 }
  0xb8   :  { %2513 = vmatprep.subr.bf16.mxu1 %v2512_v58 }
  0xb9   :  { %2483 = vmatpush3.bf16.msra.mxu0 %v2482_v0 }
  0xba   :  { %2485 = vmatprep.subr.bf16.mxu0 %v2484_v2  ;;  %v1369_v2 = vld [vmem:[%s4055_s3] sm:$0xff] }
  0xbb   :  { %2515 = vmatpush3.bf16.msra.mxu1 %v2514_v1  ;;  %v2549_v5 = vpack.c.bf16 %v1370_v3, %v1369_v2 }
  0xbc   :  { %2517 = vmatprep.subr.bf16.mxu1 %v2516_v6  ;;  %v1371_v6 = vld [vmem:[%s4055_s3 + $0x10] sm:$0xff] }
  0xbd   :  { %2487 = vmatpush3.bf16.msra.mxu0 %v2486_v12  ;;  %v2552_v9 = vpack.c.bf16 %v1372_v7, %v1371_v6  ;;  %v2555_v12 = vpack.c.bf16 %v1374_v11, %v1373_v10 }
  0xbe   :  { %2489 = vmatprep.subr.bf16.mxu0 %v2488_v14  ;;  %v1376_v14 = vld [vmem:[%s4055_s3 + $0x38] sm:$0xff] }
  0xbf   :  { %2519 = vmatpush3.bf16.msra.mxu1 %v2518_v13  ;;  %v1375_v13 = vld [vmem:[%s4055_s3 + $0x30] sm:$0xff] }
  0xc0   :  { %2521 = vmatprep.subr.bf16.mxu1 %v2520_v17  ;;  %v2558_v15 = vpack.c.bf16 %v1376_v14, %v1375_v13  ;;  %v1378_v17 = vld [vmem:[%s4055_s3 + $0x48] sm:$0xff] }
  0xc1   :  { %2491 = vmatpush3.bf16.msra.mxu0 %v2490_v20  ;;  %v2561_v18 = vpack.c.bf16 %v1378_v17, %v1377_v16  ;;  %v1380_v20 = vld [vmem:[%s4055_s3 + $0x58] sm:$0xff] }
  0xc2   :  { %2524 = vmatprep.subr.bf16.mxu0 %v2599_v26 }
  0xc3   :  { %2523 = vmatpush3.bf16.msra.mxu1 %v2522_v21  ;;  %v2564_v21 = vpack.c.bf16 %v1380_v20, %v1379_v19 }
  0xc4   :  { %2548 = vmatprep.subr.bf16.mxu1 %v2599_v26  ;;  %1223 = vmatmul.mubr.f32.vlgmr.msra.gmra.mrb[10].mxu0 %v46_v24  ;;  %v2567_v24 = vpack.c.bf16 %v1382_v23, %v1381_v22  ;;  %v1478_v22 = vld [vmem:[%s4056_s5 + $0x78] sm:$0xff] }
  0xc5   :  { %2526 = vmatpush3.bf16.msra.mxu0 %v2525_v25  ;;  %2067 = vmatprep.mubr.msk.f32.mxu0 %vm2600_vm0, %v2601_v33  ;;  %v1383_v25 = vld [vmem:[%s4055_s3 + $0x70] sm:$0xff] }
  0xc6   :  { %1293 = vmatmul.mubr.f32.vlgmr.msra.gmra.mrb[10].mxu1 %v48_v27  ;;  %2527 = vmatprep.subr.bf16.mxu0 %v2599_v26  ;;  %v1384_v27 = vld [vmem:[%s4055_s3 + $0x78] sm:$0xff] }
  0xc7   :  { %2102 = vmatprep.mubr.msk.f32.mxu1 %vm2600_vm0, %v2601_v33  ;;  %2550 = vmatpush3.bf16.msra.mxu1 %v2549_v5  ;;  %v2570_v29 = vpack.c.bf16 %v1384_v27, %v1383_v25 }
  0xc8   :  { %2551 = vmatprep.subr.bf16.mxu1 %v2599_v26 }
  0xc9   :  { %2529 = vmatpush3.bf16.msra.mxu0 %v2528_v30 }
  0xca   :  { %2530 = vmatprep.subr.bf16.mxu0 %v2599_v26 }
  0xcb   :  { %2553 = vmatpush3.bf16.msra.mxu1 %v2552_v9 }
  0xcc   :  { %2554 = vmatprep.subr.bf16.mxu1 %v2599_v26 }
  0xcd   :  { %2532 = vmatpush3.bf16.msra.mxu0 %v2531_v34 }
  0xce   :  { %2533 = vmatprep.subr.bf16.mxu0 %v2599_v26 }
  0xcf   :  { %2556 = vmatpush3.bf16.msra.mxu1 %v2555_v12 }
  0xd0   :  { %2557 = vmatprep.subr.bf16.mxu1 %v2599_v26 }
  0xd1   :  { %2535 = vmatpush3.bf16.msra.mxu0 %v2534_v37  ;;  %v1463_v37 = vld [vmem:[%s4056_s5] sm:$0xff] }
  0xd2   :  { %2536 = vmatprep.subr.bf16.mxu0 %v2599_v26 }
  0xd3   :  { %2559 = vmatpush3.bf16.msra.mxu1 %v2558_v15 }
  0xd4   :  { %2560 = vmatprep.subr.bf16.mxu1 %v2599_v26 }
  0xd5   :  { %2538 = vmatpush3.bf16.msra.mxu0 %v2537_v40  ;;  %v2573_v40 = vpack.c.bf16 %v1464_v38, %v1463_v37 }
  0xd6   :  { %2539 = vmatprep.subr.bf16.mxu0 %v2599_v26 }
  0xd7   :  { %2562 = vmatpush3.bf16.msra.mxu1 %v2561_v18 }
  0xd8   :  { %2563 = vmatprep.subr.bf16.mxu1 %v2599_v26 }
  0xd9   :  { %2541 = vmatpush3.bf16.msra.mxu0 %v2540_v43  ;;  %v1467_v43 = vld [vmem:[%s4056_s5 + $0x20] sm:$0xff] }
  0xda   :  { %2542 = vmatprep.subr.bf16.mxu0 %v2599_v26  ;;  %v2579_v45 = vpack.c.bf16 %v1468_v44, %v1467_v43 }
  0xdb   :  { %2565 = vmatpush3.bf16.msra.mxu1 %v2564_v21  ;;  %v1477_v21 = vld [vmem:[%s4056_s5 + $0x70] sm:$0xff] }
  0xdc   :  { %2566 = vmatprep.subr.bf16.mxu1 %v2599_v26  ;;  %v2594_v23 = vpack.c.bf16 %v1478_v22, %v1477_v21 }
  0xdd   :  { %2544 = vmatpush3.bf16.msra.mxu0 %v2543_v46  ;;  %v1469_v46 = vld [vmem:[%s4056_s5 + $0x30] sm:$0xff] }
  0xde   :  { %2545 = vmatprep.subr.bf16.mxu0 %v2599_v26  ;;  %v2582_v48 = vpack.c.bf16 %v1470_v47, %v1469_v46 }
  0xdf   :  { %2568 = vmatpush3.bf16.msra.mxu1 %v2567_v24  ;;  %v1562_v24 = vld [vmem:[%s4057_s4] ss:$0 sm:$0xff] }
  0xe0   :  { %2569 = vmatprep.subr.bf16.mxu1 %v2599_v26 }
  0xe1   :  { %2547 = vmatpush3.bf16.msra.mxu0 %v2546_v49  ;;  %v1471_v49 = vld [vmem:[%s4056_s5 + $0x40] sm:$0xff] }
  0xe2   :  { %2572 = vmatprep.subr.bf16.mxu0 %v2599_v26 }
  0xe3   :  { %2571 = vmatpush3.bf16.msra.mxu1 %v2570_v29 }
  0xe4   :  { %2068 = vmatmul.mubr.f32.vlgmr.msra.gmra.mrb[12].mxu0 %v50_v50  ;;  %v1472_v50 = vld [vmem:[%s4056_s5 + $0x48] sm:$0xff] }
  0xe5   :  { %2137 = vmatprep.mubr.msk.f32.mxu0 %vm2600_vm0, %v2601_v33  ;;  %2574 = vmatpush3.bf16.msra.mxu0 %v2573_v40 }
  0xe6   :  { %2575 = vmatprep.subr.bf16.mxu0 %v2599_v26 }
  0xe9   :  { %2577 = vmatpush3.bf16.msra.mxu0 %v2576_v42 }
  0xea   :  { %2578 = vmatprep.subr.bf16.mxu0 %v2599_v26 }
  0xed   :  { %2580 = vmatpush3.bf16.msra.mxu0 %v2579_v45 }
  0xee   :  { %2581 = vmatprep.subr.bf16.mxu0 %v2599_v26 }
  0xf1   :  { %2583 = vmatpush3.bf16.msra.mxu0 %v2582_v48 }
  0xf2   :  { %2584 = vmatprep.subr.bf16.mxu0 %v2599_v26 }
  0xf7   :  { %v1596_v51 = vpop.f32.mrb[0].mxu0 }
  0xf8   :  { %v1597_v53 = vpop.f32.mrb[1].mxu0 }
  0xf9   :  { %v1631_v54 = vpop.f32.mrb[0].mxu1  ;;  %v1598_v55 = vadd.f32 %v1597_v53, %v1596_v51  ;;  %v2585_v51 = vpack.c.bf16 %v1472_v50, %v1471_v49  ;;  %v1474_v53 = vld [vmem:[%s4056_s5 + $0x58] sm:$0xff] }
  0xfa   :  { %v1632_v56 = vpop.f32.mrb[1].mxu1 }
  0xfb   :  { %v1633_v57 = vadd.f32 %v1632_v56, %v1631_v54  ;;  %v525_v58 = vadd.f32 %v1598_v55, %v1561_v52  ;;  %v1473_v52 = vld [vmem:[%s4056_s5 + $0x50] sm:$0xff]  ;;  %2586 = vmatpush3.bf16.msra.mxu0 %v2585_v51  ;;  %v1475_v55 = vld [vmem:[%s4056_s5 + $0x60] sm:$0xff]  ;;  %v1476_v56 = vld [vmem:[%s4056_s5 + $0x68] sm:$0xff] }
  0xfc   :  { %v2588_v54 = vpack.c.bf16 %v1474_v53, %v1473_v52  ;;  %2587 = vmatprep.subr.bf16.mxu0 %v2599_v26 }
  0xfd   :  { %v595_v59 = vadd.f32 %v1633_v57, %v525_v58  ;;  %v2591_v57 = vpack.c.bf16 %v1476_v56, %v1475_v55 }
  0xff   :  { %2589 = vmatpush3.bf16.msra.mxu0 %v2588_v54 }
 0x100   :  { %2590 = vmatprep.subr.bf16.mxu0 %v2599_v26 }
 0x103   :  { %2592 = vmatpush3.bf16.msra.mxu0 %v2591_v57 }
 0x104   :  { %2593 = vmatprep.subr.bf16.mxu0 %v2599_v26 }
 0x107   :  { %2595 = vmatpush3.bf16.msra.mxu0 %v2594_v23 }
 0x117   :  { %v1666_v60 = vpop.f32.mrb[2].mxu0 }
 0x118   :  { %v1667_v61 = vpop.f32.mrb[3].mxu0 }
 0x119   :  { %v1701_v62 = vpop.f32.mrb[2].mxu1  ;;  %v1668_v63 = vadd.f32 %v1667_v61, %v1666_v60 }
 0x11a   :  { %v1702_v0 = vpop.f32.mrb[3].mxu1 }
 0x11b   :  { %v1703_v1 = vadd.f32 %v1702_v0, %v1701_v62  ;;  %v665_v4 = vadd.f32 %v1668_v63, %v595_v59 }
 0x11d   :  { %v735_v8 = vadd.f32 %v1703_v1, %v665_v4 }
 0x137   :  { %v1736_v28 = vpop.f32.mrb[4].mxu0 }
 0x138   :  { %v1737_v30 = vpop.f32.mrb[5].mxu0 }
 0x139   :  { %v1771_v31 = vpop.f32.mrb[4].mxu1  ;;  %v1738_v32 = vadd.f32 %v1737_v30, %v1736_v28  ;;  %v1563_v30 = vld [vmem:[%s4058_s6] ss:$0 sm:$0xff] }
 0x13a   :  { %v1772_v33 = vpop.f32.mrb[5].mxu1 }
 0x13b   :  { %v1773_v34 = vadd.f32 %v1772_v33, %v1771_v31  ;;  %v805_v35 = vadd.f32 %v1738_v32, %v735_v8 }
 0x13d   :  { %v875_v36 = vadd.f32 %v1773_v34, %v805_v35 }
 0x157   :  { %v1806_v58 = vpop.f32.mrb[6].mxu0 }
 0x158   :  { %v1807_v59 = vpop.f32.mrb[7].mxu0 }
 0x159   :  { %v1841_v60 = vpop.f32.mrb[6].mxu1  ;;  %v1808_v61 = vadd.f32 %v1807_v59, %v1806_v58 }
 0x15a   :  { %v1842_v62 = vpop.f32.mrb[7].mxu1 }
 0x15b   :  { %v1843_v63 = vadd.f32 %v1842_v62, %v1841_v60  ;;  %v945_v0 = vadd.f32 %v1808_v61, %v875_v36 }
 0x15d   :  { %v1015_v1 = vadd.f32 %v1843_v63, %v945_v0 }
 0x177   :  { %v1876_v2 = vpop.f32.mrb[8].mxu0 }
 0x178   :  { %v1877_v3 = vpop.f32.mrb[9].mxu0 }
 0x179   :  { %v1911_v4 = vpop.f32.mrb[8].mxu1  ;;  %v1878_v5 = vadd.f32 %v1877_v3, %v1876_v2 }
 0x17a   :  { %v1912_v6 = vpop.f32.mrb[9].mxu1 }
 0x17b   :  { %v1913_v7 = vadd.f32 %v1912_v6, %v1911_v4  ;;  %v1085_v8 = vadd.f32 %v1878_v5, %v1015_v1 }
 0x17d   :  { %v1155_v9 = vadd.f32 %v1913_v7, %v1085_v8 }
 0x197   :  { %v1946_v10 = vpop.f32.mrb[10].mxu0 }
 0x198   :  { %v1947_v11 = vpop.f32.mrb[11].mxu0 }
 0x199   :  { %v1981_v12 = vpop.f32.mrb[10].mxu1  ;;  %v1948_v13 = vadd.f32 %v1947_v11, %v1946_v10 }
 0x19a   :  { %v1982_v14 = vpop.f32.mrb[11].mxu1 }
 0x19b   :  { %v1983_v15 = vadd.f32 %v1982_v14, %v1981_v12  ;;  %v1225_v16 = vadd.f32 %v1948_v13, %v1155_v9 }
 0x19d   :  { %v1295_v17 = vadd.f32 %v1983_v15, %v1225_v16 }
 0x1b7   :  { %v1364_v26 = vpop.f32.mrb[12].mxu0 }
 0x1b8   :  { %v1365_v18 = vadd.f32 %v1364_v26, %v1295_v17  ;;  %v2069_v19 = vpop.f32.mrb[13].mxu0 }
 0x1ba   :  { %v1368_v20 = vmax.f32 %v1365_v18, 0.0 }
 0x1bc   :  { %2103 = vmatmul.mubr.f32.vlgmr.msra.gmra.mrb[12].mxu1 %v1368_v20 }
 0x28f   :  { %v1458_v25 = vpop.f32.mrb[12].mxu1 }
 0x290   :  { %v1459_v27 = vadd.f32 %v1562_v24, %v1458_v25  ;;  %v2104_v28 = vpop.f32.mrb[13].mxu1 }
 0x292   :  { %v1462_v29 = vmax.f32 %v1459_v27, 0.0 }
 0x294   :  { %2138 = vmatmul.mubr.f32.vlgmr.msra.gmra.mrb[14].mxu0 %v1462_v29 }
 0x367   :  { %v1552_v31 = vpop.f32.mrb[14].mxu0 }
 0x368   :  { %v1553_v32 = vadd.f32 %v1563_v30, %v1552_v31  ;;  %v2139_v33 = vpop.f32.mrb[15].mxu0 }
 0x36a   :  { %1556 = vst [vmem:[%s4059_s7] sm:$0xff] %v1553_v32 }

</bundles_post_ra>
